<compile_context>
chip_gen: v7x
topology: tpu7x:2x2x1
jax: 0.10.0
libtpu: 0.0.40
codegen_flags: <defaults>
</compile_context>

<pallas_src>
import functools

import jax
import jax.numpy as jnp
import numpy as np
from jax.experimental import pallas as pl
from jax.experimental.pallas import tpu as pltpu


# ---------------------------------------------------------------------------
# Config (mirrors the `config` object consumed by Net.__init__/forward)
# ---------------------------------------------------------------------------
class Config:
    hidden = 32
    layers = 3
    methods = "GIN"          # -> GinConv stack
    variants = "BN"
    JK = "last"              # JumpingKnowledge('last') -> xs[-1]
    pooling = "add"          # global_add_pool
    dropout = 0.5            # eval mode -> identity
    input_dropout = "false"
    T = 2.0


NUM_CLASS = 8
EDGE_DIM = 7                 # ogbg-ppa edge features are 7-dim floats

HP = 128                     # padded hidden dim (lane-dense)
CP = 128                     # padded class dim  (lane-dense output slab)
KE = 8                       # padded edge-feature dim (sublane-aligned K)


# ---------------------------------------------------------------------------
# Pallas kernel: single invocation, all parameters VMEM-resident, layer loop
# unrolled (L is static).  MXU matmuls use bf16 operands / fp32 accumulation.
# ---------------------------------------------------------------------------
def _net_kernel(L, Hp,
                x0_ref, G_ref, St_ref, ea_ref,
                We_ref, be_ref, W1_ref, b1_ref, W2_ref, b2_ref,
                Pt_ref, Wp_ref, bp_ref,
                out_ref):
    f32 = jnp.float32
    bf16 = jnp.bfloat16

    x = x0_ref[...]                                   # (N, Hp) fp32 node state
    G = G_ref[...]                                    # (E, N)  bf16 one-hot(src)
    St = St_ref[...]                                  # (N, E)  bf16 one-hot(dst)^T

    # edge_encoder for ALL layers at once (layer-invariant input, lane-dense
    # L*Hp output): (E, 8) @ (8, L*Hp) + (1, L*Hp), fp32 accumulation.
    e_all = jnp.dot(ea_ref[...], We_ref[...],
                    preferred_element_type=f32) + be_ref[...]             # (E, L*Hp)

    for l in range(L):                                # unrolled, L is static
        e = e_all[:, l * Hp:(l + 1) * Hp]             # lane-tile-aligned view (E, Hp)
        # gather x_j = x[src] and GIN message with edge features
        xj = jnp.dot(G, x.astype(bf16), preferred_element_type=f32)       # (E, Hp)
        msg = jnp.maximum(xj + e, 0.0)
        # scatter-add aggregation to destination nodes
        aggr = jnp.dot(St, msg.astype(bf16), preferred_element_type=f32)  # (N, Hp)
        # fea_mlp(aggr + x): Linear -> ReLU -> Linear (BN affine pre-folded
        # into W2/b2 on the host).  GIN eps = 0.
        h = aggr + x
        h = jnp.dot(h.astype(bf16), W1_ref[l], preferred_element_type=f32) + b1_ref[l]
        h = jnp.maximum(h, 0.0)
        x = jnp.dot(h.astype(bf16), W2_ref[l], preferred_element_type=f32) + b2_ref[l]

    # JK='last' -> x ; global_add_pool ; graph_pred_linear (1/T pre-folded)
    pooled = jnp.dot(Pt_ref[...], x.astype(bf16),
                     preferred_element_type=f32)                          # (B, Hp)
    out_ref[...] = jnp.dot(pooled.astype(bf16), Wp_ref[...],
                           preferred_element_type=f32) + bp_ref[...]      # (B, Cp)


def net_forward_pallas(x0, G, St, ea, layers, Pt, Wp, bp, *, T,
                       hp=HP, cp=CP, ke=KE):
    """layers: dict of per-layer params stacked along axis 0 -> [L, ...]."""
    L, H, _ = layers["W1"].shape
    N, E = x0.shape[0], ea.shape[0]
    B = Pt.shape[0]
    C = Wp.shape[1]
    bf16, f32 = jnp.bfloat16, jnp.float32

    def pad_to(a, shape):
        return jnp.pad(a, [(0, s - d) for d, s in zip(a.shape, shape)])

    # --- host-side prep: bf16 pre-cast, lane padding, BN / 1/T folding -----
    # Activations / structural 0-1 matrices (0 and 1 are exact in bf16).
    x0p = pad_to(x0, (N, hp)).astype(f32)                       # (N, hp) fp32
    eap = pad_to(ea, (E, ke)).astype(bf16)                      # (E, 8)  bf16
    G16 = G.astype(bf16)                                        # (E, N)  bf16
    St16 = St.astype(bf16)                                      # (N, E)  bf16
    Pt16 = Pt.astype(bf16)                                      # (B, N)  bf16

    # Hoisted edge-encoder weights: (ke, L*hp) so one lane-dense matmul covers
    # every layer; per-layer slab l lives at columns [l*hp, (l+1)*hp).
    We_p = pad_to(layers["We"], (L, ke, hp))
    We_flat = jnp.transpose(We_p, (1, 0, 2)).reshape(ke, L * hp).astype(bf16)
    be_p = pad_to(layers["be"], (L, 1, hp))
    be_flat = jnp.transpose(be_p, (1, 0, 2)).reshape(1, L * hp).astype(f32)

    # fea_mlp weights; eval-mode BN affine folded into the second linear.
    # (gamma/beta are assumed to already contain running mean/var/eps.)
    gamma, beta = layers["gamma"], layers["beta"]
    W1p = pad_to(layers["W1"], (L, hp, hp)).astype(bf16)
    b1p = pad_to(layers["b1"], (L, 1, hp)).astype(f32)
    W2p = pad_to(layers["W2"] * gamma, (L, hp, hp)).astype(bf16)
    b2p = pad_to(layers["b2"] * gamma + beta, (L, 1, hp)).astype(f32)

    # graph_pred_linear with 1/T folded in; lane-dense padded output slab.
    Wpp = pad_to(Wp / T, (hp, cp)).astype(bf16)
    bpp = pad_to(bp / T, (1, cp)).astype(f32)

    vmem = functools.partial(pl.BlockSpec, memory_space=pltpu.MemorySpace.VMEM)
    out_p = pl.pallas_call(
        functools.partial(_net_kernel, L, hp),
        out_shape=jax.ShapeDtypeStruct((B, cp), jnp.float32),
        in_specs=[vmem()] * 13,
        out_specs=vmem(),
    )(x0p, G16, St16, eap, We_flat, be_flat,
      W1p, b1p, W2p, b2p, Pt16, Wpp, bpp)
    return out_p[:, :C]


# ---------------------------------------------------------------------------
# Pure-JAX reference (same math, fp32 HIGHEST precision, no padding/folding)
# ---------------------------------------------------------------------------
def net_forward_ref(x0, G, St, ea, layers, Pt, Wp, bp, *, T):
    hp_prec = jax.lax.Precision.HIGHEST
    dot = lambda a, b: jnp.dot(a, b, precision=hp_prec)
    x = x0
    L = layers["We"].shape[0]
    for i in range(L):
        e = dot(ea, layers["We"][i]) + layers["be"][i]
        xj = dot(G, x)
        msg = jnp.maximum(xj + e, 0.0)
        aggr = dot(St, msg)
        h = aggr + x
        h = jnp.maximum(dot(h, layers["W1"][i]) + layers["b1"][i], 0.0)
        h = dot(h, layers["W2"][i]) + layers["b2"][i]
        x = h * layers["gamma"][i] + layers["beta"][i]
    pooled = dot(Pt, x)
    return (dot(pooled, Wp) + bp) / T


# ---------------------------------------------------------------------------
if __name__ == "__main__":
    cfg = Config()
    H, L, C = cfg.hidden, cfg.layers, NUM_CLASS
    N, E, B = 128, 256, 4          # nodes, edges, graphs in the batch

    key = jax.random.PRNGKey(0)
    keys = jax.random.split(key, 16)

    # --- synthetic batched_data -------------------------------------------
    node_x = jnp.zeros((N,), dtype=jnp.int32)                 # ppa: all node ids = 0
    edge_index = jax.random.randint(keys[0], (2, E), 0, N, dtype=jnp.int32)
    edge_attr = jax.random.uniform(keys[1], (E, EDGE_DIM), dtype=jnp.float32)
    batch = jnp.repeat(jnp.arange(B, dtype=jnp.int32), N // B)

    # --- deterministic parameters (shapes follow Net.__init__) -------------
    emb = 0.1 * jax.random.normal(keys[2], (1, H), jnp.float32)          # Embedding(1, H)
    layers = {
        "We":    0.1 * jax.random.normal(keys[3], (L, EDGE_DIM, H), jnp.float32),
        "be":    0.01 * jax.random.normal(keys[4], (L, 1, H), jnp.float32),
        "W1":    0.1 * jax.random.normal(keys[5], (L, H, H), jnp.float32),
        "b1":    0.01 * jax.random.normal(keys[6], (L, 1, H), jnp.float32),
        "W2":    0.1 * jax.random.normal(keys[7], (L, H, H), jnp.float32),
        "b2":    0.01 * jax.random.normal(keys[8], (L, 1, H), jnp.float32),
        "gamma": 1.0 + 0.1 * jax.random.normal(keys[9], (L, 1, H), jnp.float32),
        "beta":  0.01 * jax.random.normal(keys[10], (L, 1, H), jnp.float32),
    }
    Wp = 0.1 * jax.random.normal(keys[11], (H, C), jnp.float32)          # graph_pred_linear
    bp = 0.01 * jax.random.normal(keys[12], (1, C), jnp.float32)

    # --- glue: embedding lookup + one-hot gather/scatter matrices ----------
    x0 = jnp.take(emb, node_x, axis=0)                                   # (N, H)
    src, dst = edge_index[0], edge_index[1]
    G = jax.nn.one_hot(src, N, dtype=jnp.float32)                        # (E, N)
    St = jax.nn.one_hot(dst, N, dtype=jnp.float32).T                     # (N, E)
    Pt = jax.nn.one_hot(batch, B, dtype=jnp.float32).T                   # (B, N)

    out = net_forward_pallas(x0, G, St, edge_attr, layers, Pt, Wp, bp, T=cfg.T)
    out = jax.block_until_ready(out)

    ref = net_forward_ref(x0, G, St, edge_attr, layers, Pt, Wp, bp, T=cfg.T)
    ref_np = np.asarray(ref)
    # bf16 MXU operands (fp32 accumulation) vs fp32 HIGHEST reference: scale the
    # absolute tolerance with the magnitude of the pooled reductions.
    scale = max(1.0, float(np.max(np.abs(ref_np))))
    np.testing.assert_allclose(np.asarray(out), ref_np,
                               rtol=2e-2, atol=2e-2 * scale)

    print("KERNEL_OK")
</pallas_src>

<mosaic_0001>
module attributes {stable_mosaic.version = 11 : i64} {
  func.func @_net_kernel(%arg0: memref<128x128xf32, #tpu.memory_space<vmem>>, %arg1: memref<256x128xbf16, #tpu.memory_space<vmem>>, %arg2: memref<128x256xbf16, #tpu.memory_space<vmem>>, %arg3: memref<256x8xbf16, #tpu.memory_space<vmem>>, %arg4: memref<8x384xbf16, #tpu.memory_space<vmem>>, %arg5: memref<1x384xf32, #tpu.memory_space<vmem>>, %arg6: memref<3x128x128xbf16, #tpu.memory_space<vmem>>, %arg7: memref<3x1x128xf32, #tpu.memory_space<vmem>>, %arg8: memref<3x128x128xbf16, #tpu.memory_space<vmem>>, %arg9: memref<3x1x128xf32, #tpu.memory_space<vmem>>, %arg10: memref<4x128xbf16, #tpu.memory_space<vmem>>, %arg11: memref<128x128xbf16, #tpu.memory_space<vmem>>, %arg12: memref<1x128xf32, #tpu.memory_space<vmem>>, %arg13: memref<4x128xf32, #tpu.memory_space<vmem>>) attributes {dimension_semantics = [], scalar_prefetch = 0 : i64, scratch_operands = 0 : i64, tpu.core_type = #tpu.core_type<tc>} {
    %c0 = arith.constant 0 : index
    %c0_0 = arith.constant 0 : index
    %0 = vector.load %arg0[%c0, %c0_0] : memref<128x128xf32, #tpu.memory_space<vmem>>, vector<128x128xf32>
    %c0_1 = arith.constant 0 : index
    %c0_2 = arith.constant 0 : index
    %1 = vector.load %arg1[%c0_1, %c0_2] : memref<256x128xbf16, #tpu.memory_space<vmem>>, vector<256x128xbf16>
    %c0_3 = arith.constant 0 : index
    %c0_4 = arith.constant 0 : index
    %2 = vector.load %arg2[%c0_3, %c0_4] : memref<128x256xbf16, #tpu.memory_space<vmem>>, vector<128x256xbf16>
    %c0_5 = arith.constant 0 : index
    %c0_6 = arith.constant 0 : index
    %3 = vector.load %arg3[%c0_5, %c0_6] : memref<256x8xbf16, #tpu.memory_space<vmem>>, vector<256x8xbf16>
    %c0_7 = arith.constant 0 : index
    %c0_8 = arith.constant 0 : index
    %4 = vector.load %arg4[%c0_7, %c0_8] : memref<8x384xbf16, #tpu.memory_space<vmem>>, vector<8x384xbf16>
    %cst = arith.constant dense<0.000000e+00> : vector<256x384xf32>
    %5 = tpu.matmul %3, %4, %cst {dimension_numbers = #tpu.dot_dimension_numbers<[1], [0], [0], [1], [0, 0, 1, 1], [], []>} : vector<256x8xbf16>, vector<8x384xbf16>, vector<256x384xf32> -> vector<256x384xf32>
    %c0_9 = arith.constant 0 : index
    %c0_10 = arith.constant 0 : index
    %6 = vector.load %arg5[%c0_9, %c0_10] : memref<1x384xf32, #tpu.memory_space<vmem>>, vector<1x384xf32>
    %7 = vector.broadcast %6 : vector<1x384xf32> to vector<256x384xf32>
    %8 = arith.addf %5, %7 : vector<256x384xf32>
    %9 = vector.extract_strided_slice %8 {offsets = [0, 0], sizes = [256, 128], strides = [1, 1]} : vector<256x384xf32> to vector<256x128xf32>
    %10 = arith.truncf %0 : vector<128x128xf32> to vector<128x128xbf16>
    %cst_11 = arith.constant dense<0.000000e+00> : vector<256x128xf32>
    %11 = tpu.matmul %1, %10, %cst_11 {dimension_numbers = #tpu.dot_dimension_numbers<[1], [0], [0], [1], [0, 0, 1, 1], [], []>} : vector<256x128xbf16>, vector<128x128xbf16>, vector<256x128xf32> -> vector<256x128xf32>
    %12 = arith.addf %11, %9 : vector<256x128xf32>
    %cst_12 = arith.constant 0.000000e+00 : f32
    %13 = vector.broadcast %cst_12 : f32 to vector<256x128xf32>
    %14 = arith.maximumf %12, %13 : vector<256x128xf32>
    %15 = arith.truncf %14 : vector<256x128xf32> to vector<256x128xbf16>
    %cst_13 = arith.constant dense<0.000000e+00> : vector<128x128xf32>
    %16 = tpu.matmul %2, %15, %cst_13 {dimension_numbers = #tpu.dot_dimension_numbers<[1], [0], [0], [1], [0, 0, 1, 1], [], []>} : vector<128x256xbf16>, vector<256x128xbf16>, vector<128x128xf32> -> vector<128x128xf32>
    %17 = arith.addf %16, %0 : vector<128x128xf32>
    %18 = arith.truncf %17 : vector<128x128xf32> to vector<128x128xbf16>
    %c0_14 = arith.constant 0 : index
    %c0_15 = arith.constant 0 : index
    %c0_16 = arith.constant 0 : index
    %19 = vector.load %arg6[%c0_14, %c0_15, %c0_16] : memref<3x128x128xbf16, #tpu.memory_space<vmem>>, vector<1x128x128xbf16>
    %20 = vector.shape_cast %19 : vector<1x128x128xbf16> to vector<128x128xbf16>
    %cst_17 = arith.constant dense<0.000000e+00> : vector<128x128xf32>
    %21 = tpu.matmul %18, %20, %cst_17 {dimension_numbers = #tpu.dot_dimension_numbers<[1], [0], [0], [1], [0, 0, 1, 1], [], []>} : vector<128x128xbf16>, vector<128x128xbf16>, vector<128x128xf32> -> vector<128x128xf32>
    %c0_18 = arith.constant 0 : index
    %c0_19 = arith.constant 0 : index
    %c0_20 = arith.constant 0 : index
    %22 = vector.load %arg7[%c0_18, %c0_19, %c0_20] : memref<3x1x128xf32, #tpu.memory_space<vmem>>, vector<1x1x128xf32>
    %23 = vector.shape_cast %22 : vector<1x1x128xf32> to vector<1x128xf32>
    %24 = vector.broadcast %23 : vector<1x128xf32> to vector<128x128xf32>
    %25 = arith.addf %21, %24 : vector<128x128xf32>
    %cst_21 = arith.constant 0.000000e+00 : f32
    %26 = vector.broadcast %cst_21 : f32 to vector<128x128xf32>
    %27 = arith.maximumf %25, %26 : vector<128x128xf32>
    %28 = arith.truncf %27 : vector<128x128xf32> to vector<128x128xbf16>
    %c0_22 = arith.constant 0 : index
    %c0_23 = arith.constant 0 : index
    %c0_24 = arith.constant 0 : index
    %29 = vector.load %arg8[%c0_22, %c0_23, %c0_24] : memref<3x128x128xbf16, #tpu.memory_space<vmem>>, vector<1x128x128xbf16>
    %30 = vector.shape_cast %29 : vector<1x128x128xbf16> to vector<128x128xbf16>
    %cst_25 = arith.constant dense<0.000000e+00> : vector<128x128xf32>
    %31 = tpu.matmul %28, %30, %cst_25 {dimension_numbers = #tpu.dot_dimension_numbers<[1], [0], [0], [1], [0, 0, 1, 1], [], []>} : vector<128x128xbf16>, vector<128x128xbf16>, vector<128x128xf32> -> vector<128x128xf32>
    %c0_26 = arith.constant 0 : index
    %c0_27 = arith.constant 0 : index
    %c0_28 = arith.constant 0 : index
    %32 = vector.load %arg9[%c0_26, %c0_27, %c0_28] : memref<3x1x128xf32, #tpu.memory_space<vmem>>, vector<1x1x128xf32>
    %33 = vector.shape_cast %32 : vector<1x1x128xf32> to vector<1x128xf32>
    %34 = vector.broadcast %33 : vector<1x128xf32> to vector<128x128xf32>
    %35 = arith.addf %31, %34 : vector<128x128xf32>
    %36 = vector.extract_strided_slice %8 {offsets = [0, 128], sizes = [256, 128], strides = [1, 1]} : vector<256x384xf32> to vector<256x128xf32>
    %37 = arith.truncf %35 : vector<128x128xf32> to vector<128x128xbf16>
    %cst_29 = arith.constant dense<0.000000e+00> : vector<256x128xf32>
    %38 = tpu.matmul %1, %37, %cst_29 {dimension_numbers = #tpu.dot_dimension_numbers<[1], [0], [0], [1], [0, 0, 1, 1], [], []>} : vector<256x128xbf16>, vector<128x128xbf16>, vector<256x128xf32> -> vector<256x128xf32>
    %39 = arith.addf %38, %36 : vector<256x128xf32>
    %cst_30 = arith.constant 0.000000e+00 : f32
    %40 = vector.broadcast %cst_30 : f32 to vector<256x128xf32>
    %41 = arith.maximumf %39, %40 : vector<256x128xf32>
    %42 = arith.truncf %41 : vector<256x128xf32> to vector<256x128xbf16>
    %cst_31 = arith.constant dense<0.000000e+00> : vector<128x128xf32>
    %43 = tpu.matmul %2, %42, %cst_31 {dimension_numbers = #tpu.dot_dimension_numbers<[1], [0], [0], [1], [0, 0, 1, 1], [], []>} : vector<128x256xbf16>, vector<256x128xbf16>, vector<128x128xf32> -> vector<128x128xf32>
    %44 = arith.addf %43, %35 : vector<128x128xf32>
    %45 = arith.truncf %44 : vector<128x128xf32> to vector<128x128xbf16>
    %c1 = arith.constant 1 : index
    %c0_32 = arith.constant 0 : index
    %c0_33 = arith.constant 0 : index
    %46 = vector.load %arg6[%c1, %c0_32, %c0_33] : memref<3x128x128xbf16, #tpu.memory_space<vmem>>, vector<1x128x128xbf16>
    %47 = vector.shape_cast %46 : vector<1x128x128xbf16> to vector<128x128xbf16>
    %cst_34 = arith.constant dense<0.000000e+00> : vector<128x128xf32>
    %48 = tpu.matmul %45, %47, %cst_34 {dimension_numbers = #tpu.dot_dimension_numbers<[1], [0], [0], [1], [0, 0, 1, 1], [], []>} : vector<128x128xbf16>, vector<128x128xbf16>, vector<128x128xf32> -> vector<128x128xf32>
    %c1_35 = arith.constant 1 : index
    %c0_36 = arith.constant 0 : index
    %c0_37 = arith.constant 0 : index
    %49 = vector.load %arg7[%c1_35, %c0_36, %c0_37] : memref<3x1x128xf32, #tpu.memory_space<vmem>>, vector<1x1x128xf32>
    %50 = vector.shape_cast %49 : vector<1x1x128xf32> to vector<1x128xf32>
    %51 = vector.broadcast %50 : vector<1x128xf32> to vector<128x128xf32>
    %52 = arith.addf %48, %51 : vector<128x128xf32>
    %cst_38 = arith.constant 0.000000e+00 : f32
    %53 = vector.broadcast %cst_38 : f32 to vector<128x128xf32>
    %54 = arith.maximumf %52, %53 : vector<128x128xf32>
    %55 = arith.truncf %54 : vector<128x128xf32> to vector<128x128xbf16>
    %c1_39 = arith.constant 1 : index
    %c0_40 = arith.constant 0 : index
    %c0_41 = arith.constant 0 : index
    %56 = vector.load %arg8[%c1_39, %c0_40, %c0_41] : memref<3x128x128xbf16, #tpu.memory_space<vmem>>, vector<1x128x128xbf16>
    %57 = vector.shape_cast %56 : vector<1x128x128xbf16> to vector<128x128xbf16>
    %cst_42 = arith.constant dense<0.000000e+00> : vector<128x128xf32>
    %58 = tpu.matmul %55, %57, %cst_42 {dimension_numbers = #tpu.dot_dimension_numbers<[1], [0], [0], [1], [0, 0, 1, 1], [], []>} : vector<128x128xbf16>, vector<128x128xbf16>, vector<128x128xf32> -> vector<128x128xf32>
    %c1_43 = arith.constant 1 : index
    %c0_44 = arith.constant 0 : index
    %c0_45 = arith.constant 0 : index
    %59 = vector.load %arg9[%c1_43, %c0_44, %c0_45] : memref<3x1x128xf32, #tpu.memory_space<vmem>>, vector<1x1x128xf32>
    %60 = vector.shape_cast %59 : vector<1x1x128xf32> to vector<1x128xf32>
    %61 = vector.broadcast %60 : vector<1x128xf32> to vector<128x128xf32>
    %62 = arith.addf %58, %61 : vector<128x128xf32>
    %63 = vector.extract_strided_slice %8 {offsets = [0, 256], sizes = [256, 128], strides = [1, 1]} : vector<256x384xf32> to vector<256x128xf32>
    %64 = arith.truncf %62 : vector<128x128xf32> to vector<128x128xbf16>
    %cst_46 = arith.constant dense<0.000000e+00> : vector<256x128xf32>
    %65 = tpu.matmul %1, %64, %cst_46 {dimension_numbers = #tpu.dot_dimension_numbers<[1], [0], [0], [1], [0, 0, 1, 1], [], []>} : vector<256x128xbf16>, vector<128x128xbf16>, vector<256x128xf32> -> vector<256x128xf32>
    %66 = arith.addf %65, %63 : vector<256x128xf32>
    %cst_47 = arith.constant 0.000000e+00 : f32
    %67 = vector.broadcast %cst_47 : f32 to vector<256x128xf32>
    %68 = arith.maximumf %66, %67 : vector<256x128xf32>
    %69 = arith.truncf %68 : vector<256x128xf32> to vector<256x128xbf16>
    %cst_48 = arith.constant dense<0.000000e+00> : vector<128x128xf32>
    %70 = tpu.matmul %2, %69, %cst_48 {dimension_numbers = #tpu.dot_dimension_numbers<[1], [0], [0], [1], [0, 0, 1, 1], [], []>} : vector<128x256xbf16>, vector<256x128xbf16>, vector<128x128xf32> -> vector<128x128xf32>
    %71 = arith.addf %70, %62 : vector<128x128xf32>
    %72 = arith.truncf %71 : vector<128x128xf32> to vector<128x128xbf16>
    %c2 = arith.constant 2 : index
    %c0_49 = arith.constant 0 : index
    %c0_50 = arith.constant 0 : index
    %73 = vector.load %arg6[%c2, %c0_49, %c0_50] : memref<3x128x128xbf16, #tpu.memory_space<vmem>>, vector<1x128x128xbf16>
    %74 = vector.shape_cast %73 : vector<1x128x128xbf16> to vector<128x128xbf16>
    %cst_51 = arith.constant dense<0.000000e+00> : vector<128x128xf32>
    %75 = tpu.matmul %72, %74, %cst_51 {dimension_numbers = #tpu.dot_dimension_numbers<[1], [0], [0], [1], [0, 0, 1, 1], [], []>} : vector<128x128xbf16>, vector<128x128xbf16>, vector<128x128xf32> -> vector<128x128xf32>
    %c2_52 = arith.constant 2 : index
    %c0_53 = arith.constant 0 : index
    %c0_54 = arith.constant 0 : index
    %76 = vector.load %arg7[%c2_52, %c0_53, %c0_54] : memref<3x1x128xf32, #tpu.memory_space<vmem>>, vector<1x1x128xf32>
    %77 = vector.shape_cast %76 : vector<1x1x128xf32> to vector<1x128xf32>
    %78 = vector.broadcast %77 : vector<1x128xf32> to vector<128x128xf32>
    %79 = arith.addf %75, %78 : vector<128x128xf32>
    %cst_55 = arith.constant 0.000000e+00 : f32
    %80 = vector.broadcast %cst_55 : f32 to vector<128x128xf32>
    %81 = arith.maximumf %79, %80 : vector<128x128xf32>
    %82 = arith.truncf %81 : vector<128x128xf32> to vector<128x128xbf16>
    %c2_56 = arith.constant 2 : index
    %c0_57 = arith.constant 0 : index
    %c0_58 = arith.constant 0 : index
    %83 = vector.load %arg8[%c2_56, %c0_57, %c0_58] : memref<3x128x128xbf16, #tpu.memory_space<vmem>>, vector<1x128x128xbf16>
    %84 = vector.shape_cast %83 : vector<1x128x128xbf16> to vector<128x128xbf16>
    %cst_59 = arith.constant dense<0.000000e+00> : vector<128x128xf32>
    %85 = tpu.matmul %82, %84, %cst_59 {dimension_numbers = #tpu.dot_dimension_numbers<[1], [0], [0], [1], [0, 0, 1, 1], [], []>} : vector<128x128xbf16>, vector<128x128xbf16>, vector<128x128xf32> -> vector<128x128xf32>
    %c2_60 = arith.constant 2 : index
    %c0_61 = arith.constant 0 : index
    %c0_62 = arith.constant 0 : index
    %86 = vector.load %arg9[%c2_60, %c0_61, %c0_62] : memref<3x1x128xf32, #tpu.memory_space<vmem>>, vector<1x1x128xf32>
    %87 = vector.shape_cast %86 : vector<1x1x128xf32> to vector<1x128xf32>
    %88 = vector.broadcast %87 : vector<1x128xf32> to vector<128x128xf32>
    %89 = arith.addf %85, %88 : vector<128x128xf32>
    %c0_63 = arith.constant 0 : index
    %c0_64 = arith.constant 0 : index
    %90 = vector.load %arg10[%c0_63, %c0_64] : memref<4x128xbf16, #tpu.memory_space<vmem>>, vector<4x128xbf16>
    %91 = arith.truncf %89 : vector<128x128xf32> to vector<128x128xbf16>
    %cst_65 = arith.constant dense<0.000000e+00> : vector<4x128xf32>
    %92 = tpu.matmul %90, %91, %cst_65 {dimension_numbers = #tpu.dot_dimension_numbers<[1], [0], [0], [1], [0, 0, 1, 1], [], []>} : vector<4x128xbf16>, vector<128x128xbf16>, vector<4x128xf32> -> vector<4x128xf32>
    %93 = arith.truncf %92 : vector<4x128xf32> to vector<4x128xbf16>
    %c0_66 = arith.constant 0 : index
    %c0_67 = arith.constant 0 : index
    %94 = vector.load %arg11[%c0_66, %c0_67] : memref<128x128xbf16, #tpu.memory_space<vmem>>, vector<128x128xbf16>
    %cst_68 = arith.constant dense<0.000000e+00> : vector<4x128xf32>
    %95 = tpu.matmul %93, %94, %cst_68 {dimension_numbers = #tpu.dot_dimension_numbers<[1], [0], [0], [1], [0, 0, 1, 1], [], []>} : vector<4x128xbf16>, vector<128x128xbf16>, vector<4x128xf32> -> vector<4x128xf32>
    %c0_69 = arith.constant 0 : index
    %c0_70 = arith.constant 0 : index
    %96 = vector.load %arg12[%c0_69, %c0_70] : memref<1x128xf32, #tpu.memory_space<vmem>>, vector<1x128xf32>
    %97 = vector.broadcast %96 : vector<1x128xf32> to vector<4x128xf32>
    %98 = arith.addf %95, %97 : vector<4x128xf32>
    %c0_71 = arith.constant 0 : index
    %c0_72 = arith.constant 0 : index
    %99 = vector.load %arg13[%c0_71, %c0_72] : memref<4x128xf32, #tpu.memory_space<vmem>>, vector<4x128xf32>
    tpu.vector_store %arg13[%c0_71, %c0_72], %98 {strides = array<i32>} : memref<4x128xf32, #tpu.memory_space<vmem>>, vector<4x128xf32>,
    return
  }
}

</mosaic_0001>

<bundles_post_ra>
// kernel: tpu_custom_call.1
= control target key start
LH: loop header
LB: loop body
LE: loop exit
PB: predicated region body
PF: predicated region fallthrough
CT: control target
= control target key end

     0   :  { %18 = vsyncpa [#allocation3], 0  ;;  %s5464_s0 = inlined_call_operand.vmem [shape: f32[128,128], index: 0, kind: input, shape index: {}]   ;;  %s5465_s1 = inlined_call_operand.hbm [shape: bf16[256,128], index: 1, kind: input, shape index: {}]   ;;  %s5466_s2 = inlined_call_operand.hbm [shape: bf16[128,256], index: 2, kind: input, shape index: {}]   ;;  %s5467_s3 = inlined_call_operand.vmem [shape: bf16[256,8], index: 3, kind: input, shape index: {}]   ;;  %s5468_s4 = inlined_call_operand.vmem [shape: bf16[8,384], index: 4, kind: input, shape index: {}]   ;;  %s5469_s5 = inlined_call_operand.vmem [shape: f32[1,384], index: 5, kind: input, shape index: {}]   ;;  %s5470_s6 = inlined_call_operand.hbm [shape: bf16[3,128,128], index: 6, kind: input, shape index: {}]   ;;  %s5471_s7 = inlined_call_operand.vmem [shape: f32[3,1,128], index: 7, kind: input, shape index: {}]   ;;  %s5472_s8 = inlined_call_operand.hbm [shape: bf16[3,128,128], index: 8, kind: input, shape index: {}]   ;;  %s5473_s9 = inlined_call_operand.vmem [shape: f32[3,1,128], index: 9, kind: input, shape index: {}]   ;;  %s5474_s10 = inlined_call_operand.vmem [shape: bf16[4,128], index: 10, kind: input, shape index: {}]   ;;  %s5475_s11 = inlined_call_operand.hbm [shape: bf16[128,128], index: 11, kind: input, shape index: {}]   ;;  %s5476_s12 = inlined_call_operand.vmem [shape: f32[1,128], index: 12, kind: input, shape index: {}]   ;;  %s5477_s13 = inlined_call_operand.hbm [shape: f32[4,128], index: 13, kind: output, shape index: {}]  }
   0x1   :  { %19 = vsyncpa [#allocation6], 0 }
   0x2   :  { %20 = vsyncpa [#allocation9], 0 }
   0x3   :  { %21 = vsyncpa [#allocation4], 0  ;;  %s4477_s25 = smov [#allocation5]   ;;  %s4337_s29 = scalar_lea.hbm %s5466_s2, 2048 }
   0x4   :  { %s41_s26 = sshll.u32 %s4477_s25, 4  ;;  %p4338_p0 = scmp.ne.s32.totalorder %s5466_s2, %s4337_s29  ;;  %s42_s26 = int_to_ptr.vmem [resolvable:$true] %s41_s26 }
   0x5   :  { %p4341_p1 = scmp.lt.u32.totalorder %s4337_s29, %s5466_s2 }
   0x7   :  { %p4343_p2 = pnand %p4341_p1, %p4338_p0 }
   0x9   :  { %4346 = shalt.err (!%p4343_p2)
}
   0xa   :  { %s4347_s17 = scalar_lea.vmem %s42_s26, 2048  ;;  %p4352_p4 = scmp.lt.s32.totalorder %s42_s26, %s42_s26 }
   0xb   :  { %p4348_p3 = scmp.ne.s32.totalorder %s42_s26, %s4347_s17  ;;  %p4353_p5 = scmp.lt.s32.totalorder %s4347_s17, %s4347_s17 }
   0xd   :  { %p4354_p6 = por %p4353_p5, %p4352_p4 }
   0xf   :  { %p4355_p7 = pnand %p4354_p6, %p4348_p3 }
  0x11   :  { %4358 = shalt.err (!%p4355_p7)
}
  0x12   :  { %s4478_s18 = smov 128   ;;  %s4479_s19 = smov 8  }
  0x13   :  { %47 = dma.hbm_to_vmem [thread:$0]  %s5466_s2, 2048, %s42_s26, [#allocation6], %s4478_s18, %s4478_s18, %s4479_s19  }
  0x14   :  { %s4480_s22 = smov [#allocation8]   ;;  %s4481_s24 = smov [#allocation2]  }
  0x15   :  { %s73_s23 = sshll.u32 %s4480_s22, 4  ;;  %s29_s25 = sshll.u32 %s4481_s24, 4  ;;  %s74_s23 = int_to_ptr.vmem [resolvable:$true] %s73_s23  ;;  %s30_s25 = int_to_ptr.vmem [resolvable:$true] %s29_s25 }
  0x16   :  { %s4359_s29 = scalar_lea.hbm %s5472_s8, 3072 }
  0x17   :  { %p4360_p8 = scmp.ne.s32.totalorder %s5472_s8, %s4359_s29  ;;  %p4363_p9 = scmp.lt.u32.totalorder %s4359_s29, %s5472_s8 }
  0x19   :  { %p4365_p10 = pnand %p4363_p9, %p4360_p8 }
  0x1b   :  { %4368 = shalt.err (!%p4365_p10)
}
  0x1c   :  { %s4369_s2 = scalar_lea.vmem %s74_s23, 3072  ;;  %p4374_p12 = scmp.lt.s32.totalorder %s74_s23, %s74_s23 }
  0x1d   :  { %p4370_p11 = scmp.ne.s32.totalorder %s74_s23, %s4369_s2  ;;  %p4375_p13 = scmp.lt.s32.totalorder %s4369_s2, %s4369_s2 }
  0x1f   :  { %p4376_p0 = por %p4375_p13, %p4374_p12 }
  0x21   :  { %p4377_p1 = pnand %p4376_p0, %p4370_p11 }
  0x23   :  { %4380 = shalt.err (!%p4377_p1)
}
  0x24   :  { %s4482_s26 = smov 64   ;;  %s4483_s17 = smov 4  }
  0x25   :  { %79 = dma.hbm_to_vmem [thread:$0]  %s5472_s8, 3072, %s74_s23, [#allocation9], %s4482_s26, %s4482_s26, %s4483_s17  }
  0x26   :  { %s4381_s22 = scalar_lea.hbm %s5465_s1, 2048 }
  0x27   :  { %p4382_p2 = scmp.ne.s32.totalorder %s5465_s1, %s4381_s22  ;;  %p4385_p3 = scmp.lt.u32.totalorder %s4381_s22, %s5465_s1 }
  0x29   :  { %p4387_p4 = pnand %p4385_p3, %p4382_p2 }
  0x2b   :  { %4390 = shalt.err (!%p4387_p4)
}
  0x2c   :  { %s4391_s30 = scalar_lea.vmem %s30_s25, 2048  ;;  %p4396_p6 = scmp.lt.s32.totalorder %s30_s25, %s30_s25 }
  0x2d   :  { %p4392_p5 = scmp.ne.s32.totalorder %s30_s25, %s4391_s30  ;;  %p4397_p7 = scmp.lt.s32.totalorder %s4391_s30, %s4391_s30 }
  0x2f   :  { %p4398_p8 = por %p4397_p7, %p4396_p6 }
  0x31   :  { %p4399_p9 = pnand %p4398_p8, %p4392_p5 }
  0x33   :  { %4402 = shalt.err (!%p4399_p9)
}
  0x34   :  { %35 = dma.hbm_to_vmem [thread:$0]  %s5465_s1, 2048, %s30_s25, [#allocation3], %s4482_s26, %s4482_s26, %s4483_s17  }
  0x35   :  { %s4484_s14 = smov [#allocation7]   ;;  %s4485_s16 = smov [#allocation10]  }
  0x36   :  { %s59_s15 = sshll.u32 %s4484_s14, 4  ;;  %s89_s2 = sshll.u32 %s4485_s16, 4  ;;  %s60_s15 = int_to_ptr.vmem [resolvable:$true] %s59_s15  ;;  %s90_s2 = int_to_ptr.vmem [resolvable:$true] %s89_s2 }
  0x37   :  { %s4403_s20 = scalar_lea.hbm %s5470_s6, 3072 }
  0x38   :  { %p4404_p10 = scmp.ne.s32.totalorder %s5470_s6, %s4403_s20  ;;  %p4407_p11 = scmp.lt.u32.totalorder %s4403_s20, %s5470_s6 }
  0x3a   :  { %p4409_p12 = pnand %p4407_p11, %p4404_p10 }
  0x3c   :  { %4412 = shalt.err (!%p4409_p12)
}
  0x3d   :  { %s4413_s1 = scalar_lea.vmem %s60_s15, 3072  ;;  %p4418_p0 = scmp.lt.s32.totalorder %s60_s15, %s60_s15 }
  0x3e   :  { %p4414_p13 = scmp.ne.s32.totalorder %s60_s15, %s4413_s1  ;;  %p4419_p1 = scmp.lt.s32.totalorder %s4413_s1, %s4413_s1 }
  0x40   :  { %p4420_p2 = por %p4419_p1, %p4418_p0 }
  0x42   :  { %p4421_p3 = pnand %p4420_p2, %p4414_p13 }
  0x44   :  { %4424 = shalt.err (!%p4421_p3)
}
  0x45   :  { %65 = dma.hbm_to_vmem [thread:$0]  %s5470_s6, 3072, %s60_s15, [#allocation6], %s4482_s26, %s4482_s26, %s4483_s17  }
  0x46   :  { %s4425_s8 = scalar_lea.hbm %s5475_s11, 1024 }
  0x47   :  { %p4426_p4 = scmp.ne.s32.totalorder %s5475_s11, %s4425_s8  ;;  %p4429_p5 = scmp.lt.u32.totalorder %s4425_s8, %s5475_s11 }
  0x49   :  { %p4431_p6 = pnand %p4429_p5, %p4426_p4 }
  0x4b   :  { %4434 = shalt.err (!%p4431_p6)
}
  0x4c   :  { %s4435_s19 = scalar_lea.vmem %s90_s2, 1024  ;;  %p4440_p8 = scmp.lt.s32.totalorder %s90_s2, %s90_s2 }
  0x4d   :  { %p4436_p7 = scmp.ne.s32.totalorder %s90_s2, %s4435_s19  ;;  %p4441_p9 = scmp.lt.s32.totalorder %s4435_s19, %s4435_s19 }
  0x4f   :  { %p4442_p10 = por %p4441_p9, %p4440_p8 }
  0x51   :  { %p4443_p11 = pnand %p4442_p10, %p4436_p7 }
  0x53   :  { %4446 = shalt.err (!%p4443_p11)
}
  0x54   :  { %95 = dma.hbm_to_vmem [thread:$0]  %s5475_s11, 1024, %s90_s2, [#allocation9], %s4482_s26, %s4482_s26, %s4483_s17  }
  0x55   :  { %4469 = dma.done.wait [#allocation3], 2048  }
  0x56   :  { %4470 = vsyncadd [#allocation3], 4294965248 }
  0x57   :  { %4471 = dma.done.wait [#allocation6], 5120  }
  0x58   :  { %4472 = vsyncadd [#allocation6], 4294962176 }
  0x59   :  { %4473 = dma.done.wait [#allocation9], 4096  }
  0x5a   :  { %4474 = vsyncadd [#allocation9], 4294963200  ;;  %v4486_v0 = vmov 0   ;;  %vm366_vm0 = vcmask 1043456   ;;  %v4173_v1 = vld [vmem:[%s5468_s4 + $0x8] ss:$0 sps:$4 sm:$0xff]  }
  0x5b   :  { %408 = vmatprep.mubr.bf16.mxu0 %v4486_v0  ;;  %v210_v2 = vld [vmem:[%s5468_s4] sm:$0xff]  ;;  %vm317_vm1 = vcmask 64512   ;;  %4159 = vmatprep.subr.msk.bf16.mxu1 %vm366_vm0, %v4173_v1  ;;  %v374_v6 = vsel %vm366_vm0, %v4173_v1, 0  ;;  %v4177_v7 = vld [vmem:[%s5467_s3 + $0x8] sm:$0xff]   ;;  %v4178_v9 = vld [vmem:[%s5467_s3 + $0x10] sm:$0xff]   ;;  %vm4488_vm2 = vmmov 0  }
  0x5c   :  { %v3156_v3 = vcombine.high %v210_v2, %v210_v2  ;;  %v4175_v4 = vld [vmem:[%s5467_s3] sm:$0xff]   ;;  %v3155_v5 = vcombine.low %v210_v2, %v210_v2  ;;  %3686 = vmatpush3.bf16.msra.mxu1 %v374_v6  ;;  %v4179_v10 = vld [vmem:[%s5467_s3 + $0x18] sm:$0xff]   ;;  %v115_v13 = vld [vmem:[%s5464_s0 + $0x8] sm:$0xff] }
  0x5d   :  { %3687 = vmatprep.mubr.msk.bf16.mxu1 %vm317_vm1, %v4175_v4  ;;  %v4180_v11 = vld [vmem:[%s5467_s3 + $0x20] sm:$0xff]   ;;  %v116_v14 = vld [vmem:[%s5464_s0 + $0x10] sm:$0xff]  ;;  %v117_v16 = vld [vmem:[%s5464_s0 + $0x18] sm:$0xff] }
  0x5e   :  { %3158 = vmatprep.subr.msk.bf16.mxu0 %vm366_vm0, %v3156_v3  ;;  %v368_v8 = vsel %vm366_vm0, %v3155_v5, 0  ;;  %v114_v12 = vld [vmem:[%s5464_s0] sm:$0xff]  ;;  %v731_v17 = vpack.c.bf16 %v117_v16, %v116_v14  ;;  %v119_v19 = vld [vmem:[%s5464_s0 + $0x28] sm:$0xff]  ;;  %v120_v22 = vld [vmem:[%s5464_s0 + $0x30] sm:$0xff] }
  0x5f   :  { %377 = vmatpush1.bf16.msra.mxu0 %v368_v8  ;;  %3688 = vmatmul.mubr.msk.bf16.vlgmr.msra.gmra.mrb[0].mxu1 %vm317_vm1, %v4177_v7  ;;  %v730_v15 = vpack.c.bf16 %v115_v13, %v114_v12  ;;  %v118_v18 = vld [vmem:[%s5464_s0 + $0x20] sm:$0xff]  ;;  %v4181_v21 = vld [vmem:[%s5467_s3 + $0x28] sm:$0xff]   ;;  %v121_v23 = vld [vmem:[%s5464_s0 + $0x38] sm:$0xff] }
  0x60   :  { %3691 = vmatprep.mubr.msk.bf16.mxu1 %vm317_vm1, %v4178_v9  ;;  %v732_v20 = vpack.c.bf16 %v119_v19, %v118_v18  ;;  %v4182_v24 = vld [vmem:[%s5467_s3 + $0x30] sm:$0xff]   ;;  %v733_v25 = vpack.c.bf16 %v121_v23, %v120_v22  ;;  %v122_v26 = vld [vmem:[%s5464_s0 + $0x40] sm:$0xff]  ;;  %v123_v27 = vld [vmem:[%s5464_s0 + $0x48] sm:$0xff] }
  0x61   :  { %3719 = vmatprep.subr.bf16.mxu1 %v730_v15  ;;  %v4183_v28 = vld [vmem:[%s5467_s3 + $0x38] sm:$0xff]   ;;  %v734_v29 = vpack.c.bf16 %v123_v27, %v122_v26  ;;  %v124_v30 = vld [vmem:[%s5464_s0 + $0x50] sm:$0xff]  ;;  %v4184_v32 = vld [vmem:[%s5467_s3 + $0x40] sm:$0xff]  }
  0x62   :  { %3159 = vmatmul.mubr.msk.bf16.vlgmr.msra.gmra.mrb[0].mxu0 %vm317_vm1, %v4175_v4  ;;  %3720 = vmatpush3.bf16.msra.mxu1 %v730_v15  ;;  %v125_v31 = vld [vmem:[%s5464_s0 + $0x58] sm:$0xff]  ;;  %v126_v34 = vld [vmem:[%s5464_s0 + $0x60] sm:$0xff]  ;;  %v127_v35 = vld [vmem:[%s5464_s0 + $0x68] sm:$0xff] }
  0x63   :  { %418 = vmatprep.mubr.bf16.mxu0 %v4486_v0  ;;  %3721 = vmatprep.subr.bf16.mxu1 %v731_v17  ;;  %v735_v33 = vpack.c.bf16 %v125_v31, %v124_v30  ;;  %v4185_v36 = vld [vmem:[%s5467_s3 + $0x48] sm:$0xff]   ;;  %v736_v37 = vpack.c.bf16 %v127_v35, %v126_v34  ;;  %v128_v38 = vld [vmem:[%s5464_s0 + $0x70] sm:$0xff]  ;;  %v129_v39 = vld [vmem:[%s5464_s0 + $0x78] sm:$0xff] }
  0x64   :  { %v4186_v40 = vld [vmem:[%s5467_s3 + $0x50] sm:$0xff]   ;;  %v737_v41 = vpack.c.bf16 %v129_v39, %v128_v38  ;;  %v4187_v42 = vld [vmem:[%s5467_s3 + $0x58] sm:$0xff]   ;;  %v4188_v43 = vld [vmem:[%s5467_s3 + $0x60] sm:$0xff]  }
  0x65   :  { %v4189_v44 = vld [vmem:[%s5467_s3 + $0x68] sm:$0xff]   ;;  %v4190_v45 = vld [vmem:[%s5467_s3 + $0x70] sm:$0xff]   ;;  %v4191_v46 = vld [vmem:[%s5467_s3 + $0x78] sm:$0xff]   ;;  %s4489_s3 = smov [#allocation11]  }
  0x66   :  { %3722 = vmatpush3.bf16.msra.mxu1 %v731_v17  ;;  %v4764_v47 = vld [vmem:[#allocation2] sm:$0xff]   ;;  %v4193_v48 = vld [vmem:[#allocation2 + $0x8] sm:$0xff]   ;;  %v4194_v49 = vld [vmem:[#allocation2 + $0x10] sm:$0xff]   ;;  %s3128_s15 = sshll.u32 %s4489_s3, 4  ;;  %s3129_s15 = int_to_ptr.vmem [resolvable:$true] %s3128_s15 }
  0x67   :  { %3692 = vmatmul.mubr.msk.bf16.gmra.mrb[4].mxu1 %vm317_vm1, %v4179_v10  ;;  %3723 = vmatprep.subr.bf16.mxu1 %v732_v20  ;;  %v4195_v50 = vld [vmem:[#allocation2 + $0x18] sm:$0xff]   ;;  %v4196_v51 = vld [vmem:[#allocation2 + $0x20] sm:$0xff]   ;;  %v4197_v52 = vld [vmem:[#allocation2 + $0x28] sm:$0xff]   ;;  %p4452_p13 = scmp.lt.s32.totalorder %s3129_s15, %s3129_s15 }
  0x68   :  { %3695 = vmatprep.mubr.msk.bf16.mxu1 %vm317_vm1, %v4180_v11  ;;  %v4198_v53 = vld [vmem:[#allocation2 + $0x30] sm:$0xff]   ;;  %v4199_v54 = vld [vmem:[#allocation2 + $0x38] sm:$0xff]   ;;  %v4200_v55 = vld [vmem:[#allocation2 + $0x40] sm:$0xff]  }
  0x69   :  { %v4201_v56 = vld [vmem:[#allocation2 + $0x48] sm:$0xff]   ;;  %v4202_v57 = vld [vmem:[#allocation2 + $0x50] sm:$0xff]   ;;  %v4203_v58 = vld [vmem:[#allocation2 + $0x58] sm:$0xff]  }
  0x6a   :  { %3160 = vmatmul.mubr.msk.bf16.gmra.mrb[4].mxu0 %vm317_vm1, %v4177_v7  ;;  %3724 = vmatpush3.bf16.msra.mxu1 %v732_v20  ;;  %v4204_v59 = vld [vmem:[#allocation2 + $0x60] sm:$0xff]   ;;  %v4205_v60 = vld [vmem:[#allocation2 + $0x68] sm:$0xff]   ;;  %v4206_v61 = vld [vmem:[#allocation2 + $0x70] sm:$0xff]  }
  0x6b   :  { %428 = vmatprep.mubr.bf16.mxu0 %v4486_v0  ;;  %3725 = vmatprep.subr.bf16.mxu1 %v733_v25  ;;  %v4207_v62 = vld [vmem:[#allocation2 + $0x78] sm:$0xff]   ;;  %v4789_v4 = vld [vmem:[#allocation5 + $0x4] ss:$8 sps:$4 sm:$0xff]   ;;  %v4836_v31 = vld [vmem:[%s5469_s5] sm:$0x7] }
  0x6e   :  { %3726 = vmatpush3.bf16.msra.mxu1 %v733_v25 }
  0x6f   :  { %3696 = vmatmul.mubr.msk.bf16.gmra.mrb[8].mxu1 %vm317_vm1, %v4181_v21  ;;  %3727 = vmatprep.subr.bf16.mxu1 %v734_v29 }
  0x70   :  { %3699 = vmatprep.mubr.msk.bf16.mxu1 %vm317_vm1, %v4182_v24 }
  0x72   :  { %3161 = vmatmul.mubr.msk.bf16.gmra.mrb[8].mxu0 %vm317_vm1, %v4178_v9  ;;  %3728 = vmatpush3.bf16.msra.mxu1 %v734_v29 }
  0x73   :  { %438 = vmatprep.mubr.bf16.mxu0 %v4486_v0  ;;  %3729 = vmatprep.subr.bf16.mxu1 %v735_v33 }
  0x76   :  { %3730 = vmatpush3.bf16.msra.mxu1 %v735_v33 }
  0x77   :  { %3700 = vmatmul.mubr.msk.bf16.gmra.mrb[12].mxu1 %vm317_vm1, %v4183_v28  ;;  %3731 = vmatprep.subr.bf16.mxu1 %v736_v37 }
  0x78   :  { %3703 = vmatprep.mubr.msk.bf16.mxu1 %vm317_vm1, %v4184_v32 }
  0x7a   :  { %3162 = vmatmul.mubr.msk.bf16.gmra.mrb[12].mxu0 %vm317_vm1, %v4179_v10  ;;  %3732 = vmatpush3.bf16.msra.mxu1 %v736_v37 }
  0x7b   :  { %448 = vmatprep.mubr.bf16.mxu0 %v4486_v0  ;;  %3733 = vmatprep.subr.bf16.mxu1 %v737_v41 }
  0x7e   :  { %3734 = vmatpush3.bf16.msra.mxu1 %v737_v41 }
  0x7f   :  { %3704 = vmatmul.mubr.msk.bf16.gmra.mrb[16].mxu1 %vm317_vm1, %v4185_v36 }
  0x80   :  { %3707 = vmatprep.mubr.msk.bf16.mxu1 %vm317_vm1, %v4186_v40 }
  0x82   :  { %3163 = vmatmul.mubr.msk.bf16.gmra.mrb[16].mxu0 %vm317_vm1, %v4180_v11 }
  0x83   :  { %458 = vmatprep.mubr.bf16.mxu0 %v4486_v0 }
  0x87   :  { %3708 = vmatmul.mubr.msk.bf16.gmra.mrb[20].mxu1 %vm317_vm1, %v4187_v42 }
  0x88   :  { %3711 = vmatprep.mubr.msk.bf16.mxu1 %vm317_vm1, %v4188_v43 }
  0x8a   :  { %3164 = vmatmul.mubr.msk.bf16.gmra.mrb[20].mxu0 %vm317_vm1, %v4181_v21 }
  0x8b   :  { %468 = vmatprep.mubr.bf16.mxu0 %v4486_v0 }
  0x8f   :  { %3712 = vmatmul.mubr.msk.bf16.gmra.mrb[24].mxu1 %vm317_vm1, %v4189_v44 }
  0x90   :  { %3715 = vmatprep.mubr.msk.bf16.mxu1 %vm317_vm1, %v4190_v45 }
  0x92   :  { %3165 = vmatmul.mubr.msk.bf16.gmra.mrb[24].mxu0 %vm317_vm1, %v4182_v24  ;;  %v214_v24 = vlaneseq }
  0x93   :  { %478 = vmatprep.mubr.bf16.mxu0 %v4486_v0 }
  0x97   :  { %3716 = vmatmul.mubr.msk.bf16.gmra.mrb[28].mxu1 %vm317_vm1, %v4191_v46 }
  0x98   :  { %3735 = vmatprep.mubr.bf16.mxu1 %v4764_v47 }
  0x9a   :  { %3166 = vmatmul.mubr.msk.bf16.gmra.mrb[28].mxu0 %vm317_vm1, %v4183_v28  ;;  %v4828_v28 = vshrl.u32 %v214_v24, 7 }
  0x9b   :  { %488 = vmatprep.mubr.bf16.mxu0 %v4486_v0 }
  0x9c   :  { %5510 = vst [vmem:[#allocation16_spill] sm:$0xff] %v4828_v28  ;;  %v216_v30 = vsub.s32 0, %v4828_v28 }
  0x9e   :  { %v4845_v35 = vrot.slane %v4836_v31, %v216_v30 }
  0x9f   :  { %3736 = vmatmul.mubr.bf16.vlgmr.msra.gmra.mrb[32].mxu1 %v4193_v48 }
  0xa0   :  { %3739 = vmatprep.mubr.bf16.mxu1 %v4194_v49  ;;  %v4232_v49 = vld [vmem:[#allocation7] sm:$0xff]  }
  0xa1   :  { %3767 = vmatprep.subr.bf16.mxu1 %v4232_v49 }
  0xa2   :  { %3167 = vmatmul.mubr.msk.bf16.gmra.mrb[32].mxu0 %vm317_vm1, %v4184_v32  ;;  %3768 = vmatpush3.bf16.msra.mxu1 %v4232_v49 }
  0xa3   :  { %498 = vmatprep.mubr.bf16.mxu0 %v4486_v0 }
  0xa7   :  { %3740 = vmatmul.mubr.bf16.gmra.mrb[36].mxu1 %v4195_v50  ;;  %v4233_v50 = vld [vmem:[#allocation7 + $0x8] sm:$0xff]  }
  0xa8   :  { %3743 = vmatprep.mubr.bf16.mxu1 %v4196_v51  ;;  %3769 = vmatprep.subr.bf16.mxu1 %v4233_v50 }
  0xa9   :  { %3770 = vmatpush3.bf16.msra.mxu1 %v4233_v50 }
  0xaa   :  { %3168 = vmatmul.mubr.msk.bf16.gmra.mrb[36].mxu0 %vm317_vm1, %v4185_v36 }
  0xab   :  { %508 = vmatprep.mubr.bf16.mxu0 %v4486_v0 }
  0xaf   :  { %3744 = vmatmul.mubr.bf16.gmra.mrb[40].mxu1 %v4197_v52 }
  0xb0   :  { %3747 = vmatprep.mubr.bf16.mxu1 %v4198_v53 }
  0xb2   :  { %3169 = vmatmul.mubr.msk.bf16.gmra.mrb[40].mxu0 %vm317_vm1, %v4186_v40 }
  0xb3   :  { %518 = vmatprep.mubr.bf16.mxu0 %v4486_v0 }
  0xb7   :  { %3748 = vmatmul.mubr.bf16.gmra.mrb[44].mxu1 %v4199_v54 }
  0xb8   :  { %3751 = vmatprep.mubr.bf16.mxu1 %v4200_v55 }
  0xba   :  { %3170 = vmatmul.mubr.msk.bf16.gmra.mrb[44].mxu0 %vm317_vm1, %v4187_v42 }
  0xbb   :  { %528 = vmatprep.mubr.bf16.mxu0 %v4486_v0 }
  0xbf   :  { %3752 = vmatmul.mubr.bf16.gmra.mrb[48].mxu1 %v4201_v56 }
  0xc0   :  { %3755 = vmatprep.mubr.bf16.mxu1 %v4202_v57 }
  0xc2   :  { %3171 = vmatmul.mubr.msk.bf16.gmra.mrb[48].mxu0 %vm317_vm1, %v4188_v43 }
  0xc3   :  { %538 = vmatprep.mubr.bf16.mxu0 %v4486_v0 }
  0xc7   :  { %3756 = vmatmul.mubr.bf16.gmra.mrb[52].mxu1 %v4203_v58 }
  0xc8   :  { %3759 = vmatprep.mubr.bf16.mxu1 %v4204_v59 }
  0xca   :  { %3172 = vmatmul.mubr.msk.bf16.gmra.mrb[52].mxu0 %vm317_vm1, %v4189_v44 }
  0xcb   :  { %548 = vmatprep.mubr.bf16.mxu0 %v4486_v0 }
  0xcf   :  { %3760 = vmatmul.mubr.bf16.gmra.mrb[56].mxu1 %v4205_v60  ;;  %v4234_v60 = vld [vmem:[#allocation7 + $0x10] sm:$0xff]  }
  0xd0   :  { %3763 = vmatprep.mubr.bf16.mxu1 %v4206_v61  ;;  %3771 = vmatprep.subr.bf16.mxu1 %v4234_v60 }
  0xd1   :  { %3772 = vmatpush3.bf16.msra.mxu1 %v4234_v60 }
  0xd2   :  { %3173 = vmatmul.mubr.msk.bf16.gmra.mrb[56].mxu0 %vm317_vm1, %v4190_v45 }
  0xd3   :  { %558 = vmatprep.mubr.bf16.mxu0 %v4486_v0 }
  0xd7   :  { %3764 = vmatmul.mubr.bf16.gmra.mrb[60].mxu1 %v4207_v62 }
  0xda   :  { %3174 = vmatmul.mubr.msk.bf16.gmra.mrb[60].mxu0 %vm317_vm1, %v4191_v46 }
  0xdb   :  { %1155 = vmatprep.mubr.bf16.mxu0 %v4789_v4 }
 0x135   :  { %v410_v63 = vpop.f32.mrb[0].mxu0 }
 0x136   :  { %v4785_v1 = vpop.f32.mrb[1].mxu0  ;;  %v411_v38 = vadd.f32 %v410_v63, %v4845_v35 }
 0x137   :  { %v414_v2 = vpop.f32.mrb[2].mxu0 }
 0x138   :  { %v4787_v3 = vpop.f32.mrb[3].mxu0  ;;  %v415_v44 = vadd.f32 %v414_v2, %v4845_v35 }
 0x13d   :  { %v420_v5 = vpop.f32.mrb[4].mxu0 }
 0x13e   :  { %v4792_v6 = vpop.f32.mrb[5].mxu0  ;;  %v421_v37 = vadd.f32 %v420_v5, %v4845_v35 }
 0x13f   :  { %v424_v7 = vpop.f32.mrb[6].mxu0 }
 0x140   :  { %v4794_v8 = vpop.f32.mrb[7].mxu0  ;;  %v425_v40 = vadd.f32 %v424_v7, %v4845_v35 }
 0x145   :  { %v430_v0 = vpop.f32.mrb[8].mxu0 }
 0x146   :  { %v4796_v9 = vpop.f32.mrb[9].mxu0  ;;  %v431_v63 = vadd.f32 %v430_v0, %v4845_v35 }
 0x147   :  { %v4798_v10 = vpop.f32.mrb[10].mxu0 }
 0x148   :  { %v4800_v11 = vpop.f32.mrb[11].mxu0 }
 0x14d   :  { %v440_v12 = vpop.f32.mrb[12].mxu0 }
 0x14e   :  { %v4802_v13 = vpop.f32.mrb[13].mxu0  ;;  %v441_v61 = vadd.f32 %v440_v12, %v4845_v35 }
 0x14f   :  { %v444_v14 = vpop.f32.mrb[14].mxu0 }
 0x150   :  { %v4804_v15 = vpop.f32.mrb[15].mxu0  ;;  %v445_v7 = vadd.f32 %v444_v14, %v4845_v35 }
 0x155   :  { %v4806_v16 = vpop.f32.mrb[16].mxu0 }
 0x156   :  { %v4808_v17 = vpop.f32.mrb[17].mxu0 }
 0x157   :  { %v4810_v18 = vpop.f32.mrb[18].mxu0 }
 0x158   :  { %v4812_v19 = vpop.f32.mrb[19].mxu0 }
 0x15d   :  { %v4814_v20 = vpop.f32.mrb[20].mxu0 }
 0x15e   :  { %v4816_v21 = vpop.f32.mrb[21].mxu0 }
 0x15f   :  { %v4818_v22 = vpop.f32.mrb[22].mxu0 }
 0x160   :  { %v4820_v23 = vpop.f32.mrb[23].mxu0 }
 0x165   :  { %v4822_v25 = vpop.f32.mrb[24].mxu0 }
 0x166   :  { %v4824_v26 = vpop.f32.mrb[25].mxu0 }
 0x167   :  { %v4826_v27 = vpop.f32.mrb[26].mxu0 }
 0x168   :  { %v4830_v29 = vpop.f32.mrb[27].mxu0 }
 0x16d   :  { %v4838_v32 = vpop.f32.mrb[28].mxu0 }
 0x16e   :  { %v4840_v33 = vpop.f32.mrb[29].mxu0 }
 0x16f   :  { %v4842_v34 = vpop.f32.mrb[30].mxu0 }
 0x170   :  { %v4847_v36 = vpop.f32.mrb[31].mxu0 }
 0x172   :  { %v3737_v39 = vpop.f32.mrb[32].mxu1 }
 0x173   :  { %v877_v41 = vadd.f32 %v3737_v39, %v421_v37  ;;  %v868_v42 = vpop.f32.mrb[33].mxu1 }
 0x174   :  { %v869_v45 = vadd.f32 %v868_v42, %v411_v38  ;;  %v3738_v46 = vpop.f32.mrb[34].mxu1  ;;  %v435_v38 = vadd.f32 %v4798_v10, %v4845_v35  ;;  %v461_v10 = vadd.f32 %v4814_v20, %v4845_v35 }
 0x175   :  { %v4852_v43 = vpop.f32.mrb[32].mxu0  ;;  %v880_v51 = vadd.f32 %v3738_v46, %v425_v40  ;;  %v871_v52 = vpop.f32.mrb[35].mxu1  ;;  %v997_v56 = vmax.f32 %v877_v41, 0.0  ;;  %v4235_v41 = vld [vmem:[#allocation7 + $0x18] sm:$0xff]  }
 0x176   :  { %v4855_v48 = vpop.f32.mrb[33].mxu0  ;;  %v872_v54 = vadd.f32 %v871_v52, %v415_v44  ;;  %v995_v58 = vmax.f32 %v869_v45, 0.0  ;;  %3773 = vmatprep.subr.bf16.mxu1 %v4235_v41  ;;  %v4236_v52 = vld [vmem:[#allocation7 + $0x20] sm:$0xff]  }
 0x177   :  { %v4857_v53 = vpop.f32.mrb[34].mxu0  ;;  %v998_v57 = vmax.f32 %v880_v51, 0.0  ;;  %3774 = vmatpush3.bf16.msra.mxu1 %v4235_v41 }
 0x178   :  { %v4859_v55 = vpop.f32.mrb[35].mxu0  ;;  %v996_v59 = vmax.f32 %v872_v54, 0.0  ;;  %3775 = vmatprep.subr.bf16.mxu1 %v4236_v52 }
 0x179   :  { %v4862_v62 = vpack.c.bf16 %v998_v57, %v997_v56  ;;  %v451_v56 = vadd.f32 %v4806_v16, %v4845_v35 }
 0x17a   :  { %v4865_v2 = vpack.c.bf16 %v996_v59, %v995_v58  ;;  %v3741_v5 = vpop.f32.mrb[36].mxu1  ;;  %v465_v59 = vadd.f32 %v4818_v22, %v4845_v35 }
 0x17b   :  { %v893_v24 = vadd.f32 %v3741_v5, %v441_v61  ;;  %v884_v30 = vpop.f32.mrb[37].mxu1  ;;  %v455_v5 = vadd.f32 %v4810_v18, %v4845_v35  ;;  %3776 = vmatpush3.bf16.msra.mxu1 %v4236_v52  ;;  %v481_v18 = vadd.f32 %v4838_v32, %v4845_v35  ;;  %v475_v52 = vadd.f32 %v4826_v27, %v4845_v35 }
 0x17c   :  { %v885_v39 = vadd.f32 %v884_v30, %v431_v63  ;;  %v3742_v40 = vpop.f32.mrb[38].mxu1  ;;  %v491_v27 = vadd.f32 %v4852_v43, %v4845_v35 }
 0x17d   :  { %v4868_v37 = vpop.f32.mrb[36].mxu0  ;;  %v896_v0 = vadd.f32 %v3742_v40, %v445_v7  ;;  %v887_v42 = vpop.f32.mrb[39].mxu1  ;;  %v1001_v14 = vmax.f32 %v893_v24, 0.0 }
 0x17e   :  { %v4872_v12 = vpop.f32.mrb[37].mxu0  ;;  %v888_v45 = vadd.f32 %v887_v42, %v435_v38  ;;  %v999_v51 = vmax.f32 %v885_v39, 0.0 }
 0x17f   :  { %v504_v44 = vpop.f32.mrb[38].mxu0  ;;  %v1002_v49 = vmax.f32 %v896_v0, 0.0 }
 0x180   :  { %v4874_v46 = vpop.f32.mrb[39].mxu0  ;;  %v1000_v50 = vmax.f32 %v888_v45, 0.0 }
 0x181   :  { %v4878_v54 = vpack.c.bf16 %v1002_v49, %v1001_v14  ;;  %v471_v14 = vadd.f32 %v4822_v25, %v4845_v35 }
 0x182   :  { %v4882_v57 = vpack.c.bf16 %v1000_v50, %v999_v51  ;;  %v3745_v58 = vpop.f32.mrb[40].mxu1  ;;  %v485_v50 = vadd.f32 %v4842_v34, %v4845_v35 }
 0x183   :  { %v909_v61 = vadd.f32 %v3745_v58, %v461_v10  ;;  %v900_v60 = vpop.f32.mrb[41].mxu1 }
 0x184   :  { %v901_v20 = vadd.f32 %v900_v60, %v451_v56  ;;  %v3746_v7 = vpop.f32.mrb[42].mxu1 }
 0x185   :  { %v4886_v63 = vpop.f32.mrb[40].mxu0  ;;  %v912_v16 = vadd.f32 %v3746_v7, %v465_v59  ;;  %v903_v30 = vpop.f32.mrb[43].mxu1  ;;  %v1005_v22 = vmax.f32 %v909_v61, 0.0 }
 0x186   :  { %v4890_v24 = vpop.f32.mrb[41].mxu0  ;;  %v904_v39 = vadd.f32 %v903_v30, %v455_v5  ;;  %v1003_v42 = vmax.f32 %v901_v20, 0.0 }
 0x187   :  { %v514_v38 = vpop.f32.mrb[42].mxu0  ;;  %v1006_v0 = vmax.f32 %v912_v16, 0.0 }
 0x188   :  { %v4892_v40 = vpop.f32.mrb[43].mxu0  ;;  %v1004_v45 = vmax.f32 %v904_v39, 0.0 }
 0x189   :  { %v4894_v41 = vpack.c.bf16 %v1006_v0, %v1005_v22  ;;  %v501_v0 = vadd.f32 %v4868_v37, %v4845_v35 }
 0x18a   :  { %v4900_v49 = vpack.c.bf16 %v1004_v45, %v1003_v42  ;;  %v3749_v51 = vpop.f32.mrb[44].mxu1 }
 0x18b   :  { %v925_v10 = vadd.f32 %v3749_v51, %v481_v18  ;;  %v916_v56 = vpop.f32.mrb[45].mxu1  ;;  %v505_v18 = vadd.f32 %v504_v44, %v4845_v35 }
 0x18c   :  { %v917_v59 = vadd.f32 %v916_v56, %v471_v14  ;;  %v3750_v61 = vpop.f32.mrb[46].mxu1 }
 0x18d   :  { %v520_v58 = vpop.f32.mrb[44].mxu0  ;;  %v928_v32 = vadd.f32 %v3750_v61, %v485_v50  ;;  %v919_v5 = vpop.f32.mrb[47].mxu1  ;;  %v1009_v16 = vmax.f32 %v925_v10, 0.0  ;;  %v495_v10 = vadd.f32 %v4857_v53, %v4845_v35  ;;  %v511_v53 = vadd.f32 %v4886_v63, %v4845_v35 }
 0x18e   :  { %v4906_v60 = vpop.f32.mrb[45].mxu0  ;;  %v920_v25 = vadd.f32 %v919_v5, %v475_v52  ;;  %v1007_v39 = vmax.f32 %v917_v59, 0.0 }
 0x18f   :  { %v524_v20 = vpop.f32.mrb[46].mxu0  ;;  %v1010_v30 = vmax.f32 %v928_v32, 0.0 }
 0x190   :  { %v4908_v7 = vpop.f32.mrb[47].mxu0  ;;  %v1008_v34 = vmax.f32 %v920_v25, 0.0 }
 0x191   :  { %v4910_v22 = vpack.c.bf16 %v1010_v30, %v1009_v16 }
 0x192   :  { %v4916_v42 = vpack.c.bf16 %v1008_v34, %v1007_v39  ;;  %v3753_v45 = vpop.f32.mrb[48].mxu1  ;;  %v521_v34 = vadd.f32 %v520_v58, %v4845_v35 }
 0x193   :  { %v941_v14 = vadd.f32 %v3753_v45, %v501_v0  ;;  %v932_v51 = vpop.f32.mrb[49].mxu1 }
 0x194   :  { %v933_v56 = vadd.f32 %v932_v51, %v491_v27  ;;  %v3754_v52 = vpop.f32.mrb[50].mxu1 }
 0x195   :  { %v530_v50 = vpop.f32.mrb[48].mxu0  ;;  %v944_v61 = vadd.f32 %v3754_v52, %v505_v18  ;;  %v935_v37 = vpop.f32.mrb[51].mxu1  ;;  %v1013_v25 = vmax.f32 %v941_v14, 0.0  ;;  %v525_v18 = vadd.f32 %v524_v20, %v4845_v35 }
 0x196   :  { %v4921_v59 = vpop.f32.mrb[49].mxu0  ;;  %v936_v5 = vadd.f32 %v935_v37, %v495_v10  ;;  %v1011_v30 = vmax.f32 %v933_v56, 0.0  ;;  %v515_v10 = vadd.f32 %v514_v38, %v4845_v35 }
 0x197   :  { %v534_v32 = vpop.f32.mrb[50].mxu0  ;;  %v1014_v16 = vmax.f32 %v944_v61, 0.0 }
 0x198   :  { %v4923_v43 = vpop.f32.mrb[51].mxu0  ;;  %v1012_v44 = vmax.f32 %v936_v5, 0.0 }
 0x199   :  { %v1036_v39 = vpack.c.bf16 %v1014_v16, %v1013_v25 }
 0x19a   :  { %v1035_v0 = vpack.c.bf16 %v1012_v44, %v1011_v30  ;;  %v3757_v27 = vpop.f32.mrb[52].mxu1 }
 0x19b   :  { %v948_v45 = vpop.f32.mrb[53].mxu1  ;;  %v957_v51 = vadd.f32 %v3757_v27, %v521_v34 }
 0x19c   :  { %v949_v37 = vadd.f32 %v948_v45, %v511_v53  ;;  %v3758_v14 = vpop.f32.mrb[54].mxu1  ;;  %3331 = vmatprep.subr.bf16.mxu0 %v1035_v0  ;;  %v531_v53 = vadd.f32 %v530_v50, %v4845_v35 }
 0x19d   :  { %v540_v52 = vpop.f32.mrb[52].mxu0  ;;  %v951_v61 = vpop.f32.mrb[55].mxu1  ;;  %3332 = vmatpush3.bf16.msra.mxu0 %v4865_v2  ;;  %v960_v58 = vadd.f32 %v3758_v14, %v525_v18  ;;  %v1017_v16 = vmax.f32 %v957_v51, 0.0 }
 0x19e   :  { %v4930_v56 = vpop.f32.mrb[53].mxu0  ;;  %v952_v25 = vadd.f32 %v951_v61, %v515_v10  ;;  %3333 = vmatprep.subr.bf16.mxu0 %v1036_v39  ;;  %v1015_v20 = vmax.f32 %v949_v37, 0.0  ;;  %v541_v38 = vadd.f32 %v540_v52, %v4845_v35  ;;  %v535_v10 = vadd.f32 %v534_v32, %v4845_v35 }
 0x19f   :  { %v544_v5 = vpop.f32.mrb[54].mxu0  ;;  %v1018_v30 = vmax.f32 %v960_v58, 0.0 }
 0x1a0   :  { %v4933_v63 = vpop.f32.mrb[55].mxu0  ;;  %v1016_v44 = vmax.f32 %v952_v25, 0.0  ;;  %v545_v18 = vadd.f32 %v544_v5, %v4845_v35 }
 0x1a1   :  { %3334 = vmatpush3.bf16.msra.mxu0 %v4862_v62  ;;  %v1038_v34 = vpack.c.bf16 %v1018_v30, %v1017_v16 }
 0x1a2   :  { %v1037_v0 = vpack.c.bf16 %v1016_v44, %v1015_v20  ;;  %v3761_v27 = vpop.f32.mrb[56].mxu1 }
 0x1a3   :  { %v964_v2 = vpop.f32.mrb[57].mxu1  ;;  %v973_v45 = vadd.f32 %v3761_v27, %v541_v38 }
 0x1a4   :  { %v965_v51 = vadd.f32 %v964_v2, %v531_v53  ;;  %v3762_v14 = vpop.f32.mrb[58].mxu1  ;;  %3335 = vmatprep.subr.bf16.mxu0 %v1037_v0 }
 0x1a5   :  { %v550_v39 = vpop.f32.mrb[56].mxu0  ;;  %v967_v62 = vpop.f32.mrb[59].mxu1  ;;  %3336 = vmatpush3.bf16.msra.mxu0 %v4882_v57  ;;  %v976_v52 = vadd.f32 %v3762_v14, %v545_v18  ;;  %v1021_v25 = vmax.f32 %v973_v45, 0.0 }
 0x1a6   :  { %v4940_v37 = vpop.f32.mrb[57].mxu0  ;;  %v968_v58 = vadd.f32 %v967_v62, %v535_v10  ;;  %3337 = vmatprep.subr.bf16.mxu0 %v1038_v34  ;;  %v1019_v5 = vmax.f32 %v965_v51, 0.0  ;;  %v551_v44 = vadd.f32 %v550_v39, %v4845_v35 }
 0x1a7   :  { %v554_v61 = vpop.f32.mrb[58].mxu0  ;;  %v1022_v16 = vmax.f32 %v976_v52, 0.0 }
 0x1a8   :  { %v4943_v50 = vpop.f32.mrb[59].mxu0  ;;  %v1020_v30 = vmax.f32 %v968_v58, 0.0  ;;  %v555_v57 = vadd.f32 %v554_v61, %v4845_v35 }
 0x1a9   :  { %3338 = vmatpush3.bf16.msra.mxu0 %v4878_v54  ;;  %v1040_v32 = vpack.c.bf16 %v1022_v16, %v1021_v25 }
 0x1aa   :  { %v1039_v20 = vpack.c.bf16 %v1020_v30, %v1019_v5  ;;  %v3765_v38 = vpop.f32.mrb[60].mxu1  ;;  %v4964_v30 = vld [vmem:[#allocation5 + $0x10] ss:$8 sps:$4 sm:$0xff]  }
 0x1ab   :  { %v980_v0 = vpop.f32.mrb[61].mxu1 }
 0x1ac   :  { %v981_v27 = vadd.f32 %v980_v0, %v551_v44  ;;  %v3766_v2 = vpop.f32.mrb[62].mxu1  ;;  %3339 = vmatprep.subr.bf16.mxu0 %v1039_v20  ;;  %v4978_v20 = vld [vmem:[#allocation5 + $0x44] ss:$8 sps:$4 sm:$0xff]   ;;  %v4982_v44 = vld [vmem:[#allocation5 + $0x40] ss:$8 sps:$4 sm:$0xff]  }
 0x1ad   :  { %v560_v53 = vpop.f32.mrb[60].mxu0  ;;  %v983_v18 = vpop.f32.mrb[63].mxu1  ;;  %3340 = vmatpush3.bf16.msra.mxu0 %v4900_v49  ;;  %v4957_v49 = vld [vmem:[#allocation5] ss:$8 sps:$4 sm:$0xff]   ;;  %5512 = vst [vmem:[#allocation18_spill] sm:$0xff] %v4978_v20  ;;  %5513 = vst [vmem:[#allocation19_spill] sm:$0xff] %v4982_v44 }
 0x1ae   :  { %v561_v34 = vadd.f32 %v560_v53, %v4845_v35  ;;  %v4949_v45 = vpop.f32.mrb[61].mxu0  ;;  %v984_v51 = vadd.f32 %v983_v18, %v555_v57  ;;  %3341 = vmatprep.subr.bf16.mxu0 %v1040_v32  ;;  %v1023_v62 = vmax.f32 %v981_v27, 0.0  ;;  %v4972_v32 = vld [vmem:[#allocation5 + $0x34] ss:$8 sps:$4 sm:$0xff]   ;;  %v4988_v0 = vld [vmem:[#allocation5 + $0x50] ss:$8 sps:$4 sm:$0xff]  }
 0x1af   :  { %v564_v54 = vpop.f32.mrb[62].mxu0  ;;  %5515 = vst [vmem:[#allocation21_spill] sm:$0xff] %v4988_v0  ;;  %v4990_v53 = vld [vmem:[#allocation5 + $0x64] ss:$8 sps:$4 sm:$0xff]   ;;  %v4994_v57 = vld [vmem:[#allocation5 + $0x60] ss:$8 sps:$4 sm:$0xff]  }
 0x1b0   :  { %v989_v10 = vadd.f32 %v3765_v38, %v561_v34  ;;  %v565_v39 = vadd.f32 %v564_v54, %v4845_v35  ;;  %v4953_v14 = vpop.f32.mrb[63].mxu0  ;;  %v1024_v52 = vmax.f32 %v984_v51, 0.0  ;;  %v4960_v35 = vld [vmem:[#allocation5 + $0x14] ss:$8 sps:$4 sm:$0xff]   ;;  %5516 = vst [vmem:[#allocation22_spill] sm:$0xff] %v4990_v53  ;;  %5517 = vst [vmem:[#allocation23_spill] sm:$0xff] %v4994_v57 }
 0x1b1   :  { %3342 = vmatpush3.bf16.msra.mxu0 %v4894_v41  ;;  %v4966_v41 = vld [vmem:[#allocation5 + $0x24] ss:$8 sps:$4 sm:$0xff]   ;;  %v4984_v38 = vld [vmem:[#allocation5 + $0x54] ss:$8 sps:$4 sm:$0xff]  }
 0x1b2   :  { %v992_v61 = vadd.f32 %v3766_v2, %v565_v39  ;;  %v1025_v58 = vmax.f32 %v989_v10, 0.0  ;;  %v1041_v25 = vpack.c.bf16 %v1024_v52, %v1023_v62  ;;  %5514 = vst [vmem:[#allocation20_spill] sm:$0xff] %v4984_v38  ;;  %v4996_v27 = vld [vmem:[#allocation5 + $0x74] ss:$8 sps:$4 sm:$0xff]   ;;  %v5000_v2 = vld [vmem:[#allocation5 + $0x70] ss:$8 sps:$4 sm:$0xff]  }
 0x1b3   :  { %5518 = vst [vmem:[#allocation24_spill] sm:$0xff] %v4996_v27  ;;  %5519 = vst [vmem:[#allocation25_spill] sm:$0xff] %v5000_v2  ;;  %v4237_v34 = vld [vmem:[#allocation7 + $0x28] sm:$0xff]   ;;  %v4238_v18 = vld [vmem:[#allocation7 + $0x30] sm:$0xff]  }
 0x1b4   :  { %v1026_v16 = vmax.f32 %v992_v61, 0.0  ;;  %3343 = vmatprep.subr.bf16.mxu0 %v1041_v25  ;;  %3777 = vmatprep.subr.bf16.mxu1 %v4237_v34  ;;  %v4239_v54 = vld [vmem:[#allocation7 + $0x38] sm:$0xff]   ;;  %v4240_v10 = vld [vmem:[#allocation8] sm:$0xff]  }
 0x1b5   :  { %3344 = vmatpush3.bf16.msra.mxu0 %v4916_v42  ;;  %v4970_v42 = vld [vmem:[#allocation5 + $0x20] ss:$8 sps:$4 sm:$0xff]   ;;  %3778 = vmatpush3.bf16.msra.mxu1 %v4237_v34 }
 0x1b6   :  { %v1042_v5 = vpack.c.bf16 %v1026_v16, %v1025_v58  ;;  %3779 = vmatprep.subr.bf16.mxu1 %v4238_v18  ;;  %v4289_v16 = vld [vmem:[%s5464_s0 + $0x8] sm:$0xff] }
 0x1b8   :  { %3345 = vmatprep.subr.bf16.mxu0 %v1042_v5 }
 0x1b9   :  { %3346 = vmatpush3.bf16.msra.mxu0 %v4910_v22  ;;  %v4976_v22 = vld [vmem:[#allocation5 + $0x30] ss:$8 sps:$4 sm:$0xff]   ;;  %3780 = vmatpush3.bf16.msra.mxu1 %v4238_v18 }
 0x1ba   :  { %5511 = vst [vmem:[#allocation17_spill] sm:$0xff] %v4976_v22  ;;  %3781 = vmatprep.subr.bf16.mxu1 %v4239_v54 }
 0x1bc   :  { %1156 = vmatmul.mubr.bf16.vlgmr.msra.gmra.mrb[64].mxu0 %v4957_v49 }
 0x1bd   :  { %1163 = vmatprep.mubr.bf16.mxu0 %v4960_v35  ;;  %3782 = vmatpush3.bf16.msra.mxu1 %v4239_v54 }
 0x1be   :  { %3799 = vmatprep.subr.bf16.mxu1 %v4240_v10 }
 0x1c4   :  { %1164 = vmatmul.mubr.bf16.gmra.mrb[68].mxu0 %v4964_v30 }
 0x1c5   :  { %1171 = vmatprep.mubr.bf16.mxu0 %v4966_v41 }
 0x1cc   :  { %1172 = vmatmul.mubr.bf16.gmra.mrb[72].mxu0 %v4970_v42 }
 0x1cd   :  { %1179 = vmatprep.mubr.bf16.mxu0 %v4972_v32 }
 0x1d4   :  { %1180 = vmatmul.mubr.bf16.gmra.mrb[76].mxu0 %v4976_v22 }
 0x1d5   :  { %1187 = vmatprep.mubr.bf16.mxu0 %v4978_v20 }
 0x1dc   :  { %1188 = vmatmul.mubr.bf16.gmra.mrb[80].mxu0 %v4982_v44 }
 0x1dd   :  { %1195 = vmatprep.mubr.bf16.mxu0 %v4984_v38 }
 0x1e4   :  { %1196 = vmatmul.mubr.bf16.gmra.mrb[84].mxu0 %v4988_v0 }
 0x1e5   :  { %1203 = vmatprep.mubr.bf16.mxu0 %v4990_v53 }
 0x1ec   :  { %1204 = vmatmul.mubr.bf16.gmra.mrb[88].mxu0 %v4994_v57 }
 0x1ed   :  { %1211 = vmatprep.mubr.bf16.mxu0 %v4996_v27 }
 0x1f4   :  { %1212 = vmatmul.mubr.bf16.gmra.mrb[92].mxu0 %v5000_v2 }
 0x1f5   :  { %3847 = vmatprep.mubr.bf16.mxu0 %v4764_v47  ;;  %v4288_v47 = vld [vmem:[%s5464_s0] sm:$0xff] }
 0x28f   :  { %v3347_v51 = vpop.f32.mrb[64].mxu0 }
 0x290   :  { %v3348_v39 = vpop.f32.mrb[65].mxu0 }
 0x291   :  { %v3349_v62 = vadd.f32 %v3348_v39, %v3347_v51  ;;  %v3350_v52 = vpop.f32.mrb[66].mxu0 }
 0x292   :  { %v3351_v61 = vpop.f32.mrb[67].mxu0 }
 0x293   :  { %v3352_v58 = vadd.f32 %v3351_v61, %v3350_v52  ;;  %v1158_v25 = vadd.f32 %v4288_v47, %v3349_v62  ;;  %v4290_v52 = vld [vmem:[%s5464_s0 + $0x10] sm:$0xff]  ;;  %v4291_v62 = vld [vmem:[%s5464_s0 + $0x18] sm:$0xff] }
 0x295   :  { %v1161_v5 = vadd.f32 %v4289_v16, %v3352_v58  ;;  %v4241_v16 = vld [vmem:[#allocation8 + $0x8] sm:$0xff]  }
 0x297   :  { %v3353_v34 = vpop.f32.mrb[68].mxu0  ;;  %v1220_v18 = vpack.c.bf16 %v1161_v5, %v1158_v25 }
 0x298   :  { %v3354_v54 = vpop.f32.mrb[69].mxu0 }
 0x299   :  { %v3355_v2 = vadd.f32 %v3354_v54, %v3353_v34  ;;  %v3356_v27 = vpop.f32.mrb[70].mxu0  ;;  %3783 = vmatprep.mubr.bf16.mxu1 %v1220_v18  ;;  %v4242_v54 = vld [vmem:[#allocation8 + $0x10] sm:$0xff]  }
 0x29a   :  { %v3357_v51 = vpop.f32.mrb[71].mxu0 }
 0x29b   :  { %v3358_v39 = vadd.f32 %v3357_v51, %v3356_v27  ;;  %v1166_v61 = vadd.f32 %v4290_v52, %v3355_v2  ;;  %v4292_v2 = vld [vmem:[%s5464_s0 + $0x20] sm:$0xff] }
 0x29d   :  { %v1169_v47 = vadd.f32 %v4291_v62, %v3358_v39  ;;  %v4293_v39 = vld [vmem:[%s5464_s0 + $0x28] sm:$0xff] }
 0x29f   :  { %v1221_v57 = vpack.c.bf16 %v1169_v47, %v1166_v61  ;;  %v3359_v58 = vpop.f32.mrb[72].mxu0 }
 0x2a0   :  { %v3360_v25 = vpop.f32.mrb[73].mxu0 }
 0x2a1   :  { %v3361_v5 = vadd.f32 %v3360_v25, %v3359_v58  ;;  %v3362_v34 = vpop.f32.mrb[74].mxu0  ;;  %3784 = vmatmul.mubr.bf16.vlgmr.msra.gmra.mrb[64].mxu1 %v1221_v57  ;;  %v4243_v57 = vld [vmem:[#allocation8 + $0x18] sm:$0xff]  }
 0x2a2   :  { %v3363_v18 = vpop.f32.mrb[75].mxu0  ;;  %3800 = vmatpush3.bf16.msra.mxu1 %v4240_v10 }
 0x2a3   :  { %v3364_v27 = vadd.f32 %v3363_v18, %v3362_v34  ;;  %3801 = vmatprep.subr.bf16.mxu1 %v4241_v16  ;;  %v1174_v51 = vadd.f32 %v4292_v2, %v3361_v5  ;;  %v4244_v18 = vld [vmem:[#allocation8 + $0x20] sm:$0xff]   ;;  %v4294_v5 = vld [vmem:[%s5464_s0 + $0x30] sm:$0xff] }
 0x2a5   :  { %v1177_v52 = vadd.f32 %v4293_v39, %v3364_v27 }
 0x2a6   :  { %3802 = vmatpush3.bf16.msra.mxu1 %v4241_v16  ;;  %v4295_v16 = vld [vmem:[%s5464_s0 + $0x38] sm:$0xff] }
 0x2a7   :  { %v3365_v61 = vpop.f32.mrb[76].mxu0  ;;  %v1222_v62 = vpack.c.bf16 %v1177_v52, %v1174_v51  ;;  %3803 = vmatprep.subr.bf16.mxu1 %v4242_v54  ;;  %v4245_v52 = vld [vmem:[#allocation8 + $0x28] sm:$0xff]  }
 0x2a8   :  { %v3366_v47 = vpop.f32.mrb[77].mxu0 }
 0x2a9   :  { %v3367_v10 = vadd.f32 %v3366_v47, %v3365_v61  ;;  %v3368_v58 = vpop.f32.mrb[78].mxu0  ;;  %3787 = vmatprep.mubr.bf16.mxu1 %v1222_v62 }
 0x2aa   :  { %v3369_v25 = vpop.f32.mrb[79].mxu0  ;;  %3804 = vmatpush3.bf16.msra.mxu1 %v4242_v54 }
 0x2ab   :  { %v3370_v34 = vadd.f32 %v3369_v25, %v3368_v58  ;;  %3805 = vmatprep.subr.bf16.mxu1 %v4243_v57  ;;  %v1182_v2 = vadd.f32 %v4294_v5, %v3367_v10  ;;  %v4296_v10 = vld [vmem:[%s5464_s0 + $0x40] sm:$0xff] }
 0x2ad   :  { %v1185_v27 = vadd.f32 %v4295_v16, %v3370_v34 }
 0x2ae   :  { %3806 = vmatpush3.bf16.msra.mxu1 %v4243_v57  ;;  %v4297_v57 = vld [vmem:[%s5464_s0 + $0x48] sm:$0xff] }
 0x2af   :  { %v3371_v51 = vpop.f32.mrb[80].mxu0  ;;  %v1223_v39 = vpack.c.bf16 %v1185_v27, %v1182_v2  ;;  %3807 = vmatprep.subr.bf16.mxu1 %v4244_v18 }
 0x2b0   :  { %v3372_v61 = vpop.f32.mrb[81].mxu0 }
 0x2b1   :  { %v3373_v54 = vadd.f32 %v3372_v61, %v3371_v51  ;;  %v3374_v62 = vpop.f32.mrb[82].mxu0  ;;  %3788 = vmatmul.mubr.bf16.gmra.mrb[68].mxu1 %v1223_v39  ;;  %v4298_v61 = vld [vmem:[%s5464_s0 + $0x50] sm:$0xff] }
 0x2b2   :  { %v3375_v47 = vpop.f32.mrb[83].mxu0  ;;  %3808 = vmatpush3.bf16.msra.mxu1 %v4244_v18 }
 0x2b3   :  { %v3376_v58 = vadd.f32 %v3375_v47, %v3374_v62  ;;  %3809 = vmatprep.subr.bf16.mxu1 %v4245_v52  ;;  %v1190_v25 = vadd.f32 %v4296_v10, %v3373_v54  ;;  %v4299_v54 = vld [vmem:[%s5464_s0 + $0x58] sm:$0xff] }
 0x2b5   :  { %v1193_v34 = vadd.f32 %v4297_v57, %v3376_v58 }
 0x2b6   :  { %3810 = vmatpush3.bf16.msra.mxu1 %v4245_v52 }
 0x2b7   :  { %v3377_v5 = vpop.f32.mrb[84].mxu0  ;;  %v1224_v2 = vpack.c.bf16 %v1193_v34, %v1190_v25 }
 0x2b8   :  { %v3378_v16 = vpop.f32.mrb[85].mxu0 }
 0x2b9   :  { %v3379_v27 = vadd.f32 %v3378_v16, %v3377_v5  ;;  %v3380_v51 = vpop.f32.mrb[86].mxu0  ;;  %3791 = vmatprep.mubr.bf16.mxu1 %v1224_v2  ;;  %v4300_v2 = vld [vmem:[%s5464_s0 + $0x60] sm:$0xff] }
 0x2ba   :  { %v3381_v18 = vpop.f32.mrb[87].mxu0 }
 0x2bb   :  { %v3382_v39 = vadd.f32 %v3381_v18, %v3380_v51  ;;  %v1198_v62 = vadd.f32 %v4298_v61, %v3379_v27  ;;  %v4301_v27 = vld [vmem:[%s5464_s0 + $0x68] sm:$0xff] }
 0x2bd   :  { %v1201_v47 = vadd.f32 %v4299_v54, %v3382_v39 }
 0x2bf   :  { %v3383_v58 = vpop.f32.mrb[88].mxu0  ;;  %v1225_v52 = vpack.c.bf16 %v1201_v47, %v1198_v62 }
 0x2c0   :  { %v3384_v10 = vpop.f32.mrb[89].mxu0 }
 0x2c1   :  { %v3385_v25 = vadd.f32 %v3384_v10, %v3383_v58  ;;  %v3386_v57 = vpop.f32.mrb[90].mxu0  ;;  %3792 = vmatmul.mubr.bf16.gmra.mrb[72].mxu1 %v1225_v52  ;;  %v4302_v52 = vld [vmem:[%s5464_s0 + $0x70] sm:$0xff] }
 0x2c2   :  { %v3387_v34 = vpop.f32.mrb[91].mxu0 }
 0x2c3   :  { %v3388_v5 = vadd.f32 %v3387_v34, %v3386_v57  ;;  %v1206_v16 = vadd.f32 %v4300_v2, %v3385_v25  ;;  %v4303_v25 = vld [vmem:[%s5464_s0 + $0x78] sm:$0xff] }
 0x2c4   :  { %v4247_v2 = vld [vmem:[#allocation8 + $0x38] sm:$0xff]  }
 0x2c5   :  { %v1209_v51 = vadd.f32 %v4301_v27, %v3388_v5  ;;  %v4246_v5 = vld [vmem:[#allocation8 + $0x30] sm:$0xff]  }
 0x2c6   :  { %3811 = vmatprep.subr.bf16.mxu1 %v4246_v5 }
 0x2c7   :  { %v3389_v18 = vpop.f32.mrb[92].mxu0  ;;  %v1226_v39 = vpack.c.bf16 %v1209_v51, %v1206_v16  ;;  %3812 = vmatpush3.bf16.msra.mxu1 %v4246_v5  ;;  %v3223_v16 = vld [vmem:[%s5471_s7] ss:$0 sm:$0xff] }
 0x2c8   :  { %v3390_v61 = vpop.f32.mrb[93].mxu0  ;;  %3813 = vmatprep.subr.bf16.mxu1 %v4247_v2 }
 0x2c9   :  { %v3391_v62 = vadd.f32 %v3390_v61, %v3389_v18  ;;  %v3392_v54 = vpop.f32.mrb[94].mxu0  ;;  %3795 = vmatprep.mubr.bf16.mxu1 %v1226_v39 }
 0x2ca   :  { %v3393_v47 = vpop.f32.mrb[95].mxu0 }
 0x2cb   :  { %v3394_v58 = vadd.f32 %v3393_v47, %v3392_v54  ;;  %v1214_v10 = vadd.f32 %v4302_v52, %v3391_v62  ;;  %3814 = vmatpush3.bf16.msra.mxu1 %v4247_v2 }
 0x2cd   :  { %v1217_v57 = vadd.f32 %v4303_v25, %v3394_v58 }
 0x2cf   :  { %v1227_v34 = vpack.c.bf16 %v1217_v57, %v1214_v10 }
 0x2d1   :  { %3796 = vmatmul.mubr.bf16.gmra.mrb[76].mxu1 %v1227_v34 }
 0x374   :  { %v3785_v27 = vpop.f32.mrb[64].mxu1 }
 0x375   :  { %v1342_v51 = vadd.f32 %v3785_v27, %v3223_v16  ;;  %v1333_v18 = vpop.f32.mrb[65].mxu1 }
 0x376   :  { %v1334_v39 = vadd.f32 %v3223_v16, %v1333_v18  ;;  %v3786_v61 = vpop.f32.mrb[66].mxu1 }
 0x377   :  { %v1345_v62 = vadd.f32 %v3786_v61, %v3223_v16  ;;  %v1336_v54 = vpop.f32.mrb[67].mxu1  ;;  %v1398_v58 = vmax.f32 %v1342_v51, 0.0 }
 0x378   :  { %v1337_v47 = vadd.f32 %v3223_v16, %v1336_v54  ;;  %v1396_v10 = vmax.f32 %v1334_v39, 0.0 }
 0x379   :  { %v1399_v52 = vmax.f32 %v1345_v62, 0.0 }
 0x37a   :  { %v1397_v25 = vmax.f32 %v1337_v47, 0.0 }
 0x37b   :  { %v1413_v57 = vpack.c.bf16 %v1399_v52, %v1398_v58 }
 0x37c   :  { %v1412_v34 = vpack.c.bf16 %v1397_v25, %v1396_v10 }
 0x37e   :  { %3815 = vmatprep.mubr.bf16.mxu1 %v1412_v34 }
 0x37f   :  { %3816 = vmatmul.mubr.bf16.vlgmr.msra.gmra.mrb[80].mxu1 %v1413_v57 }
 0x384   :  { %v3789_v5 = vpop.f32.mrb[68].mxu1 }
 0x385   :  { %v1358_v2 = vadd.f32 %v3789_v5, %v3223_v16  ;;  %v1349_v53 = vpop.f32.mrb[69].mxu1 }
 0x386   :  { %v1350_v0 = vadd.f32 %v3223_v16, %v1349_v53  ;;  %v3790_v38 = vpop.f32.mrb[70].mxu1 }
 0x387   :  { %v1361_v27 = vadd.f32 %v3790_v38, %v3223_v16  ;;  %v1352_v44 = vpop.f32.mrb[71].mxu1  ;;  %v1402_v20 = vmax.f32 %v1358_v2, 0.0 }
 0x388   :  { %v1353_v18 = vadd.f32 %v3223_v16, %v1352_v44  ;;  %v1400_v22 = vmax.f32 %v1350_v0, 0.0 }
 0x389   :  { %v1403_v61 = vmax.f32 %v1361_v27, 0.0 }
 0x38a   :  { %v1401_v54 = vmax.f32 %v1353_v18, 0.0 }
 0x38b   :  { %v1415_v51 = vpack.c.bf16 %v1403_v61, %v1402_v20 }
 0x38c   :  { %v1414_v62 = vpack.c.bf16 %v1401_v54, %v1400_v22 }
 0x38e   :  { %3819 = vmatprep.mubr.bf16.mxu1 %v1414_v62 }
 0x38f   :  { %3820 = vmatmul.mubr.bf16.gmra.mrb[84].mxu1 %v1415_v51 }
 0x394   :  { %v3793_v39 = vpop.f32.mrb[72].mxu1 }
 0x395   :  { %v1374_v47 = vadd.f32 %v3793_v39, %v3223_v16  ;;  %v1365_v58 = vpop.f32.mrb[73].mxu1 }
 0x396   :  { %v1366_v52 = vadd.f32 %v3223_v16, %v1365_v58  ;;  %v3794_v10 = vpop.f32.mrb[74].mxu1 }
 0x397   :  { %v1377_v25 = vadd.f32 %v3794_v10, %v3223_v16  ;;  %v1368_v57 = vpop.f32.mrb[75].mxu1  ;;  %v1406_v34 = vmax.f32 %v1374_v47, 0.0 }
 0x398   :  { %v1369_v53 = vadd.f32 %v3223_v16, %v1368_v57  ;;  %v1404_v5 = vmax.f32 %v1366_v52, 0.0 }
 0x399   :  { %v1407_v38 = vmax.f32 %v1377_v25, 0.0 }
 0x39a   :  { %v1405_v44 = vmax.f32 %v1369_v53, 0.0  ;;  %v3232_v53 = vld [vmem:[%s5473_s9] ss:$0 sm:$0xff] }
 0x39b   :  { %v1417_v2 = vpack.c.bf16 %v1407_v38, %v1406_v34 }
 0x39c   :  { %v1416_v27 = vpack.c.bf16 %v1405_v44, %v1404_v5 }
 0x39e   :  { %3823 = vmatprep.mubr.bf16.mxu1 %v1416_v27 }
 0x39f   :  { %3824 = vmatmul.mubr.bf16.gmra.mrb[88].mxu1 %v1417_v2 }
 0x3a4   :  { %v3797_v20 = vpop.f32.mrb[76].mxu1 }
 0x3a5   :  { %v1390_v22 = vadd.f32 %v3797_v20, %v3223_v16  ;;  %v1381_v0 = vpop.f32.mrb[77].mxu1 }
 0x3a6   :  { %v1382_v18 = vadd.f32 %v3223_v16, %v1381_v0  ;;  %v3798_v61 = vpop.f32.mrb[78].mxu1 }
 0x3a7   :  { %v1393_v54 = vadd.f32 %v3798_v61, %v3223_v16  ;;  %v1384_v51 = vpop.f32.mrb[79].mxu1  ;;  %v1410_v39 = vmax.f32 %v1390_v22, 0.0 }
 0x3a8   :  { %v1385_v62 = vadd.f32 %v3223_v16, %v1384_v51  ;;  %v1408_v10 = vmax.f32 %v1382_v18, 0.0 }
 0x3a9   :  { %v1411_v58 = vmax.f32 %v1393_v54, 0.0 }
 0x3aa   :  { %v1409_v57 = vmax.f32 %v1385_v62, 0.0 }
 0x3ab   :  { %v1419_v47 = vpack.c.bf16 %v1411_v58, %v1410_v39 }
 0x3ac   :  { %v1418_v25 = vpack.c.bf16 %v1409_v57, %v1408_v10 }
 0x3ae   :  { %3827 = vmatprep.mubr.bf16.mxu1 %v1418_v25 }
 0x3af   :  { %3828 = vmatmul.mubr.bf16.gmra.mrb[92].mxu1 %v1419_v47 }
 0x3b0   :  { %1837 = vmatprep.mubr.bf16.mxu1 %v4789_v4 }
 0x452   :  { %v3817_v52 = vpop.f32.mrb[80].mxu1 }
 0x453   :  { %v1525_v34 = vpop.f32.mrb[81].mxu1  ;;  %v5065_v27 = vadd.f32 %v3817_v52, %v3232_v53 }
 0x454   :  { %v3818_v38 = vpop.f32.mrb[82].mxu1  ;;  %v5059_v44 = vadd.f32 %v3232_v53, %v1525_v34 }
 0x455   :  { %v1528_v5 = vpop.f32.mrb[83].mxu1  ;;  %v5061_v16 = vadd.f32 %v3818_v38, %v3232_v53 }
 0x456   :  { %v5063_v2 = vadd.f32 %v3232_v53, %v1528_v5 }
 0x457   :  { %v1589_v4 = vpack.c.bf16 %v5061_v16, %v5065_v27 }
 0x458   :  { %v1588_v20 = vpack.c.bf16 %v5063_v2, %v5059_v44 }
 0x45a   :  { %3831 = vmatprep.subr.bf16.mxu0 %v1588_v20 }
 0x45b   :  { %3832 = vmatpush3.bf16.msra.mxu0 %v1588_v20 }
 0x45c   :  { %3833 = vmatprep.subr.bf16.mxu0 %v1589_v4 }
 0x45f   :  { %3834 = vmatpush3.bf16.msra.mxu0 %v1589_v4 }
 0x462   :  { %v3821_v22 = vpop.f32.mrb[84].mxu1 }
 0x463   :  { %v1541_v0 = vpop.f32.mrb[85].mxu1  ;;  %v5077_v39 = vadd.f32 %v3821_v22, %v3232_v53 }
 0x464   :  { %v3822_v18 = vpop.f32.mrb[86].mxu1  ;;  %v5071_v54 = vadd.f32 %v3232_v53, %v1541_v0 }
 0x465   :  { %v1544_v61 = vpop.f32.mrb[87].mxu1  ;;  %v5073_v51 = vadd.f32 %v3822_v18, %v3232_v53 }
 0x466   :  { %v5075_v62 = vadd.f32 %v3232_v53, %v1544_v61 }
 0x467   :  { %v1591_v10 = vpack.c.bf16 %v5073_v51, %v5077_v39 }
 0x468   :  { %v1590_v58 = vpack.c.bf16 %v5075_v62, %v5071_v54 }
 0x46a   :  { %3835 = vmatprep.subr.bf16.mxu0 %v1590_v58 }
 0x46b   :  { %3836 = vmatpush3.bf16.msra.mxu0 %v1590_v58 }
 0x46c   :  { %3837 = vmatprep.subr.bf16.mxu0 %v1591_v10 }
 0x46f   :  { %3838 = vmatpush3.bf16.msra.mxu0 %v1591_v10 }
 0x472   :  { %v3825_v57 = vpop.f32.mrb[88].mxu1 }
 0x473   :  { %v1557_v47 = vpop.f32.mrb[89].mxu1  ;;  %v5089_v20 = vadd.f32 %v3825_v57, %v3232_v53 }
 0x474   :  { %v3826_v25 = vpop.f32.mrb[90].mxu1  ;;  %v5083_v34 = vadd.f32 %v3232_v53, %v1557_v47 }
 0x475   :  { %v1560_v52 = vpop.f32.mrb[91].mxu1  ;;  %v5085_v38 = vadd.f32 %v3826_v25, %v3232_v53  ;;  %5522 = vst [vmem:[#allocation28_spill] sm:$0xff] %v5089_v20 }
 0x476   :  { %v5087_v5 = vadd.f32 %v3232_v53, %v1560_v52 }
 0x477   :  { %5520 = vst [vmem:[#allocation26_spill] sm:$0xff] %v5085_v38  ;;  %v1593_v22 = vpack.c.bf16 %v5085_v38, %v5089_v20 }
 0x478   :  { %5521 = vst [vmem:[#allocation27_spill] sm:$0xff] %v5087_v5  ;;  %v1592_v4 = vpack.c.bf16 %v5087_v5, %v5083_v34 }
 0x47a   :  { %3839 = vmatprep.subr.bf16.mxu0 %v1592_v4 }
 0x47b   :  { %3840 = vmatpush3.bf16.msra.mxu0 %v1592_v4 }
 0x47c   :  { %3841 = vmatprep.subr.bf16.mxu0 %v1593_v22 }
 0x47f   :  { %3842 = vmatpush3.bf16.msra.mxu0 %v1593_v22  ;;  %v5107_v22 = vld [vmem:[#allocation2 + $0x8] sm:$0xff]  }
 0x480   :  { %5527 = vst [vmem:[#allocation33_spill] sm:$0xff] %v5107_v22 }
 0x482   :  { %v3829_v0 = vpop.f32.mrb[92].mxu1 }
 0x483   :  { %v1573_v18 = vpop.f32.mrb[93].mxu1  ;;  %v5101_v25 = vadd.f32 %v3829_v0, %v3232_v53  ;;  %v5116_v0 = vld [vmem:[#allocation2 + $0x20] sm:$0xff]  }
 0x484   :  { %v3830_v61 = vpop.f32.mrb[94].mxu1  ;;  %v5095_v10 = vadd.f32 %v3232_v53, %v1573_v18  ;;  %v5110_v18 = vld [vmem:[#allocation2 + $0x10] sm:$0xff]   ;;  %5530 = vst [vmem:[#allocation36_spill] sm:$0xff] %v5116_v0 }
 0x485   :  { %v1576_v58 = vpop.f32.mrb[95].mxu1  ;;  %v5097_v47 = vadd.f32 %v3830_v61, %v3232_v53  ;;  %5526 = vst [vmem:[#allocation32_spill] sm:$0xff] %v5101_v25  ;;  %5528 = vst [vmem:[#allocation34_spill] sm:$0xff] %v5110_v18  ;;  %v5119_v61 = vld [vmem:[#allocation2 + $0x28] sm:$0xff]  }
 0x486   :  { %5523 = vst [vmem:[#allocation29_spill] sm:$0xff] %v5095_v10  ;;  %v5099_v57 = vadd.f32 %v3232_v53, %v1576_v58  ;;  %v5113_v53 = vld [vmem:[#allocation2 + $0x18] sm:$0xff]   ;;  %5531 = vst [vmem:[#allocation37_spill] sm:$0xff] %v5119_v61  ;;  %v5122_v58 = vld [vmem:[#allocation2 + $0x30] sm:$0xff]  }
 0x487   :  { %5524 = vst [vmem:[#allocation30_spill] sm:$0xff] %v5097_v47  ;;  %v1595_v4 = vpack.c.bf16 %v5097_v47, %v5101_v25  ;;  %5529 = vst [vmem:[#allocation35_spill] sm:$0xff] %v5113_v53 }
 0x488   :  { %5525 = vst [vmem:[#allocation31_spill] sm:$0xff] %v5099_v57  ;;  %v1594_v52 = vpack.c.bf16 %v5099_v57, %v5095_v10  ;;  %5532 = vst [vmem:[#allocation38_spill] sm:$0xff] %v5122_v58  ;;  %v4248_v57 = vld [vmem:[#allocation7 + $0x40] sm:$0xff]  }
 0x48a   :  { %3843 = vmatprep.subr.bf16.mxu0 %v1594_v52 }
 0x48b   :  { %3844 = vmatpush3.bf16.msra.mxu0 %v1594_v52  ;;  %v5125_v52 = vld [vmem:[#allocation2 + $0x38] sm:$0xff]  }
 0x48c   :  { %3845 = vmatprep.subr.bf16.mxu0 %v1595_v4  ;;  %5533 = vst [vmem:[#allocation39_spill] sm:$0xff] %v5125_v52 }
 0x48f   :  { %3846 = vmatpush3.bf16.msra.mxu0 %v1595_v4  ;;  %v5128_v4 = vld [vmem:[#allocation2 + $0x40] sm:$0xff]  }
 0x490   :  { %5534 = vst [vmem:[#allocation40_spill] sm:$0xff] %v5128_v4  ;;  %3879 = vmatprep.subr.bf16.mxu0 %v4248_v57 }
 0x492   :  { %3848 = vmatmul.mubr.bf16.vlgmr.msra.gmra.mrb[96].mxu0 %v5107_v22 }
 0x493   :  { %3851 = vmatprep.mubr.bf16.mxu0 %v5110_v18  ;;  %3880 = vmatpush3.bf16.msra.mxu0 %v4248_v57 }
 0x49a   :  { %3852 = vmatmul.mubr.bf16.gmra.mrb[100].mxu0 %v5113_v53  ;;  %v5131_v53 = vld [vmem:[#allocation2 + $0x48] sm:$0xff]  }
 0x49b   :  { %3855 = vmatprep.mubr.bf16.mxu0 %v5116_v0  ;;  %5535 = vst [vmem:[#allocation41_spill] sm:$0xff] %v5131_v53  ;;  %v5134_v0 = vld [vmem:[#allocation2 + $0x50] sm:$0xff]  }
 0x49c   :  { %5536 = vst [vmem:[#allocation42_spill] sm:$0xff] %v5134_v0 }
 0x4a2   :  { %3856 = vmatmul.mubr.bf16.gmra.mrb[104].mxu0 %v5119_v61  ;;  %v5137_v61 = vld [vmem:[#allocation2 + $0x58] sm:$0xff]  }
 0x4a3   :  { %3859 = vmatprep.mubr.bf16.mxu0 %v5122_v58  ;;  %5537 = vst [vmem:[#allocation43_spill] sm:$0xff] %v5137_v61  ;;  %v5140_v58 = vld [vmem:[#allocation2 + $0x60] sm:$0xff]  }
 0x4a4   :  { %5538 = vst [vmem:[#allocation44_spill] sm:$0xff] %v5140_v58 }
 0x4aa   :  { %3860 = vmatmul.mubr.bf16.gmra.mrb[108].mxu0 %v5125_v52  ;;  %v5143_v52 = vld [vmem:[#allocation2 + $0x68] sm:$0xff]  }
 0x4ab   :  { %3863 = vmatprep.mubr.bf16.mxu0 %v5128_v4  ;;  %5539 = vst [vmem:[#allocation45_spill] sm:$0xff] %v5143_v52  ;;  %v5146_v4 = vld [vmem:[#allocation2 + $0x70] sm:$0xff]  }
 0x4ac   :  { %5540 = vst [vmem:[#allocation46_spill] sm:$0xff] %v5146_v4 }
 0x4b2   :  { %3864 = vmatmul.mubr.bf16.gmra.mrb[112].mxu0 %v5131_v53  ;;  %v5149_v53 = vld [vmem:[#allocation2 + $0x78] sm:$0xff]  }
 0x4b3   :  { %3867 = vmatprep.mubr.bf16.mxu0 %v5134_v0  ;;  %5541 = vst [vmem:[#allocation47_spill] sm:$0xff] %v5149_v53  ;;  %v220_v0 = vsub.s32 1, %v4828_v28 }
 0x4ba   :  { %3868 = vmatmul.mubr.bf16.gmra.mrb[116].mxu0 %v5137_v61  ;;  %v5154_v61 = vrot.slane %v4836_v31, %v220_v0  ;;  %v4249_v31 = vld [vmem:[#allocation7 + $0x48] sm:$0xff]  }
 0x4bb   :  { %3871 = vmatprep.mubr.bf16.mxu0 %v5140_v58  ;;  %3881 = vmatprep.subr.bf16.mxu0 %v4249_v31 }
 0x4bc   :  { %v423_v58 = vadd.f32 %v4792_v6, %v5154_v61  ;;  %v413_v18 = vadd.f32 %v4785_v1, %v5154_v61  ;;  %v427_v22 = vadd.f32 %v4794_v8, %v5154_v61  ;;  %v4250_v8 = vld [vmem:[#allocation7 + $0x50] sm:$0xff]   ;;  %3882 = vmatpush3.bf16.msra.mxu0 %v4249_v31 }
 0x4bd   :  { %3883 = vmatprep.subr.bf16.mxu0 %v4250_v8 }
 0x4c0   :  { %3884 = vmatpush3.bf16.msra.mxu0 %v4250_v8  ;;  %v457_v8 = vadd.f32 %v4812_v19, %v5154_v61 }
 0x4c2   :  { %3872 = vmatmul.mubr.bf16.gmra.mrb[120].mxu0 %v5143_v52 }
 0x4c3   :  { %3875 = vmatprep.mubr.bf16.mxu0 %v5146_v4 }
 0x4ca   :  { %3876 = vmatmul.mubr.bf16.gmra.mrb[124].mxu0 %v5149_v53  ;;  %v417_v53 = vadd.f32 %v4787_v3, %v5154_v61  ;;  %v433_v3 = vadd.f32 %v4796_v9, %v5154_v61 }
 0x565   :  { %v3849_v52 = vpop.f32.mrb[96].mxu0 }
 0x566   :  { %v1639_v4 = vadd.f32 %v3849_v52, %v423_v58  ;;  %v1630_v47 = vpop.f32.mrb[97].mxu0  ;;  %v443_v58 = vadd.f32 %v4802_v13, %v5154_v61  ;;  %v4251_v13 = vld [vmem:[#allocation7 + $0x58] sm:$0xff]  }
 0x567   :  { %v1631_v25 = vadd.f32 %v1630_v47, %v413_v18  ;;  %v3850_v28 = vpop.f32.mrb[98].mxu0  ;;  %3885 = vmatprep.subr.bf16.mxu0 %v4251_v13 }
 0x568   :  { %v1642_v0 = vadd.f32 %v3850_v28, %v427_v22  ;;  %v1633_v10 = vpop.f32.mrb[99].mxu0  ;;  %v1759_v6 = vmax.f32 %v1639_v4, 0.0  ;;  %3886 = vmatpush3.bf16.msra.mxu0 %v4251_v13 }
 0x569   :  { %v1634_v38 = vadd.f32 %v1633_v10, %v417_v53  ;;  %v1757_v1 = vmax.f32 %v1631_v25, 0.0  ;;  %v447_v10 = vadd.f32 %v4804_v15, %v5154_v61  ;;  %v463_v15 = vadd.f32 %v4816_v21, %v5154_v61 }
 0x56a   :  { %v1760_v20 = vmax.f32 %v1642_v0, 0.0 }
 0x56b   :  { %v1758_v5 = vmax.f32 %v1634_v38, 0.0  ;;  %v437_v38 = vadd.f32 %v4800_v11, %v5154_v61  ;;  %v453_v11 = vadd.f32 %v4808_v17, %v5154_v61 }
 0x56c   :  { %v5166_v52 = vpack.c.bf16 %v1760_v20, %v1759_v6 }
 0x56d   :  { %v5170_v47 = vpack.c.bf16 %v1758_v5, %v1757_v1  ;;  %v3853_v28 = vpop.f32.mrb[100].mxu0 }
 0x56e   :  { %v1655_v22 = vadd.f32 %v3853_v28, %v443_v58  ;;  %v1646_v57 = vpop.f32.mrb[101].mxu0 }
 0x56f   :  { %v1647_v25 = vadd.f32 %v1646_v57, %v433_v3  ;;  %v3854_v18 = vpop.f32.mrb[102].mxu0  ;;  %v467_v3 = vadd.f32 %v4820_v23, %v5154_v61  ;;  %v473_v23 = vadd.f32 %v4824_v26, %v5154_v61 }
 0x570   :  { %v1658_v20 = vadd.f32 %v3854_v18, %v447_v10  ;;  %v1649_v53 = vpop.f32.mrb[103].mxu0  ;;  %v1763_v9 = vmax.f32 %v1655_v22, 0.0 }
 0x571   :  { %v1650_v4 = vadd.f32 %v1649_v53, %v437_v38  ;;  %v1761_v0 = vmax.f32 %v1647_v25, 0.0 }
 0x572   :  { %v1764_v5 = vmax.f32 %v1658_v20, 0.0 }
 0x573   :  { %v1762_v6 = vmax.f32 %v1650_v4, 0.0  ;;  %v483_v4 = vadd.f32 %v4840_v33, %v5154_v61 }
 0x574   :  { %v5178_v31 = vpack.c.bf16 %v1764_v5, %v1763_v9  ;;  %v487_v5 = vadd.f32 %v4847_v36, %v5154_v61  ;;  %v493_v36 = vadd.f32 %v4855_v48, %v5154_v61 }
 0x575   :  { %v5182_v1 = vpack.c.bf16 %v1762_v6, %v1761_v0  ;;  %v3857_v58 = vpop.f32.mrb[104].mxu0 }
 0x576   :  { %v1671_v28 = vadd.f32 %v3857_v58, %v463_v15  ;;  %v1662_v10 = vpop.f32.mrb[105].mxu0  ;;  %v477_v15 = vadd.f32 %v4830_v29, %v5154_v61 }
 0x577   :  { %v1663_v22 = vadd.f32 %v1662_v10, %v453_v11  ;;  %v3858_v57 = vpop.f32.mrb[106].mxu0 }
 0x578   :  { %v1674_v21 = vadd.f32 %v3858_v57, %v467_v3  ;;  %v1665_v38 = vpop.f32.mrb[107].mxu0  ;;  %v1767_v18 = vmax.f32 %v1671_v28, 0.0  ;;  %v503_v57 = vadd.f32 %v4872_v12, %v5154_v61 }
 0x579   :  { %v1666_v25 = vadd.f32 %v1665_v38, %v457_v8  ;;  %v1765_v17 = vmax.f32 %v1663_v22, 0.0 }
 0x57a   :  { %v1768_v20 = vmax.f32 %v1674_v21, 0.0 }
 0x57b   :  { %v1766_v53 = vmax.f32 %v1666_v25, 0.0  ;;  %v507_v25 = vadd.f32 %v4874_v46, %v5154_v61  ;;  %v513_v46 = vadd.f32 %v4890_v24, %v5154_v61 }
 0x57c   :  { %v5190_v9 = vpack.c.bf16 %v1768_v20, %v1767_v18 }
 0x57d   :  { %v5194_v13 = vpack.c.bf16 %v1766_v53, %v1765_v17  ;;  %v3861_v19 = vpop.f32.mrb[108].mxu0  ;;  %v497_v17 = vadd.f32 %v4859_v55, %v5154_v61  ;;  %v527_v55 = vadd.f32 %v4908_v7, %v5154_v61  ;;  %v543_v7 = vadd.f32 %v4930_v56, %v5154_v61 }
 0x57e   :  { %v1687_v0 = vadd.f32 %v3861_v19, %v483_v4  ;;  %v1678_v6 = vpop.f32.mrb[109].mxu0 }
 0x57f   :  { %v1679_v11 = vadd.f32 %v1678_v6, %v473_v23  ;;  %v3862_v58 = vpop.f32.mrb[110].mxu0 }
 0x580   :  { %v1690_v3 = vadd.f32 %v3862_v58, %v487_v5  ;;  %v1681_v33 = vpop.f32.mrb[111].mxu0  ;;  %v1771_v10 = vmax.f32 %v1687_v0, 0.0 }
 0x581   :  { %v1682_v28 = vadd.f32 %v1681_v33, %v477_v15  ;;  %v1769_v22 = vmax.f32 %v1679_v11, 0.0  ;;  %v523_v15 = vadd.f32 %v4906_v60, %v5154_v61 }
 0x582   :  { %v1772_v8 = vmax.f32 %v1690_v3, 0.0 }
 0x583   :  { %v1770_v26 = vmax.f32 %v1682_v28, 0.0 }
 0x584   :  { %v5202_v21 = vpack.c.bf16 %v1772_v8, %v1771_v10  ;;  %v517_v10 = vadd.f32 %v4892_v40, %v5154_v61  ;;  %v533_v40 = vadd.f32 %v4921_v59, %v5154_v61 }
 0x585   :  { %v5206_v38 = vpack.c.bf16 %v1770_v26, %v1769_v22  ;;  %v3865_v29 = vpop.f32.mrb[112].mxu0 }
 0x586   :  { %v1703_v18 = vadd.f32 %v3865_v29, %v503_v57  ;;  %v1694_v20 = vpop.f32.mrb[113].mxu0 }
 0x587   :  { %v1695_v53 = vadd.f32 %v1694_v20, %v493_v36  ;;  %v3866_v4 = vpop.f32.mrb[114].mxu0 }
 0x588   :  { %v1706_v23 = vadd.f32 %v3866_v4, %v507_v25  ;;  %v1697_v12 = vpop.f32.mrb[115].mxu0  ;;  %v1775_v5 = vmax.f32 %v1703_v18, 0.0 }
 0x589   :  { %v1698_v19 = vadd.f32 %v1697_v12, %v497_v17  ;;  %v1773_v6 = vmax.f32 %v1695_v53, 0.0 }
 0x58a   :  { %v1776_v0 = vmax.f32 %v1706_v23, 0.0  ;;  %v537_v23 = vadd.f32 %v4923_v43, %v5154_v61  ;;  %v553_v43 = vadd.f32 %v4940_v37, %v5154_v61 }
 0x58b   :  { %v1774_v48 = vmax.f32 %v1698_v19, 0.0 }
 0x58c   :  { %v1798_v11 = vpack.c.bf16 %v1776_v0, %v1775_v5 }
 0x58d   :  { %v1797_v58 = vpack.c.bf16 %v1774_v48, %v1773_v6  ;;  %v3869_v3 = vpop.f32.mrb[116].mxu0 }
 0x58e   :  { %v1719_v33 = vadd.f32 %v3869_v3, %v523_v15  ;;  %v1710_v28 = vpop.f32.mrb[117].mxu0 }
 0x58f   :  { %v1711_v8 = vadd.f32 %v1710_v28, %v513_v46  ;;  %v3870_v22 = vpop.f32.mrb[118].mxu0  ;;  %3451 = vmatprep.subr.bf16.mxu1 %v1797_v58 }
 0x590   :  { %v1722_v26 = vadd.f32 %v3870_v22, %v527_v55  ;;  %v1713_v57 = vpop.f32.mrb[119].mxu0  ;;  %3452 = vmatpush3.bf16.msra.mxu1 %v5170_v47  ;;  %v1779_v24 = vmax.f32 %v1719_v33, 0.0  ;;  %v547_v47 = vadd.f32 %v4933_v63, %v5154_v61  ;;  %v563_v63 = vadd.f32 %v4949_v45, %v5154_v61 }
 0x591   :  { %v1714_v60 = vadd.f32 %v1713_v57, %v517_v10  ;;  %3453 = vmatprep.subr.bf16.mxu1 %v1798_v11  ;;  %v1777_v29 = vmax.f32 %v1711_v8, 0.0  ;;  %v557_v55 = vadd.f32 %v4943_v50, %v5154_v61  ;;  %v5542_v50 = vld [vmem:[#allocation17_spill] sm:$0xff] }
 0x592   :  { %v1780_v36 = vmax.f32 %v1722_v26, 0.0 }
 0x593   :  { %v1778_v25 = vmax.f32 %v1714_v60, 0.0  ;;  %v4255_v60 = vld [vmem:[#allocation7 + $0x78] sm:$0xff]  }
 0x594   :  { %v1800_v18 = vpack.c.bf16 %v1780_v36, %v1779_v24  ;;  %3454 = vmatpush3.bf16.msra.mxu1 %v5166_v52  ;;  %v4256_v24 = vld [vmem:[#allocation8 + $0x40] sm:$0xff]   ;;  %v4257_v36 = vld [vmem:[#allocation8 + $0x48] sm:$0xff]  }
 0x595   :  { %v1799_v20 = vpack.c.bf16 %v1778_v25, %v1777_v29  ;;  %v3873_v17 = vpop.f32.mrb[120].mxu0  ;;  %v4258_v29 = vld [vmem:[#allocation8 + $0x50] sm:$0xff]   ;;  %v4259_v25 = vld [vmem:[#allocation8 + $0x58] sm:$0xff]  }
 0x596   :  { %v1735_v53 = vadd.f32 %v3873_v17, %v543_v7  ;;  %v1726_v4 = vpop.f32.mrb[121].mxu0  ;;  %v4260_v7 = vld [vmem:[#allocation8 + $0x60] sm:$0xff]  }
 0x597   :  { %v1727_v12 = vadd.f32 %v1726_v4, %v533_v40  ;;  %v3874_v19 = vpop.f32.mrb[122].mxu0  ;;  %3455 = vmatprep.subr.bf16.mxu1 %v1799_v20 }
 0x598   :  { %v1738_v56 = vadd.f32 %v3874_v19, %v547_v47  ;;  %v1729_v5 = vpop.f32.mrb[123].mxu0  ;;  %3456 = vmatpush3.bf16.msra.mxu1 %v5182_v1  ;;  %v1783_v59 = vmax.f32 %v1735_v53, 0.0  ;;  %v567_v1 = vadd.f32 %v4953_v14, %v5154_v61  ;;  %v5543_v61 = vld [vmem:[#allocation18_spill] sm:$0xff] }
 0x599   :  { %v1730_v52 = vadd.f32 %v1729_v5, %v537_v23  ;;  %3457 = vmatprep.subr.bf16.mxu1 %v1800_v18  ;;  %v1781_v6 = vmax.f32 %v1727_v12, 0.0  ;;  %v4261_v18 = vld [vmem:[#allocation8 + $0x68] sm:$0xff]  }
 0x59a   :  { %v1784_v0 = vmax.f32 %v1738_v56, 0.0 }
 0x59b   :  { %v1782_v48 = vmax.f32 %v1730_v52, 0.0 }
 0x59c   :  { %v1802_v15 = vpack.c.bf16 %v1784_v0, %v1783_v59  ;;  %3458 = vmatpush3.bf16.msra.mxu1 %v5178_v31 }
 0x59d   :  { %v1801_v11 = vpack.c.bf16 %v1782_v48, %v1781_v6  ;;  %v3877_v46 = vpop.f32.mrb[124].mxu0 }
 0x59e   :  { %v1751_v58 = vadd.f32 %v3877_v46, %v563_v63  ;;  %v1742_v3 = vpop.f32.mrb[125].mxu0 }
 0x59f   :  { %v1743_v33 = vadd.f32 %v1742_v3, %v553_v43  ;;  %v3878_v28 = vpop.f32.mrb[126].mxu0  ;;  %3459 = vmatprep.subr.bf16.mxu1 %v1801_v11 }
 0x5a0   :  { %v1754_v45 = vadd.f32 %v3878_v28, %v567_v1  ;;  %v1745_v10 = vpop.f32.mrb[127].mxu0  ;;  %3460 = vmatpush3.bf16.msra.mxu1 %v5194_v13  ;;  %v1787_v37 = vmax.f32 %v1751_v58, 0.0  ;;  %v5545_v13 = vld [vmem:[#allocation20_spill] sm:$0xff] }
 0x5a1   :  { %v1746_v31 = vadd.f32 %v1745_v10, %v557_v55  ;;  %3461 = vmatprep.subr.bf16.mxu1 %v1802_v15  ;;  %v1785_v22 = vmax.f32 %v1743_v33, 0.0 }
 0x5a2   :  { %v1788_v8 = vmax.f32 %v1754_v45, 0.0 }
 0x5a3   :  { %v1786_v26 = vmax.f32 %v1746_v31, 0.0 }
 0x5a4   :  { %v1804_v57 = vpack.c.bf16 %v1788_v8, %v1787_v37  ;;  %3462 = vmatpush3.bf16.msra.mxu1 %v5190_v9  ;;  %v5544_v9 = vld [vmem:[#allocation19_spill] sm:$0xff] }
 0x5a5   :  { %v1803_v14 = vpack.c.bf16 %v1786_v26, %v1785_v22 }
 0x5a7   :  { %3463 = vmatprep.subr.bf16.mxu1 %v1803_v14 }
 0x5a8   :  { %3464 = vmatpush3.bf16.msra.mxu1 %v5206_v38  ;;  %v4254_v38 = vld [vmem:[#allocation7 + $0x70] sm:$0xff]  }
 0x5a9   :  { %3465 = vmatprep.subr.bf16.mxu1 %v1804_v57 }
 0x5ac   :  { %3466 = vmatpush3.bf16.msra.mxu1 %v5202_v21  ;;  %v5546_v21 = vld [vmem:[#allocation21_spill] sm:$0xff] }
 0x5ad   :  { %3911 = vmatprep.subr.bf16.mxu1 %v4256_v24 }
 0x5af   :  { %1838 = vmatmul.mubr.bf16.vlgmr.msra.gmra.mrb[96].mxu1 %v4957_v49  ;;  %v5547_v49 = vld [vmem:[#allocation22_spill] sm:$0xff] }
 0x5b0   :  { %1845 = vmatprep.mubr.bf16.mxu1 %v4960_v35  ;;  %v5548_v35 = vld [vmem:[#allocation23_spill] sm:$0xff]  ;;  %3912 = vmatpush3.bf16.msra.mxu1 %v4256_v24 }
 0x5b1   :  { %3913 = vmatprep.subr.bf16.mxu1 %v4257_v36 }
 0x5b4   :  { %3914 = vmatpush3.bf16.msra.mxu1 %v4257_v36 }
 0x5b5   :  { %3915 = vmatprep.subr.bf16.mxu1 %v4258_v29 }
 0x5b7   :  { %1846 = vmatmul.mubr.bf16.gmra.mrb[100].mxu1 %v4964_v30  ;;  %v5549_v30 = vld [vmem:[#allocation24_spill] sm:$0xff] }
 0x5b8   :  { %1853 = vmatprep.mubr.bf16.mxu1 %v4966_v41  ;;  %v5550_v41 = vld [vmem:[#allocation25_spill] sm:$0xff]  ;;  %3916 = vmatpush3.bf16.msra.mxu1 %v4258_v29 }
 0x5b9   :  { %3917 = vmatprep.subr.bf16.mxu1 %v4259_v25 }
 0x5bc   :  { %3918 = vmatpush3.bf16.msra.mxu1 %v4259_v25 }
 0x5bd   :  { %3919 = vmatprep.subr.bf16.mxu1 %v4260_v7 }
 0x5bf   :  { %1854 = vmatmul.mubr.bf16.gmra.mrb[104].mxu1 %v4970_v42  ;;  %v4252_v42 = vld [vmem:[#allocation7 + $0x60] sm:$0xff]  }
 0x5c0   :  { %1861 = vmatprep.mubr.bf16.mxu1 %v4972_v32  ;;  %3887 = vmatprep.subr.bf16.mxu0 %v4252_v42  ;;  %v4253_v32 = vld [vmem:[#allocation7 + $0x68] sm:$0xff]  }
 0x5c1   :  { %3888 = vmatpush3.bf16.msra.mxu0 %v4252_v42  ;;  %3920 = vmatpush3.bf16.msra.mxu1 %v4260_v7 }
 0x5c2   :  { %3889 = vmatprep.subr.bf16.mxu0 %v4253_v32  ;;  %3921 = vmatprep.subr.bf16.mxu1 %v4261_v18 }
 0x5c5   :  { %3890 = vmatpush3.bf16.msra.mxu0 %v4253_v32  ;;  %3922 = vmatpush3.bf16.msra.mxu1 %v4261_v18  ;;  %v5553_v32 = vld [vmem:[#allocation26_spill] sm:$0xff]  ;;  %v5554_v18 = vld [vmem:[#allocation29_spill] sm:$0xff] }
 0x5c6   :  { %3891 = vmatprep.subr.bf16.mxu0 %v4254_v38 }
 0x5c7   :  { %1862 = vmatmul.mubr.bf16.gmra.mrb[108].mxu1 %v5542_v50 }
 0x5c8   :  { %1869 = vmatprep.mubr.bf16.mxu1 %v5543_v61  ;;  %v5551_v61 = vld [vmem:[#allocation27_spill] sm:$0xff] }
 0x5c9   :  { %3892 = vmatpush3.bf16.msra.mxu0 %v4254_v38 }
 0x5ca   :  { %3893 = vmatprep.subr.bf16.mxu0 %v4255_v60 }
 0x5cd   :  { %3894 = vmatpush3.bf16.msra.mxu0 %v4255_v60 }
 0x5cf   :  { %1870 = vmatmul.mubr.bf16.gmra.mrb[112].mxu1 %v5544_v9 }
 0x5d0   :  { %1877 = vmatprep.mubr.bf16.mxu1 %v5545_v13 }
 0x5d7   :  { %1878 = vmatmul.mubr.bf16.gmra.mrb[116].mxu1 %v5546_v21 }
 0x5d8   :  { %1885 = vmatprep.mubr.bf16.mxu1 %v5547_v49 }
 0x5df   :  { %1886 = vmatmul.mubr.bf16.gmra.mrb[120].mxu1 %v5548_v35 }
 0x5e0   :  { %1893 = vmatprep.mubr.bf16.mxu1 %v5549_v30 }
 0x5e7   :  { %1894 = vmatmul.mubr.bf16.gmra.mrb[124].mxu1 %v5550_v41  ;;  %v5552_v41 = vld [vmem:[#allocation28_spill] sm:$0xff] }
 0x682   :  { %v3467_v40 = vpop.f32.mrb[96].mxu1 }
 0x683   :  { %v3468_v20 = vpop.f32.mrb[97].mxu1 }
 0x684   :  { %v3469_v17 = vadd.f32 %v3468_v20, %v3467_v40  ;;  %v3470_v47 = vpop.f32.mrb[98].mxu1  ;;  %v5555_v20 = vld [vmem:[#allocation31_spill] sm:$0xff] }
 0x685   :  { %v3471_v53 = vpop.f32.mrb[99].mxu1 }
 0x686   :  { %v3472_v4 = vadd.f32 %v3471_v53, %v3470_v47  ;;  %v1840_v23 = vadd.f32 %v3469_v17, %v5059_v44 }
 0x688   :  { %v1843_v12 = vadd.f32 %v3472_v4, %v5063_v2 }
 0x68a   :  { %v3473_v19 = vpop.f32.mrb[100].mxu1  ;;  %v1902_v56 = vpack.c.bf16 %v1843_v12, %v1840_v23 }
 0x68b   :  { %v3474_v5 = vpop.f32.mrb[101].mxu1 }
 0x68c   :  { %v3475_v52 = vadd.f32 %v3474_v5, %v3473_v19  ;;  %v3476_v59 = vpop.f32.mrb[102].mxu1  ;;  %3895 = vmatprep.mubr.bf16.mxu0 %v1902_v56  ;;  %v5556_v5 = vld [vmem:[#allocation32_spill] sm:$0xff] }
 0x68d   :  { %v3477_v0 = vpop.f32.mrb[103].mxu1 }
 0x68e   :  { %v3478_v6 = vadd.f32 %v3477_v0, %v3476_v59  ;;  %v1848_v48 = vadd.f32 %v3475_v52, %v5065_v27  ;;  %v5557_v59 = vld [vmem:[#allocation30_spill] sm:$0xff] }
 0x690   :  { %v1851_v63 = vadd.f32 %v3478_v6, %v5061_v16 }
 0x692   :  { %v1903_v15 = vpack.c.bf16 %v1851_v63, %v1848_v48  ;;  %v3479_v43 = vpop.f32.mrb[104].mxu1  ;;  %v4319_v48 = vld [vmem:[#allocation5 + $0x4] ss:$8 sps:$4 sm:$0xff]   ;;  %v4262_v63 = vld [vmem:[#allocation8 + $0x70] sm:$0xff]  }
 0x693   :  { %v3480_v11 = vpop.f32.mrb[105].mxu1  ;;  %3923 = vmatprep.subr.bf16.mxu1 %v4262_v63 }
 0x694   :  { %v3481_v46 = vadd.f32 %v3480_v11, %v3479_v43  ;;  %v3482_v1 = vpop.f32.mrb[106].mxu1  ;;  %3896 = vmatmul.mubr.bf16.vlgmr.msra.gmra.mrb[128].mxu0 %v1903_v15  ;;  %3924 = vmatpush3.bf16.msra.mxu1 %v4262_v63  ;;  %v4263_v15 = vld [vmem:[#allocation8 + $0x78] sm:$0xff]   ;;  %v3242_v43 = vld [vmem:[%s5471_s7 + $0x1] ss:$0 sm:$0xff] }
 0x695   :  { %v3483_v44 = vpop.f32.mrb[107].mxu1  ;;  %3925 = vmatprep.subr.bf16.mxu1 %v4263_v15 }
 0x696   :  { %v3484_v2 = vadd.f32 %v3483_v44, %v3482_v1  ;;  %v1856_v58 = vadd.f32 %v3481_v46, %v5071_v54 }
 0x698   :  { %v1859_v3 = vadd.f32 %v3484_v2, %v5075_v62  ;;  %3926 = vmatpush3.bf16.msra.mxu1 %v4263_v15 }
 0x69a   :  { %v3485_v55 = vpop.f32.mrb[108].mxu1  ;;  %v1904_v33 = vpack.c.bf16 %v1859_v3, %v1856_v58 }
 0x69b   :  { %v3486_v28 = vpop.f32.mrb[109].mxu1 }
 0x69c   :  { %v3487_v45 = vadd.f32 %v3486_v28, %v3485_v55  ;;  %v3488_v10 = vpop.f32.mrb[110].mxu1  ;;  %3899 = vmatprep.mubr.bf16.mxu0 %v1904_v33 }
 0x69d   :  { %v3489_v27 = vpop.f32.mrb[111].mxu1 }
 0x69e   :  { %v3490_v16 = vadd.f32 %v3489_v27, %v3488_v10  ;;  %v1864_v31 = vadd.f32 %v3487_v45, %v5077_v39 }
 0x6a0   :  { %v1867_v37 = vadd.f32 %v3490_v16, %v5073_v51 }
 0x6a2   :  { %v3491_v8 = vpop.f32.mrb[112].mxu1  ;;  %v1905_v22 = vpack.c.bf16 %v1867_v37, %v1864_v31 }
 0x6a3   :  { %v3492_v26 = vpop.f32.mrb[113].mxu1 }
 0x6a4   :  { %v3493_v57 = vadd.f32 %v3492_v26, %v3491_v8  ;;  %v3494_v14 = vpop.f32.mrb[114].mxu1  ;;  %3900 = vmatmul.mubr.bf16.gmra.mrb[132].mxu0 %v1905_v22 }
 0x6a5   :  { %v3495_v54 = vpop.f32.mrb[115].mxu1 }
 0x6a6   :  { %v3496_v62 = vadd.f32 %v3495_v54, %v3494_v14  ;;  %v1872_v50 = vadd.f32 %v3493_v57, %v5083_v34 }
 0x6a8   :  { %v1875_v9 = vadd.f32 %v3496_v62, %v5551_v61 }
 0x6aa   :  { %v3497_v13 = vpop.f32.mrb[116].mxu1  ;;  %v1906_v21 = vpack.c.bf16 %v1875_v9, %v1872_v50 }
 0x6ab   :  { %v3498_v49 = vpop.f32.mrb[117].mxu1 }
 0x6ac   :  { %v3499_v35 = vadd.f32 %v3498_v49, %v3497_v13  ;;  %v3500_v30 = vpop.f32.mrb[118].mxu1  ;;  %3903 = vmatprep.mubr.bf16.mxu0 %v1906_v21 }
 0x6ad   :  { %v3501_v39 = vpop.f32.mrb[119].mxu1 }
 0x6ae   :  { %v3502_v51 = vadd.f32 %v3501_v39, %v3500_v30  ;;  %v1880_v42 = vadd.f32 %v3499_v35, %v5552_v41 }
 0x6b0   :  { %v1883_v38 = vadd.f32 %v3502_v51, %v5553_v32 }
 0x6b2   :  { %v3503_v60 = vpop.f32.mrb[120].mxu1  ;;  %v1907_v24 = vpack.c.bf16 %v1883_v38, %v1880_v42 }
 0x6b3   :  { %v3504_v36 = vpop.f32.mrb[121].mxu1 }
 0x6b4   :  { %v3505_v29 = vadd.f32 %v3504_v36, %v3503_v60  ;;  %v3506_v25 = vpop.f32.mrb[122].mxu1  ;;  %3904 = vmatmul.mubr.bf16.gmra.mrb[136].mxu0 %v1907_v24 }
 0x6b5   :  { %v3507_v34 = vpop.f32.mrb[123].mxu1 }
 0x6b6   :  { %v3508_v7 = vadd.f32 %v3507_v34, %v3506_v25  ;;  %v1888_v40 = vadd.f32 %v3505_v29, %v5554_v18 }
 0x6b8   :  { %v1891_v17 = vadd.f32 %v3508_v7, %v5555_v20 }
 0x6ba   :  { %v3509_v47 = vpop.f32.mrb[124].mxu1  ;;  %v1908_v53 = vpack.c.bf16 %v1891_v17, %v1888_v40 }
 0x6bb   :  { %v3510_v4 = vpop.f32.mrb[125].mxu1 }
 0x6bc   :  { %v3511_v23 = vadd.f32 %v3510_v4, %v3509_v47  ;;  %v3512_v12 = vpop.f32.mrb[126].mxu1  ;;  %3907 = vmatprep.mubr.bf16.mxu0 %v1908_v53 }
 0x6bd   :  { %v3513_v19 = vpop.f32.mrb[127].mxu1 }
 0x6be   :  { %v3514_v56 = vadd.f32 %v3513_v19, %v3512_v12  ;;  %v1896_v52 = vadd.f32 %v3511_v23, %v5556_v5 }
 0x6c0   :  { %v1899_v0 = vadd.f32 %v3514_v56, %v5557_v59 }
 0x6c2   :  { %v1909_v6 = vpack.c.bf16 %v1899_v0, %v1896_v52  ;;  %v4320_v52 = vld [vmem:[#allocation2] sm:$0xff]  }
 0x6c3   :  { %v3252_v0 = vld [vmem:[%s5473_s9 + $0x1] ss:$0 sm:$0xff] }
 0x6c4   :  { %3908 = vmatmul.mubr.bf16.gmra.mrb[140].mxu0 %v1909_v6 }
 0x6c5   :  { %2523 = vmatprep.mubr.bf16.mxu0 %v4319_v48 }
 0x767   :  { %v3897_v11 = vpop.f32.mrb[128].mxu0 }
 0x768   :  { %v2026_v46 = vadd.f32 %v3897_v11, %v3242_v43  ;;  %v2017_v1 = vpop.f32.mrb[129].mxu0 }
 0x769   :  { %v2018_v44 = vadd.f32 %v3242_v43, %v2017_v1  ;;  %v3898_v2 = vpop.f32.mrb[130].mxu0 }
 0x76a   :  { %v2029_v58 = vadd.f32 %v3898_v2, %v3242_v43  ;;  %v2020_v3 = vpop.f32.mrb[131].mxu0  ;;  %v2082_v33 = vmax.f32 %v2026_v46, 0.0 }
 0x76b   :  { %v2021_v55 = vadd.f32 %v3242_v43, %v2020_v3  ;;  %v2080_v45 = vmax.f32 %v2018_v44, 0.0 }
 0x76c   :  { %v2083_v28 = vmax.f32 %v2029_v58, 0.0 }
 0x76d   :  { %v2081_v10 = vmax.f32 %v2021_v55, 0.0 }
 0x76e   :  { %v2097_v27 = vpack.c.bf16 %v2083_v28, %v2082_v33 }
 0x76f   :  { %v2096_v16 = vpack.c.bf16 %v2081_v10, %v2080_v45 }
 0x771   :  { %3927 = vmatprep.mubr.bf16.mxu1 %v2096_v16 }
 0x772   :  { %3928 = vmatmul.mubr.bf16.vlgmr.msra.gmra.mrb[128].mxu1 %v2097_v27 }
 0x777   :  { %v3901_v31 = vpop.f32.mrb[132].mxu0 }
 0x778   :  { %v2042_v37 = vadd.f32 %v3901_v31, %v3242_v43  ;;  %v2033_v8 = vpop.f32.mrb[133].mxu0 }
 0x779   :  { %v2034_v22 = vadd.f32 %v3242_v43, %v2033_v8  ;;  %v3902_v26 = vpop.f32.mrb[134].mxu0 }
 0x77a   :  { %v2045_v57 = vadd.f32 %v3902_v26, %v3242_v43  ;;  %v2036_v14 = vpop.f32.mrb[135].mxu0  ;;  %v2086_v62 = vmax.f32 %v2042_v37, 0.0 }
 0x77b   :  { %v2037_v54 = vadd.f32 %v3242_v43, %v2036_v14  ;;  %v2084_v61 = vmax.f32 %v2034_v22, 0.0 }
 0x77c   :  { %v2087_v50 = vmax.f32 %v2045_v57, 0.0 }
 0x77d   :  { %v2085_v9 = vmax.f32 %v2037_v54, 0.0 }
 0x77e   :  { %v2099_v13 = vpack.c.bf16 %v2087_v50, %v2086_v62 }
 0x77f   :  { %v2098_v21 = vpack.c.bf16 %v2085_v9, %v2084_v61 }
 0x781   :  { %3931 = vmatprep.mubr.bf16.mxu1 %v2098_v21 }
 0x782   :  { %3932 = vmatmul.mubr.bf16.gmra.mrb[132].mxu1 %v2099_v13 }
 0x787   :  { %v3905_v49 = vpop.f32.mrb[136].mxu0 }
 0x788   :  { %v2058_v35 = vadd.f32 %v3905_v49, %v3242_v43  ;;  %v2049_v30 = vpop.f32.mrb[137].mxu0 }
 0x789   :  { %v2050_v39 = vadd.f32 %v3242_v43, %v2049_v30  ;;  %v3906_v51 = vpop.f32.mrb[138].mxu0 }
 0x78a   :  { %v2061_v41 = vadd.f32 %v3906_v51, %v3242_v43  ;;  %v2052_v42 = vpop.f32.mrb[139].mxu0  ;;  %v2090_v38 = vmax.f32 %v2058_v35, 0.0 }
 0x78b   :  { %v2053_v32 = vadd.f32 %v3242_v43, %v2052_v42  ;;  %v2088_v24 = vmax.f32 %v2050_v39, 0.0  ;;  %v5558_v42 = vld [vmem:[#allocation33_spill] sm:$0xff] }
 0x78c   :  { %v2091_v60 = vmax.f32 %v2061_v41, 0.0 }
 0x78d   :  { %v2089_v36 = vmax.f32 %v2053_v32, 0.0  ;;  %v5559_v32 = vld [vmem:[#allocation34_spill] sm:$0xff] }
 0x78e   :  { %v2101_v29 = vpack.c.bf16 %v2091_v60, %v2090_v38  ;;  %v5560_v38 = vld [vmem:[#allocation35_spill] sm:$0xff]  ;;  %v5561_v60 = vld [vmem:[#allocation36_spill] sm:$0xff] }
 0x78f   :  { %v2100_v25 = vpack.c.bf16 %v2089_v36, %v2088_v24  ;;  %v5562_v24 = vld [vmem:[#allocation37_spill] sm:$0xff]  ;;  %v5563_v36 = vld [vmem:[#allocation38_spill] sm:$0xff] }
 0x791   :  { %3935 = vmatprep.mubr.bf16.mxu1 %v2100_v25  ;;  %v5565_v25 = vld [vmem:[#allocation40_spill] sm:$0xff] }
 0x792   :  { %3936 = vmatmul.mubr.bf16.gmra.mrb[136].mxu1 %v2101_v29  ;;  %v5564_v29 = vld [vmem:[#allocation39_spill] sm:$0xff] }
 0x797   :  { %v3909_v34 = vpop.f32.mrb[140].mxu0 }
 0x798   :  { %v2074_v7 = vadd.f32 %v3909_v34, %v3242_v43  ;;  %v2065_v18 = vpop.f32.mrb[141].mxu0  ;;  %v5566_v34 = vld [vmem:[#allocation41_spill] sm:$0xff] }
 0x799   :  { %v2066_v40 = vadd.f32 %v3242_v43, %v2065_v18  ;;  %v3910_v20 = vpop.f32.mrb[142].mxu0  ;;  %v5568_v18 = vld [vmem:[#allocation43_spill] sm:$0xff] }
 0x79a   :  { %v2077_v17 = vadd.f32 %v3910_v20, %v3242_v43  ;;  %v2068_v47 = vpop.f32.mrb[143].mxu0  ;;  %v2094_v4 = vmax.f32 %v2074_v7, 0.0  ;;  %v5567_v7 = vld [vmem:[#allocation42_spill] sm:$0xff]  ;;  %v5570_v20 = vld [vmem:[#allocation45_spill] sm:$0xff] }
 0x79b   :  { %v2069_v53 = vadd.f32 %v3242_v43, %v2068_v47  ;;  %v2092_v12 = vmax.f32 %v2066_v40, 0.0  ;;  %v5569_v40 = vld [vmem:[#allocation44_spill] sm:$0xff]  ;;  %v5572_v47 = vld [vmem:[#allocation47_spill] sm:$0xff] }
 0x79c   :  { %v2095_v23 = vmax.f32 %v2077_v17, 0.0  ;;  %v5571_v17 = vld [vmem:[#allocation46_spill] sm:$0xff] }
 0x79d   :  { %v2093_v19 = vmax.f32 %v2069_v53, 0.0  ;;  %v5573_v53 = vld [vmem:[#allocation16_spill] sm:$0xff] }
 0x79e   :  { %v2103_v56 = vpack.c.bf16 %v2095_v23, %v2094_v4  ;;  %v224_v4 = vsub.s32 2, %v5573_v53  ;;  %v4321_v23 = vld [vmem:[%s5469_s5] sm:$0x7] }
 0x79f   :  { %v2102_v5 = vpack.c.bf16 %v2093_v19, %v2092_v12 }
 0x7a0   :  { %v5348_v12 = vrot.slane %v4321_v23, %v224_v4 }
 0x7a1   :  { %3939 = vmatprep.mubr.bf16.mxu1 %v2102_v5 }
 0x7a2   :  { %3940 = vmatmul.mubr.bf16.gmra.mrb[140].mxu1 %v2103_v56 }
 0x7a3   :  { %3959 = vmatprep.mubr.bf16.mxu1 %v4320_v52 }
 0x845   :  { %v3929_v59 = vpop.f32.mrb[128].mxu1 }
 0x846   :  { %v2211_v6 = vpop.f32.mrb[129].mxu1  ;;  %v5287_v46 = vadd.f32 %v3929_v59, %v3252_v0 }
 0x847   :  { %v3930_v48 = vpop.f32.mrb[130].mxu1  ;;  %v5281_v15 = vadd.f32 %v3252_v0, %v2211_v6 }
 0x848   :  { %v2214_v63 = vpop.f32.mrb[131].mxu1  ;;  %v5283_v43 = vadd.f32 %v3930_v48, %v3252_v0 }
 0x849   :  { %v5285_v11 = vadd.f32 %v3252_v0, %v2214_v63 }
 0x84a   :  { %v2275_v44 = vpack.c.bf16 %v5283_v43, %v5287_v46 }
 0x84b   :  { %v2274_v1 = vpack.c.bf16 %v5285_v11, %v5281_v15 }
 0x84d   :  { %3943 = vmatprep.subr.bf16.mxu1 %v2274_v1 }
 0x84e   :  { %3944 = vmatpush3.bf16.msra.mxu1 %v2274_v1 }
 0x84f   :  { %3945 = vmatprep.subr.bf16.mxu1 %v2275_v44 }
 0x852   :  { %3946 = vmatpush3.bf16.msra.mxu1 %v2275_v44 }
 0x855   :  { %v3933_v2 = vpop.f32.mrb[132].mxu1 }
 0x856   :  { %v2227_v58 = vpop.f32.mrb[133].mxu1  ;;  %v5299_v10 = vadd.f32 %v3933_v2, %v3252_v0 }
 0x857   :  { %v3934_v3 = vpop.f32.mrb[134].mxu1  ;;  %v5293_v33 = vadd.f32 %v3252_v0, %v2227_v58 }
 0x858   :  { %v2230_v55 = vpop.f32.mrb[135].mxu1  ;;  %v5295_v28 = vadd.f32 %v3934_v3, %v3252_v0 }
 0x859   :  { %v5297_v45 = vadd.f32 %v3252_v0, %v2230_v55 }
 0x85a   :  { %v2277_v16 = vpack.c.bf16 %v5295_v28, %v5299_v10 }
 0x85b   :  { %v2276_v27 = vpack.c.bf16 %v5297_v45, %v5293_v33 }
 0x85d   :  { %3947 = vmatprep.subr.bf16.mxu1 %v2276_v27 }
 0x85e   :  { %3948 = vmatpush3.bf16.msra.mxu1 %v2276_v27 }
 0x85f   :  { %3949 = vmatprep.subr.bf16.mxu1 %v2277_v16 }
 0x862   :  { %3950 = vmatpush3.bf16.msra.mxu1 %v2277_v16 }
 0x865   :  { %v3937_v31 = vpop.f32.mrb[136].mxu1 }
 0x866   :  { %v2243_v37 = vpop.f32.mrb[137].mxu1  ;;  %v5311_v54 = vadd.f32 %v3937_v31, %v3252_v0 }
 0x867   :  { %v3938_v8 = vpop.f32.mrb[138].mxu1  ;;  %v5305_v26 = vadd.f32 %v3252_v0, %v2243_v37 }
 0x868   :  { %v2246_v22 = vpop.f32.mrb[139].mxu1  ;;  %v5307_v57 = vadd.f32 %v3938_v8, %v3252_v0 }
 0x869   :  { %v5309_v14 = vadd.f32 %v3252_v0, %v2246_v22 }
 0x86a   :  { %v2279_v50 = vpack.c.bf16 %v5307_v57, %v5311_v54 }
 0x86b   :  { %v2278_v62 = vpack.c.bf16 %v5309_v14, %v5305_v26 }
 0x86d   :  { %3951 = vmatprep.subr.bf16.mxu1 %v2278_v62 }
 0x86e   :  { %3952 = vmatpush3.bf16.msra.mxu1 %v2278_v62 }
 0x86f   :  { %3953 = vmatprep.subr.bf16.mxu1 %v2279_v50 }
 0x872   :  { %3954 = vmatpush3.bf16.msra.mxu1 %v2279_v50 }
 0x875   :  { %v3941_v61 = vpop.f32.mrb[140].mxu1 }
 0x876   :  { %v2259_v9 = vpop.f32.mrb[141].mxu1  ;;  %v5323_v39 = vadd.f32 %v3941_v61, %v3252_v0 }
 0x877   :  { %v3942_v13 = vpop.f32.mrb[142].mxu1  ;;  %v5317_v49 = vadd.f32 %v3252_v0, %v2259_v9 }
 0x878   :  { %v2262_v21 = vpop.f32.mrb[143].mxu1  ;;  %v5319_v35 = vadd.f32 %v3942_v13, %v3252_v0 }
 0x879   :  { %v5321_v30 = vadd.f32 %v3252_v0, %v2262_v21 }
 0x87a   :  { %v2281_v41 = vpack.c.bf16 %v5319_v35, %v5323_v39 }
 0x87b   :  { %v2280_v51 = vpack.c.bf16 %v5321_v30, %v5317_v49 }
 0x87d   :  { %3955 = vmatprep.subr.bf16.mxu1 %v2280_v51 }
 0x87e   :  { %3956 = vmatpush3.bf16.msra.mxu1 %v2280_v51 }
 0x87f   :  { %3957 = vmatprep.subr.bf16.mxu1 %v2281_v41 }
 0x882   :  { %3958 = vmatpush3.bf16.msra.mxu1 %v2281_v41 }
 0x885   :  { %3960 = vmatmul.mubr.bf16.vlgmr.msra.gmra.mrb[0].mxu1 %v5558_v42 }
 0x886   :  { %3963 = vmatprep.mubr.bf16.mxu1 %v5559_v32 }
 0x88d   :  { %3964 = vmatmul.mubr.bf16.gmra.mrb[4].mxu1 %v5560_v38 }
 0x88e   :  { %3967 = vmatprep.mubr.bf16.mxu1 %v5561_v60 }
 0x895   :  { %3968 = vmatmul.mubr.bf16.gmra.mrb[8].mxu1 %v5562_v24 }
 0x896   :  { %3971 = vmatprep.mubr.bf16.mxu1 %v5563_v36 }
 0x89d   :  { %3972 = vmatmul.mubr.bf16.gmra.mrb[12].mxu1 %v5564_v29 }
 0x89e   :  { %3975 = vmatprep.mubr.bf16.mxu1 %v5565_v25 }
 0x8a5   :  { %3976 = vmatmul.mubr.bf16.gmra.mrb[16].mxu1 %v5566_v34 }
 0x8a6   :  { %3979 = vmatprep.mubr.bf16.mxu1 %v5567_v7 }
 0x8ad   :  { %3980 = vmatmul.mubr.bf16.gmra.mrb[20].mxu1 %v5568_v18 }
 0x8ae   :  { %3983 = vmatprep.mubr.bf16.mxu1 %v5569_v40 }
 0x8b5   :  { %3984 = vmatmul.mubr.bf16.gmra.mrb[24].mxu1 %v5570_v20 }
 0x8b6   :  { %3987 = vmatprep.mubr.bf16.mxu1 %v5571_v17 }
 0x8bd   :  { %3988 = vmatmul.mubr.bf16.gmra.mrb[28].mxu1 %v5572_v47 }
 0x958   :  { %v3961_v19 = vpop.f32.mrb[0].mxu1 }
 0x959   :  { %v4095_v56 = vadd.f32 %v3961_v19, %v5348_v12  ;;  %v2316_v5 = vpop.f32.mrb[1].mxu1 }
 0x95a   :  { %v4096_v52 = vadd.f32 %v2316_v5, %v5348_v12  ;;  %v3962_v59 = vpop.f32.mrb[2].mxu1 }
 0x95b   :  { %v4097_v0 = vadd.f32 %v3962_v59, %v5348_v12  ;;  %v2319_v6 = vpop.f32.mrb[3].mxu1  ;;  %v2445_v63 = vmax.f32 %v4095_v56, 0.0 }
 0x95c   :  { %v4098_v48 = vadd.f32 %v2319_v6, %v5348_v12  ;;  %v2443_v44 = vmax.f32 %v4096_v52, 0.0 }
 0x95d   :  { %v2446_v1 = vmax.f32 %v4097_v0, 0.0 }
 0x95e   :  { %v2444_v2 = vmax.f32 %v4098_v48, 0.0 }
 0x95f   :  { %v5354_v58 = vpack.c.bf16 %v2446_v1, %v2445_v63 }
 0x960   :  { %v5356_v3 = vpack.c.bf16 %v2444_v2, %v2443_v44  ;;  %v3965_v55 = vpop.f32.mrb[4].mxu1 }
 0x961   :  { %v4099_v27 = vadd.f32 %v3965_v55, %v5348_v12  ;;  %v2332_v16 = vpop.f32.mrb[5].mxu1 }
 0x962   :  { %v4100_v31 = vadd.f32 %v2332_v16, %v5348_v12  ;;  %v3966_v37 = vpop.f32.mrb[6].mxu1 }
 0x963   :  { %v4101_v8 = vadd.f32 %v3966_v37, %v5348_v12  ;;  %v2335_v22 = vpop.f32.mrb[7].mxu1  ;;  %v2449_v50 = vmax.f32 %v4099_v27, 0.0 }
 0x964   :  { %v4102_v62 = vadd.f32 %v2335_v22, %v5348_v12  ;;  %v2447_v9 = vmax.f32 %v4100_v31, 0.0 }
 0x965   :  { %v2450_v61 = vmax.f32 %v4101_v8, 0.0 }
 0x966   :  { %v2448_v13 = vmax.f32 %v4102_v62, 0.0 }
 0x967   :  { %v5362_v21 = vpack.c.bf16 %v2450_v61, %v2449_v50 }
 0x968   :  { %v5364_v51 = vpack.c.bf16 %v2448_v13, %v2447_v9  ;;  %v3969_v41 = vpop.f32.mrb[8].mxu1 }
 0x969   :  { %v4103_v42 = vadd.f32 %v3969_v41, %v5348_v12  ;;  %v2348_v32 = vpop.f32.mrb[9].mxu1 }
 0x96a   :  { %v4104_v38 = vadd.f32 %v2348_v32, %v5348_v12  ;;  %v3970_v60 = vpop.f32.mrb[10].mxu1 }
 0x96b   :  { %v4105_v24 = vadd.f32 %v3970_v60, %v5348_v12  ;;  %v2351_v36 = vpop.f32.mrb[11].mxu1  ;;  %v2453_v25 = vmax.f32 %v4103_v42, 0.0 }
 0x96c   :  { %v4106_v29 = vadd.f32 %v2351_v36, %v5348_v12  ;;  %v2451_v7 = vmax.f32 %v4104_v38, 0.0 }
 0x96d   :  { %v2454_v34 = vmax.f32 %v4105_v24, 0.0 }
 0x96e   :  { %v2452_v18 = vmax.f32 %v4106_v29, 0.0 }
 0x96f   :  { %v5370_v40 = vpack.c.bf16 %v2454_v34, %v2453_v25 }
 0x970   :  { %v5372_v20 = vpack.c.bf16 %v2452_v18, %v2451_v7  ;;  %v3973_v17 = vpop.f32.mrb[12].mxu1 }
 0x971   :  { %v4107_v47 = vadd.f32 %v3973_v17, %v5348_v12  ;;  %v2364_v53 = vpop.f32.mrb[13].mxu1 }
 0x972   :  { %v4108_v4 = vadd.f32 %v2364_v53, %v5348_v12  ;;  %v3974_v23 = vpop.f32.mrb[14].mxu1 }
 0x973   :  { %v4109_v19 = vadd.f32 %v3974_v23, %v5348_v12  ;;  %v2367_v56 = vpop.f32.mrb[15].mxu1  ;;  %v2457_v52 = vmax.f32 %v4107_v47, 0.0 }
 0x974   :  { %v4110_v5 = vadd.f32 %v2367_v56, %v5348_v12  ;;  %v2455_v0 = vmax.f32 %v4108_v4, 0.0 }
 0x975   :  { %v2458_v59 = vmax.f32 %v4109_v19, 0.0 }
 0x976   :  { %v2456_v6 = vmax.f32 %v4110_v5, 0.0 }
 0x977   :  { %v5378_v48 = vpack.c.bf16 %v2458_v59, %v2457_v52 }
 0x978   :  { %v5380_v63 = vpack.c.bf16 %v2456_v6, %v2455_v0  ;;  %v3977_v1 = vpop.f32.mrb[16].mxu1 }
 0x979   :  { %v4111_v44 = vadd.f32 %v3977_v1, %v5348_v12  ;;  %v2380_v2 = vpop.f32.mrb[17].mxu1 }
 0x97a   :  { %v4112_v55 = vadd.f32 %v2380_v2, %v5348_v12  ;;  %v3978_v27 = vpop.f32.mrb[18].mxu1 }
 0x97b   :  { %v4113_v16 = vadd.f32 %v3978_v27, %v5348_v12  ;;  %v2383_v31 = vpop.f32.mrb[19].mxu1  ;;  %v2461_v8 = vmax.f32 %v4111_v44, 0.0 }
 0x97c   :  { %v4114_v37 = vadd.f32 %v2383_v31, %v5348_v12  ;;  %v2459_v62 = vmax.f32 %v4112_v55, 0.0 }
 0x97d   :  { %v2462_v22 = vmax.f32 %v4113_v16, 0.0 }
 0x97e   :  { %v2460_v50 = vmax.f32 %v4114_v37, 0.0 }
 0x97f   :  { %v2484_v61 = vpack.c.bf16 %v2462_v22, %v2461_v8 }
 0x980   :  { %v2483_v9 = vpack.c.bf16 %v2460_v50, %v2459_v62  ;;  %v3981_v13 = vpop.f32.mrb[20].mxu1 }
 0x981   :  { %v4115_v41 = vadd.f32 %v3981_v13, %v5348_v12  ;;  %v2396_v42 = vpop.f32.mrb[21].mxu1  ;;  %v4322_v13 = vld [vmem:[#allocation5] ss:$8 sps:$4 sm:$0xff]  }
 0x982   :  { %v4116_v32 = vadd.f32 %v2396_v42, %v5348_v12  ;;  %v3982_v38 = vpop.f32.mrb[22].mxu1  ;;  %3571 = vmatprep.subr.bf16.mxu0 %v2483_v9  ;;  %v4264_v9 = vld [vmem:[#allocation7 + $0x80] sm:$0xff]   ;;  %v4324_v42 = vld [vmem:[#allocation5 + $0x10] ss:$8 sps:$4 sm:$0xff]  }
 0x983   :  { %v4117_v60 = vadd.f32 %v3982_v38, %v5348_v12  ;;  %v2399_v24 = vpop.f32.mrb[23].mxu1  ;;  %3572 = vmatpush3.bf16.msra.mxu0 %v5356_v3  ;;  %v2465_v29 = vmax.f32 %v4115_v41, 0.0  ;;  %v4266_v41 = vld [vmem:[#allocation7 + $0x90] sm:$0xff]  }
 0x984   :  { %v4118_v36 = vadd.f32 %v2399_v24, %v5348_v12  ;;  %3573 = vmatprep.subr.bf16.mxu0 %v2484_v61  ;;  %v2463_v34 = vmax.f32 %v4116_v32, 0.0  ;;  %v4325_v32 = vld [vmem:[#allocation5 + $0x24] ss:$8 sps:$4 sm:$0xff]   ;;  %v4328_v38 = vld [vmem:[#allocation5 + $0x30] ss:$8 sps:$4 sm:$0xff]  }
 0x985   :  { %v2466_v25 = vmax.f32 %v4117_v60, 0.0  ;;  %v4329_v60 = vld [vmem:[#allocation5 + $0x44] ss:$8 sps:$4 sm:$0xff]   ;;  %v4330_v24 = vld [vmem:[#allocation5 + $0x40] ss:$8 sps:$4 sm:$0xff]  }
 0x986   :  { %v2464_v7 = vmax.f32 %v4118_v36, 0.0  ;;  %v4331_v36 = vld [vmem:[#allocation5 + $0x54] ss:$8 sps:$4 sm:$0xff]  }
 0x987   :  { %v2486_v18 = vpack.c.bf16 %v2466_v25, %v2465_v29  ;;  %3574 = vmatpush3.bf16.msra.mxu0 %v5354_v58  ;;  %v4332_v29 = vld [vmem:[#allocation5 + $0x50] ss:$8 sps:$4 sm:$0xff]   ;;  %v4333_v25 = vld [vmem:[#allocation5 + $0x64] ss:$8 sps:$4 sm:$0xff]  }
 0x988   :  { %v2485_v17 = vpack.c.bf16 %v2464_v7, %v2463_v34  ;;  %v3985_v47 = vpop.f32.mrb[24].mxu1  ;;  %v4334_v34 = vld [vmem:[#allocation5 + $0x60] ss:$8 sps:$4 sm:$0xff]   ;;  %v4335_v7 = vld [vmem:[#allocation5 + $0x74] ss:$8 sps:$4 sm:$0xff]  }
 0x989   :  { %v4119_v53 = vadd.f32 %v3985_v47, %v5348_v12  ;;  %v2412_v4 = vpop.f32.mrb[25].mxu1  ;;  %v4269_v47 = vld [vmem:[#allocation7 + $0xa8] sm:$0xff]  }
 0x98a   :  { %v4120_v23 = vadd.f32 %v2412_v4, %v5348_v12  ;;  %v3986_v19 = vpop.f32.mrb[26].mxu1  ;;  %3575 = vmatprep.subr.bf16.mxu0 %v2485_v17  ;;  %v4268_v17 = vld [vmem:[#allocation7 + $0xa0] sm:$0xff]   ;;  %v4271_v4 = vld [vmem:[#allocation7 + $0xb8] sm:$0xff]  }
 0x98b   :  { %v4121_v3 = vadd.f32 %v3986_v19, %v5348_v12  ;;  %v2415_v56 = vpop.f32.mrb[27].mxu1  ;;  %3576 = vmatpush3.bf16.msra.mxu0 %v5364_v51  ;;  %v2469_v52 = vmax.f32 %v4119_v53, 0.0  ;;  %v4270_v53 = vld [vmem:[#allocation7 + $0xb0] sm:$0xff]   ;;  %v4273_v19 = vld [vmem:[#allocation8 + $0x88] sm:$0xff]  }
 0x98c   :  { %v4122_v5 = vadd.f32 %v2415_v56, %v5348_v12  ;;  %3577 = vmatprep.subr.bf16.mxu0 %v2486_v18  ;;  %v2467_v58 = vmax.f32 %v4120_v23, 0.0  ;;  %v4336_v18 = vld [vmem:[#allocation5 + $0x70] ss:$8 sps:$4 sm:$0xff]   ;;  %v4272_v23 = vld [vmem:[#allocation8 + $0x80] sm:$0xff]  }
 0x98d   :  { %v2470_v59 = vmax.f32 %v4121_v3, 0.0  ;;  %4023 = vmatprep.subr.bf16.mxu1 %v4272_v23  ;;  %v4274_v3 = vld [vmem:[#allocation8 + $0x90] sm:$0xff]   ;;  %v4275_v56 = vld [vmem:[#allocation8 + $0x98] sm:$0xff]  }
 0x98e   :  { %v2468_v0 = vmax.f32 %v4122_v5, 0.0  ;;  %4024 = vmatpush3.bf16.msra.mxu1 %v4272_v23  ;;  %v4276_v5 = vld [vmem:[#allocation8 + $0xa0] sm:$0xff]  }
 0x98f   :  { %v2488_v6 = vpack.c.bf16 %v2470_v59, %v2469_v52  ;;  %3578 = vmatpush3.bf16.msra.mxu0 %v5362_v21  ;;  %4025 = vmatprep.subr.bf16.mxu1 %v4273_v19  ;;  %v4277_v52 = vld [vmem:[#allocation8 + $0xa8] sm:$0xff]  }
 0x990   :  { %v2487_v1 = vpack.c.bf16 %v2468_v0, %v2467_v58  ;;  %v3989_v44 = vpop.f32.mrb[28].mxu1 }
 0x991   :  { %v4123_v2 = vadd.f32 %v3989_v44, %v5348_v12  ;;  %v2428_v55 = vpop.f32.mrb[29].mxu1 }
 0x992   :  { %v4124_v27 = vadd.f32 %v2428_v55, %v5348_v12  ;;  %v3990_v16 = vpop.f32.mrb[30].mxu1  ;;  %3579 = vmatprep.subr.bf16.mxu0 %v2487_v1  ;;  %4026 = vmatpush3.bf16.msra.mxu1 %v4273_v19 }
 0x993   :  { %v4125_v51 = vadd.f32 %v3990_v16, %v5348_v12  ;;  %v2431_v31 = vpop.f32.mrb[31].mxu1  ;;  %3580 = vmatpush3.bf16.msra.mxu0 %v5372_v20  ;;  %v2473_v8 = vmax.f32 %v4123_v2, 0.0  ;;  %v4265_v20 = vld [vmem:[#allocation7 + $0x88] sm:$0xff]   ;;  %4027 = vmatprep.subr.bf16.mxu1 %v4274_v3 }
 0x994   :  { %v4126_v37 = vadd.f32 %v2431_v31, %v5348_v12  ;;  %3581 = vmatprep.subr.bf16.mxu0 %v2488_v6  ;;  %v2471_v21 = vmax.f32 %v4124_v27, 0.0  ;;  %v4323_v12 = vld [vmem:[#allocation5 + $0x14] ss:$8 sps:$4 sm:$0xff]  }
 0x995   :  { %v2474_v22 = vmax.f32 %v4125_v51, 0.0 }
 0x996   :  { %v2472_v62 = vmax.f32 %v4126_v37, 0.0  ;;  %4028 = vmatpush3.bf16.msra.mxu1 %v4274_v3 }
 0x997   :  { %v2490_v50 = vpack.c.bf16 %v2474_v22, %v2473_v8  ;;  %3582 = vmatpush3.bf16.msra.mxu0 %v5370_v40  ;;  %v4267_v40 = vld [vmem:[#allocation7 + $0x98] sm:$0xff]   ;;  %4029 = vmatprep.subr.bf16.mxu1 %v4275_v56 }
 0x998   :  { %v2489_v61 = vpack.c.bf16 %v2472_v62, %v2471_v21 }
 0x99a   :  { %3583 = vmatprep.subr.bf16.mxu0 %v2489_v61  ;;  %4030 = vmatpush3.bf16.msra.mxu1 %v4275_v56 }
 0x99b   :  { %3584 = vmatpush3.bf16.msra.mxu0 %v5380_v63  ;;  %v4327_v63 = vld [vmem:[#allocation5 + $0x34] ss:$8 sps:$4 sm:$0xff]   ;;  %4031 = vmatprep.subr.bf16.mxu1 %v4276_v5 }
 0x99c   :  { %3585 = vmatprep.subr.bf16.mxu0 %v2490_v50 }
 0x99e   :  { %4032 = vmatpush3.bf16.msra.mxu1 %v4276_v5 }
 0x99f   :  { %3586 = vmatpush3.bf16.msra.mxu0 %v5378_v48  ;;  %v4326_v48 = vld [vmem:[#allocation5 + $0x20] ss:$8 sps:$4 sm:$0xff]   ;;  %4033 = vmatprep.subr.bf16.mxu1 %v4277_v52 }
 0x9a0   :  { %3991 = vmatprep.subr.bf16.mxu0 %v4264_v9 }
 0x9a2   :  { %2524 = vmatmul.mubr.bf16.vlgmr.msra.gmra.mrb[144].mxu0 %v4322_v13  ;;  %4034 = vmatpush3.bf16.msra.mxu1 %v4277_v52 }
 0x9a3   :  { %2531 = vmatprep.mubr.bf16.mxu0 %v4323_v12  ;;  %3992 = vmatpush3.bf16.msra.mxu0 %v4264_v9 }
 0x9a4   :  { %3993 = vmatprep.subr.bf16.mxu0 %v4265_v20 }
 0x9a7   :  { %3994 = vmatpush3.bf16.msra.mxu0 %v4265_v20 }
 0x9a8   :  { %3995 = vmatprep.subr.bf16.mxu0 %v4266_v41 }
 0x9aa   :  { %2532 = vmatmul.mubr.bf16.gmra.mrb[148].mxu0 %v4324_v42 }
 0x9ab   :  { %2539 = vmatprep.mubr.bf16.mxu0 %v4325_v32  ;;  %3996 = vmatpush3.bf16.msra.mxu0 %v4266_v41 }
 0x9ac   :  { %3997 = vmatprep.subr.bf16.mxu0 %v4267_v40 }
 0x9af   :  { %3998 = vmatpush3.bf16.msra.mxu0 %v4267_v40 }
 0x9b0   :  { %3999 = vmatprep.subr.bf16.mxu0 %v4268_v17 }
 0x9b2   :  { %2540 = vmatmul.mubr.bf16.gmra.mrb[152].mxu0 %v4326_v48 }
 0x9b3   :  { %2547 = vmatprep.mubr.bf16.mxu0 %v4327_v63  ;;  %4000 = vmatpush3.bf16.msra.mxu0 %v4268_v17 }
 0x9b4   :  { %4001 = vmatprep.subr.bf16.mxu0 %v4269_v47 }
 0x9b7   :  { %4002 = vmatpush3.bf16.msra.mxu0 %v4269_v47 }
 0x9b8   :  { %4003 = vmatprep.subr.bf16.mxu0 %v4270_v53 }
 0x9ba   :  { %2548 = vmatmul.mubr.bf16.gmra.mrb[156].mxu0 %v4328_v38 }
 0x9bb   :  { %2555 = vmatprep.mubr.bf16.mxu0 %v4329_v60  ;;  %4004 = vmatpush3.bf16.msra.mxu0 %v4270_v53 }
 0x9bc   :  { %4005 = vmatprep.subr.bf16.mxu0 %v4271_v4 }
 0x9bf   :  { %4006 = vmatpush3.bf16.msra.mxu0 %v4271_v4 }
 0x9c2   :  { %2556 = vmatmul.mubr.bf16.gmra.mrb[160].mxu0 %v4330_v24 }
 0x9c3   :  { %2563 = vmatprep.mubr.bf16.mxu0 %v4331_v36 }
 0x9ca   :  { %2564 = vmatmul.mubr.bf16.gmra.mrb[164].mxu0 %v4332_v29 }
 0x9cb   :  { %2571 = vmatprep.mubr.bf16.mxu0 %v4333_v25 }
 0x9d2   :  { %2572 = vmatmul.mubr.bf16.gmra.mrb[168].mxu0 %v4334_v34 }
 0x9d3   :  { %2579 = vmatprep.mubr.bf16.mxu0 %v4335_v7 }
 0x9da   :  { %2580 = vmatmul.mubr.bf16.gmra.mrb[172].mxu0 %v4336_v18 }
 0xa75   :  { %v3587_v59 = vpop.f32.mrb[144].mxu0 }
 0xa76   :  { %v3588_v58 = vpop.f32.mrb[145].mxu0 }
 0xa77   :  { %v3589_v0 = vadd.f32 %v3588_v58, %v3587_v59  ;;  %v3590_v6 = vpop.f32.mrb[146].mxu0 }
 0xa78   :  { %v3591_v1 = vpop.f32.mrb[147].mxu0 }
 0xa79   :  { %v3592_v44 = vadd.f32 %v3591_v1, %v3590_v6  ;;  %v2526_v2 = vadd.f32 %v3589_v0, %v5281_v15 }
 0xa7b   :  { %v2529_v55 = vadd.f32 %v3592_v44, %v5285_v11 }
 0xa7d   :  { %v3593_v27 = vpop.f32.mrb[148].mxu0  ;;  %v2588_v16 = vpack.c.bf16 %v2529_v55, %v2526_v2 }
 0xa7e   :  { %v3594_v51 = vpop.f32.mrb[149].mxu0 }
 0xa7f   :  { %v3595_v31 = vadd.f32 %v3594_v51, %v3593_v27  ;;  %v3596_v37 = vpop.f32.mrb[150].mxu0  ;;  %4007 = vmatprep.mubr.bf16.mxu0 %v2588_v16 }
 0xa80   :  { %v3597_v8 = vpop.f32.mrb[151].mxu0 }
 0xa81   :  { %v3598_v22 = vadd.f32 %v3597_v8, %v3596_v37  ;;  %v2534_v21 = vadd.f32 %v3595_v31, %v5287_v46  ;;  %v4278_v37 = vld [vmem:[#allocation8 + $0xb0] sm:$0xff]  }
 0xa82   :  { %4035 = vmatprep.subr.bf16.mxu1 %v4278_v37 }
 0xa83   :  { %v2537_v62 = vadd.f32 %v3598_v22, %v5283_v43  ;;  %4036 = vmatpush3.bf16.msra.mxu1 %v4278_v37  ;;  %v4284_v37 = vld [vmem:[#allocation10 + $0x20] sm:$0xff]  }
 0xa85   :  { %v2589_v50 = vpack.c.bf16 %v2537_v62, %v2534_v21  ;;  %v3599_v61 = vpop.f32.mrb[152].mxu0 }
 0xa86   :  { %v3600_v9 = vpop.f32.mrb[153].mxu0 }
 0xa87   :  { %v3601_v20 = vadd.f32 %v3600_v9, %v3599_v61  ;;  %v3602_v13 = vpop.f32.mrb[154].mxu0  ;;  %4008 = vmatmul.mubr.bf16.vlgmr.msra.gmra.mrb[176].mxu0 %v2589_v50 }
 0xa88   :  { %v3603_v15 = vpop.f32.mrb[155].mxu0 }
 0xa89   :  { %v3604_v11 = vadd.f32 %v3603_v15, %v3602_v13  ;;  %v2542_v12 = vadd.f32 %v3601_v20, %v5293_v33 }
 0xa8b   :  { %v2545_v41 = vadd.f32 %v3604_v11, %v5297_v45 }
 0xa8d   :  { %v3605_v40 = vpop.f32.mrb[156].mxu0  ;;  %v2590_v42 = vpack.c.bf16 %v2545_v41, %v2542_v12 }
 0xa8e   :  { %v3606_v32 = vpop.f32.mrb[157].mxu0 }
 0xa8f   :  { %v3607_v48 = vadd.f32 %v3606_v32, %v3605_v40  ;;  %v3608_v63 = vpop.f32.mrb[158].mxu0  ;;  %4011 = vmatprep.mubr.bf16.mxu0 %v2590_v42 }
 0xa90   :  { %v3609_v46 = vpop.f32.mrb[159].mxu0 }
 0xa91   :  { %v3610_v43 = vadd.f32 %v3609_v46, %v3608_v63  ;;  %v2550_v38 = vadd.f32 %v3607_v48, %v5299_v10 }
 0xa93   :  { %v2553_v60 = vadd.f32 %v3610_v43, %v5295_v28 }
 0xa95   :  { %v3611_v24 = vpop.f32.mrb[160].mxu0  ;;  %v2591_v36 = vpack.c.bf16 %v2553_v60, %v2550_v38 }
 0xa96   :  { %v3612_v29 = vpop.f32.mrb[161].mxu0 }
 0xa97   :  { %v3613_v25 = vadd.f32 %v3612_v29, %v3611_v24  ;;  %v3614_v34 = vpop.f32.mrb[162].mxu0  ;;  %4012 = vmatmul.mubr.bf16.gmra.mrb[180].mxu0 %v2591_v36 }
 0xa98   :  { %v3615_v33 = vpop.f32.mrb[163].mxu0 }
 0xa99   :  { %v3616_v45 = vadd.f32 %v3615_v33, %v3614_v34  ;;  %v2558_v7 = vadd.f32 %v3613_v25, %v5305_v26 }
 0xa9b   :  { %v2561_v18 = vadd.f32 %v3616_v45, %v5309_v14 }
 0xa9d   :  { %v3617_v17 = vpop.f32.mrb[164].mxu0  ;;  %v2592_v47 = vpack.c.bf16 %v2561_v18, %v2558_v7 }
 0xa9e   :  { %v3618_v53 = vpop.f32.mrb[165].mxu0 }
 0xa9f   :  { %v3619_v4 = vadd.f32 %v3618_v53, %v3617_v17  ;;  %v3620_v23 = vpop.f32.mrb[166].mxu0  ;;  %4015 = vmatprep.mubr.bf16.mxu0 %v2592_v47 }
 0xaa0   :  { %v3621_v10 = vpop.f32.mrb[167].mxu0 }
 0xaa1   :  { %v3622_v28 = vadd.f32 %v3621_v10, %v3620_v23  ;;  %v2566_v19 = vadd.f32 %v3619_v4, %v5311_v54 }
 0xaa3   :  { %v2569_v3 = vadd.f32 %v3622_v28, %v5307_v57 }
 0xaa5   :  { %v3623_v56 = vpop.f32.mrb[168].mxu0  ;;  %v2593_v5 = vpack.c.bf16 %v2569_v3, %v2566_v19 }
 0xaa6   :  { %v3624_v52 = vpop.f32.mrb[169].mxu0 }
 0xaa7   :  { %v3625_v59 = vadd.f32 %v3624_v52, %v3623_v56  ;;  %v3626_v58 = vpop.f32.mrb[170].mxu0  ;;  %4016 = vmatmul.mubr.bf16.gmra.mrb[184].mxu0 %v2593_v5 }
 0xaa8   :  { %v3627_v26 = vpop.f32.mrb[171].mxu0 }
 0xaa9   :  { %v3628_v14 = vadd.f32 %v3627_v26, %v3626_v58  ;;  %v2574_v0 = vadd.f32 %v3625_v59, %v5317_v49  ;;  %v4279_v49 = vld [vmem:[#allocation8 + $0xb8] sm:$0xff]  }
 0xaaa   :  { %4037 = vmatprep.subr.bf16.mxu1 %v4279_v49 }
 0xaab   :  { %v2577_v6 = vadd.f32 %v3628_v14, %v5321_v30  ;;  %4038 = vmatpush3.bf16.msra.mxu1 %v4279_v49  ;;  %v3262_v30 = vld [vmem:[%s5471_s7 + $0x2] ss:$0 sm:$0xff]  ;;  %v4285_v49 = vld [vmem:[#allocation10 + $0x28] sm:$0xff]  }
 0xaad   :  { %v3629_v1 = vpop.f32.mrb[172].mxu0  ;;  %v2594_v44 = vpack.c.bf16 %v2577_v6, %v2574_v0 }
 0xaae   :  { %v3630_v2 = vpop.f32.mrb[173].mxu0 }
 0xaaf   :  { %v3631_v55 = vadd.f32 %v3630_v2, %v3629_v1  ;;  %v3632_v27 = vpop.f32.mrb[174].mxu0  ;;  %4019 = vmatprep.mubr.bf16.mxu0 %v2594_v44 }
 0xab0   :  { %v3633_v54 = vpop.f32.mrb[175].mxu0 }
 0xab1   :  { %v3634_v57 = vadd.f32 %v3633_v54, %v3632_v27  ;;  %v2582_v16 = vadd.f32 %v3631_v55, %v5323_v39  ;;  %v4487_v54 = vmov 0.0  }
 0xab2   :  { %4055 = vmatprep.subr.bf16.mxu0 %v4487_v54  ;;  %4075 = vmatprep.subr.bf16.mxu1 %v4487_v54 }
 0xab3   :  { %v2585_v51 = vadd.f32 %v3634_v57, %v5319_v35  ;;  %v4280_v57 = vld [vmem:[#allocation10] sm:$0xff]  }
 0xab5   :  { %v2595_v31 = vpack.c.bf16 %v2585_v51, %v2582_v16  ;;  %v4281_v16 = vld [vmem:[#allocation10 + $0x8] sm:$0xff]   ;;  %v4282_v51 = vld [vmem:[#allocation10 + $0x10] sm:$0xff]  }
 0xab7   :  { %4020 = vmatmul.mubr.bf16.gmra.mrb[188].mxu0 %v2595_v31  ;;  %v4283_v31 = vld [vmem:[#allocation10 + $0x18] sm:$0xff]  }
 0xab8   :  { %4071 = vmatprep.mubr.msk.bf16.mxu0 %vm4488_vm2, %v4487_v54 }
 0xb5a   :  { %v4009_v8 = vpop.f32.mrb[176].mxu0 }
 0xb5b   :  { %v2712_v22 = vadd.f32 %v4009_v8, %v3262_v30  ;;  %v2703_v21 = vpop.f32.mrb[177].mxu0 }
 0xb5c   :  { %v2704_v62 = vadd.f32 %v3262_v30, %v2703_v21  ;;  %v4010_v50 = vpop.f32.mrb[178].mxu0 }
 0xb5d   :  { %v2715_v39 = vadd.f32 %v4010_v50, %v3262_v30  ;;  %v2706_v61 = vpop.f32.mrb[179].mxu0  ;;  %v2768_v9 = vmax.f32 %v2712_v22, 0.0  ;;  %v3272_v22 = vld [vmem:[%s5473_s9 + $0x2] ss:$0 sm:$0xff] }
 0xb5e   :  { %v2707_v35 = vadd.f32 %v3262_v30, %v2706_v61  ;;  %v2766_v13 = vmax.f32 %v2704_v62, 0.0 }
 0xb5f   :  { %v2769_v20 = vmax.f32 %v2715_v39, 0.0 }
 0xb60   :  { %v2767_v15 = vmax.f32 %v2707_v35, 0.0 }
 0xb61   :  { %v2783_v11 = vpack.c.bf16 %v2769_v20, %v2768_v9 }
 0xb62   :  { %v2782_v12 = vpack.c.bf16 %v2767_v15, %v2766_v13 }
 0xb64   :  { %4039 = vmatprep.mubr.bf16.mxu1 %v2782_v12 }
 0xb65   :  { %4040 = vmatmul.mubr.bf16.vlgmr.msra.gmra.mrb[144].mxu1 %v2783_v11 }
 0xb66   :  { %4076 = vmatpush3.bf16.msra.mxu1 %v4280_v57 }
 0xb67   :  { %4077 = vmatprep.subr.bf16.mxu1 %v4487_v54 }
 0xb6a   :  { %v4013_v41 = vpop.f32.mrb[180].mxu0  ;;  %4078 = vmatpush3.bf16.msra.mxu1 %v4281_v16 }
 0xb6b   :  { %v2728_v40 = vadd.f32 %v4013_v41, %v3262_v30  ;;  %v2719_v42 = vpop.f32.mrb[181].mxu0  ;;  %4079 = vmatprep.subr.bf16.mxu1 %v4487_v54 }
 0xb6c   :  { %v2720_v32 = vadd.f32 %v3262_v30, %v2719_v42  ;;  %v4014_v48 = vpop.f32.mrb[182].mxu0 }
 0xb6d   :  { %v2731_v63 = vadd.f32 %v4014_v48, %v3262_v30  ;;  %v2722_v46 = vpop.f32.mrb[183].mxu0  ;;  %v2772_v38 = vmax.f32 %v2728_v40, 0.0 }
 0xb6e   :  { %v2723_v43 = vadd.f32 %v3262_v30, %v2722_v46  ;;  %v2770_v24 = vmax.f32 %v2720_v32, 0.0  ;;  %4080 = vmatpush3.bf16.msra.mxu1 %v4282_v51 }
 0xb6f   :  { %v2773_v60 = vmax.f32 %v2731_v63, 0.0  ;;  %4081 = vmatprep.subr.bf16.mxu1 %v4487_v54 }
 0xb70   :  { %v2771_v36 = vmax.f32 %v2723_v43, 0.0 }
 0xb71   :  { %v2785_v29 = vpack.c.bf16 %v2773_v60, %v2772_v38 }
 0xb72   :  { %v2784_v25 = vpack.c.bf16 %v2771_v36, %v2770_v24  ;;  %4082 = vmatpush3.bf16.msra.mxu1 %v4283_v31 }
 0xb73   :  { %4083 = vmatprep.subr.bf16.mxu1 %v4487_v54 }
 0xb74   :  { %4043 = vmatprep.mubr.bf16.mxu1 %v2784_v25 }
 0xb75   :  { %4044 = vmatmul.mubr.bf16.gmra.mrb[148].mxu1 %v2785_v29 }
 0xb76   :  { %4084 = vmatpush3.bf16.msra.mxu1 %v4284_v37 }
 0xb77   :  { %4085 = vmatprep.subr.bf16.mxu1 %v4487_v54 }
 0xb7a   :  { %v4017_v34 = vpop.f32.mrb[184].mxu0  ;;  %4086 = vmatpush3.bf16.msra.mxu1 %v4285_v49 }
 0xb7b   :  { %v2744_v33 = vadd.f32 %v4017_v34, %v3262_v30  ;;  %v2735_v45 = vpop.f32.mrb[185].mxu0  ;;  %4087 = vmatprep.subr.bf16.mxu1 %v4487_v54 }
 0xb7c   :  { %v2736_v7 = vadd.f32 %v3262_v30, %v2735_v45  ;;  %v4018_v18 = vpop.f32.mrb[186].mxu0 }
 0xb7d   :  { %v2747_v17 = vadd.f32 %v4018_v18, %v3262_v30  ;;  %v2738_v47 = vpop.f32.mrb[187].mxu0  ;;  %v2776_v4 = vmax.f32 %v2744_v33, 0.0 }
 0xb7e   :  { %v2739_v53 = vadd.f32 %v3262_v30, %v2738_v47  ;;  %v2774_v10 = vmax.f32 %v2736_v7, 0.0 }
 0xb7f   :  { %v2777_v23 = vmax.f32 %v2747_v17, 0.0 }
 0xb80   :  { %v2775_v28 = vmax.f32 %v2739_v53, 0.0 }
 0xb81   :  { %v2787_v19 = vpack.c.bf16 %v2777_v23, %v2776_v4 }
 0xb82   :  { %v2786_v3 = vpack.c.bf16 %v2775_v28, %v2774_v10 }
 0xb84   :  { %4047 = vmatprep.mubr.bf16.mxu1 %v2786_v3  ;;  %v2960_v3 = vld [vmem:[%s5474_s10] sm:$0x3]  ;;  %s4447_s10 = scalar_lea.vmem %s3129_s15, 64 }
 0xb85   :  { %4048 = vmatmul.mubr.bf16.gmra.mrb[152].mxu1 %v2787_v19  ;;  %p4448_p12 = scmp.ne.s32.totalorder %s3129_s15, %s4447_s10  ;;  %p4453_p0 = scmp.lt.s32.totalorder %s4447_s10, %s4447_s10 }
 0xb87   :  { %p4454_p1 = por %p4453_p0, %p4452_p13 }
 0xb89   :  { %p4455_p2 = pnand %p4454_p1, %p4448_p12 }
 0xb8a   :  { %v4021_v56 = vpop.f32.mrb[188].mxu0 }
 0xb8b   :  { %v2760_v5 = vadd.f32 %v4021_v56, %v3262_v30  ;;  %v2751_v52 = vpop.f32.mrb[189].mxu0  ;;  %v4287_v56 = vld [vmem:[#allocation10 + $0x38] sm:$0xff]  }
 0xb8c   :  { %v2752_v59 = vadd.f32 %v3262_v30, %v2751_v52  ;;  %v4022_v58 = vpop.f32.mrb[190].mxu0 }
 0xb8d   :  { %v2763_v26 = vadd.f32 %v4022_v58, %v3262_v30  ;;  %v2754_v14 = vpop.f32.mrb[191].mxu0  ;;  %v2780_v6 = vmax.f32 %v2760_v5, 0.0 }
 0xb8e   :  { %v2755_v0 = vadd.f32 %v3262_v30, %v2754_v14  ;;  %v2778_v44 = vmax.f32 %v2752_v59, 0.0  ;;  %v4286_v30 = vld [vmem:[#allocation10 + $0x30] sm:$0xff]   ;;  %v3281_v14 = vld [vmem:[%s5476_s12] ss:$0 sm:$0xff] }
 0xb8f   :  { %v2781_v1 = vmax.f32 %v2763_v26, 0.0  ;;  %4088 = vmatpush3.bf16.msra.mxu1 %v4286_v30 }
 0xb90   :  { %v2779_v2 = vmax.f32 %v2755_v0, 0.0  ;;  %4089 = vmatprep.subr.bf16.mxu1 %v4487_v54 }
 0xb91   :  { %v2789_v55 = vpack.c.bf16 %v2781_v1, %v2780_v6 }
 0xb92   :  { %v2788_v27 = vpack.c.bf16 %v2779_v2, %v2778_v44 }
 0xb93   :  { %4090 = vmatpush3.bf16.msra.mxu1 %v4287_v56 }
 0xb94   :  { %4051 = vmatprep.mubr.bf16.mxu1 %v2788_v27 }
 0xb95   :  { %4052 = vmatmul.mubr.bf16.gmra.mrb[156].mxu1 %v2789_v55 }
 0xb96   :  { %4091 = vmatprep.mubr.msk.bf16.mxu1 %vm4488_vm2, %v4487_v54 }
 0xc38   :  { %v4041_v8 = vpop.f32.mrb[144].mxu1 }
 0xc39   :  { %v2897_v21 = vpop.f32.mrb[145].mxu1  ;;  %v2906_v50 = vadd.f32 %v4041_v8, %v3272_v22 }
 0xc3a   :  { %v4042_v62 = vpop.f32.mrb[146].mxu1  ;;  %v2898_v35 = vadd.f32 %v3272_v22, %v2897_v21 }
 0xc3b   :  { %v2909_v39 = vadd.f32 %v4042_v62, %v3272_v22  ;;  %v2900_v61 = vpop.f32.mrb[147].mxu1 }
 0xc3c   :  { %v2901_v9 = vadd.f32 %v3272_v22, %v2900_v61 }
 0xc3d   :  { %v2962_v20 = vpack.c.bf16 %v2909_v39, %v2906_v50 }
 0xc3e   :  { %v2961_v13 = vpack.c.bf16 %v2901_v9, %v2898_v35 }
 0xc40   :  { %4056 = vmatpush3.bf16.msra.mxu0 %v2961_v13 }
 0xc41   :  { %4057 = vmatprep.subr.bf16.mxu0 %v4487_v54 }
 0xc44   :  { %4058 = vmatpush3.bf16.msra.mxu0 %v2962_v20 }
 0xc45   :  { %4059 = vmatprep.subr.bf16.mxu0 %v4487_v54 }
 0xc48   :  { %v4045_v15 = vpop.f32.mrb[148].mxu1 }
 0xc49   :  { %v2913_v11 = vpop.f32.mrb[149].mxu1  ;;  %v2922_v41 = vadd.f32 %v4045_v15, %v3272_v22 }
 0xc4a   :  { %v4046_v12 = vpop.f32.mrb[150].mxu1  ;;  %v2914_v32 = vadd.f32 %v3272_v22, %v2913_v11 }
 0xc4b   :  { %v2925_v40 = vadd.f32 %v4046_v12, %v3272_v22  ;;  %v2916_v42 = vpop.f32.mrb[151].mxu1 }
 0xc4c   :  { %v2917_v48 = vadd.f32 %v3272_v22, %v2916_v42 }
 0xc4d   :  { %v2964_v63 = vpack.c.bf16 %v2925_v40, %v2922_v41 }
 0xc4e   :  { %v2963_v46 = vpack.c.bf16 %v2917_v48, %v2914_v32 }
 0xc50   :  { %4060 = vmatpush3.bf16.msra.mxu0 %v2963_v46 }
 0xc51   :  { %4061 = vmatprep.subr.bf16.mxu0 %v4487_v54 }
 0xc54   :  { %4062 = vmatpush3.bf16.msra.mxu0 %v2964_v63 }
 0xc55   :  { %4063 = vmatprep.subr.bf16.mxu0 %v4487_v54 }
 0xc58   :  { %v4049_v43 = vpop.f32.mrb[152].mxu1 }
 0xc59   :  { %v2929_v38 = vpop.f32.mrb[153].mxu1  ;;  %v2938_v24 = vadd.f32 %v4049_v43, %v3272_v22 }
 0xc5a   :  { %v4050_v60 = vpop.f32.mrb[154].mxu1  ;;  %v2930_v25 = vadd.f32 %v3272_v22, %v2929_v38 }
 0xc5b   :  { %v2941_v36 = vadd.f32 %v4050_v60, %v3272_v22  ;;  %v2932_v29 = vpop.f32.mrb[155].mxu1 }
 0xc5c   :  { %v2933_v34 = vadd.f32 %v3272_v22, %v2932_v29 }
 0xc5d   :  { %v2966_v33 = vpack.c.bf16 %v2941_v36, %v2938_v24 }
 0xc5e   :  { %v2965_v45 = vpack.c.bf16 %v2933_v34, %v2930_v25 }
 0xc60   :  { %4064 = vmatpush3.bf16.msra.mxu0 %v2965_v45 }
 0xc61   :  { %4065 = vmatprep.subr.bf16.mxu0 %v4487_v54 }
 0xc64   :  { %4066 = vmatpush3.bf16.msra.mxu0 %v2966_v33 }
 0xc65   :  { %4067 = vmatprep.subr.bf16.mxu0 %v4487_v54 }
 0xc68   :  { %v4053_v7 = vpop.f32.mrb[156].mxu1 }
 0xc69   :  { %v2945_v18 = vpop.f32.mrb[157].mxu1  ;;  %v2954_v47 = vadd.f32 %v4053_v7, %v3272_v22 }
 0xc6a   :  { %v4054_v17 = vpop.f32.mrb[158].mxu1  ;;  %v2946_v23 = vadd.f32 %v3272_v22, %v2945_v18 }
 0xc6b   :  { %v2957_v53 = vadd.f32 %v4054_v17, %v3272_v22  ;;  %v2948_v4 = vpop.f32.mrb[159].mxu1 }
 0xc6c   :  { %v2949_v10 = vadd.f32 %v3272_v22, %v2948_v4 }
 0xc6d   :  { %v2968_v28 = vpack.c.bf16 %v2957_v53, %v2954_v47 }
 0xc6e   :  { %v2967_v19 = vpack.c.bf16 %v2949_v10, %v2946_v23 }
 0xc70   :  { %4068 = vmatpush3.bf16.msra.mxu0 %v2967_v19 }
 0xc71   :  { %4069 = vmatprep.subr.bf16.mxu0 %v4487_v54 }
 0xc74   :  { %4070 = vmatpush3.bf16.msra.mxu0 %v2968_v28 }
 0xc77   :  { %4072 = vmatmul.mubr.bf16.vlgmr.msra.gmra.mrb[192].mxu0 %v2960_v3 }
 0xd4a   :  { %v3003_v5 = vpop.f32.mrb[192].mxu0 }
 0xd4b   :  { %v3009_v52 = vpack.c.bf16 %v3003_v5, %v3003_v5  ;;  %v4073_v59 = vpop.f32.mrb[193].mxu0 }
 0xd4c   :  { %v3006_v58 = vpop.f32.mrb[194].mxu0 }
 0xd4d   :  { %v4074_v26 = vpop.f32.mrb[195].mxu0  ;;  %4092 = vmatmul.mubr.bf16.vlgmr.msra.gmra.mrb[160].mxu1 %v3009_v52 }
 0xe20   :  { %v3115_v0 = vpop.f32.mrb[160].mxu1 }
 0xe21   :  { %v3116_v6 = vadd.f32 %v3281_v14, %v3115_v0  ;;  %v4093_v1 = vpop.f32.mrb[161].mxu1 }
 0xe22   :  { %v3118_v44 = vpop.f32.mrb[162].mxu1 }
 0xe23   :  { %3121 = vst [vmem:[#allocation11] sm:$0xf] %v3116_v6  ;;  %v4094_v2 = vpop.f32.mrb[163].mxu1 }
 0xe24   :  { %4458 = shalt.err (!%p4455_p2)
}
 0xe25   :  { %s4459_s12 = scalar_lea.hbm %s5477_s13, 64 }
 0xe26   :  { %p4460_p3 = scmp.ne.s32.totalorder %s5477_s13, %s4459_s12  ;;  %p4463_p4 = scmp.lt.u32.totalorder %s4459_s12, %s5477_s13 }
 0xe28   :  { %p4465_p5 = pnand %p4463_p4, %p4460_p3 }
 0xe2a   :  { %4468 = shalt.err (!%p4465_p5)
}
 0xe2b   :  { %3131 = dma.vmem_to_hbm [thread:$0]  %s3129_s15, 64, %s5477_s13, [#allocation4]  }
 0xe2c   :  { %4475 = dma.done.wait [#allocation4], 64  }
 0xe2d   :  { %4476 = vsyncadd [#allocation4], 4294967232 }
 0xe2e   :  { %3135 = vsyncpa [#allocation3], 1 }
 0xe2f   :  { %3136 = vsyncpa [#allocation6], 1 }
 0xe30   :  { %3137 = vsyncpa [#allocation9], 1 }
 0xe31   :  { %3138 = vsyncpa [#allocation4], 1 }

</bundles_post_ra>
